<compile_context>
chip_gen: v7x
topology: tpu7x:2x2x1
jax: 0.10.0
libtpu: 0.0.40
codegen_flags: <defaults>
</compile_context>

<pallas_src>
import math

import jax
import jax.numpy as jnp
from jax import lax
from jax.experimental import pallas as pl
from jax.experimental.pallas import tpu as pltpu


def _round_up(x: int, m: int) -> int:
    return ((x + m - 1) // m) * m


def _cdiv(a: int, b: int) -> int:
    return (a + b - 1) // b


# ---------------------------------------------------------------------------
# Kernels
# ---------------------------------------------------------------------------
def _make_linear_kernel(has_bias: bool):
    """Build the (i, j, k) grid-step kernel for y = x @ W_t + b.

    x_ref:   (tm, tk)   activation tile
    w_ref:   (tk, tn)   weight tile, pre-transposed (K, N) layout
    b_ref:   (1, tn)    bias tile (only when has_bias)
    o_ref:   (tm, tn)   output tile (resident across the k axis)
    acc_ref: (tm, tn)   f32 VMEM accumulator
    """
    if has_bias:

        def kernel(x_ref, w_ref, b_ref, o_ref, acc_ref):
            k = pl.program_id(2)

            @pl.when(k == 0)
            def _():
                acc_ref[...] = jnp.zeros_like(acc_ref)

            # Plain (tm,tk)@(tk,tn) -> straight MXU feed, no in-kernel transpose.
            acc_ref[...] += jnp.dot(
                x_ref[...], w_ref[...], preferred_element_type=jnp.float32
            )

            @pl.when(k == pl.num_programs(2) - 1)
            def _():
                o_ref[...] = (
                    acc_ref[...] + b_ref[...].astype(jnp.float32)
                ).astype(o_ref.dtype)

        return kernel

    def kernel(x_ref, w_ref, o_ref, acc_ref):
        k = pl.program_id(2)

        @pl.when(k == 0)
        def _():
            acc_ref[...] = jnp.zeros_like(acc_ref)

        acc_ref[...] += jnp.dot(
            x_ref[...], w_ref[...], preferred_element_type=jnp.float32
        )

        @pl.when(k == pl.num_programs(2) - 1)
        def _():
            o_ref[...] = acc_ref[...].astype(o_ref.dtype)

    return kernel


# ---------------------------------------------------------------------------
# Per-generation VMEM budgeting + balanced tile selection
# ---------------------------------------------------------------------------
def _vmem_limit_bytes() -> int:
    """Scoped-VMEM limit derived from the physical per-core VMEM capacity."""
    phys = None
    try:
        info = pltpu.get_tpu_info()
        phys = getattr(info, "vmem_capacity_bytes", None)
    except Exception:  # not on a TPU / API unavailable at trace time
        phys = None
    if not phys:
        phys = 64 * 1024 * 1024  # conservative: v7x has 64 MiB per TensorCore
    # v5e/v6e (128 MiB) -> 64 MiB scoped limit; v7x (64 MiB) -> 48 MiB.
    return int(min(phys * 3 // 4, 64 * 1024 * 1024))


def _balanced_tile(dim: int, cap: int, align: int) -> int:
    """Split `dim` into ceil(dim/cap) near-equal aligned tiles (min pad waste)."""
    if dim <= cap:
        return _round_up(dim, align)
    n_tiles = _cdiv(dim, cap)
    return _round_up(_cdiv(dim, n_tiles), align)


def _pick_tiles(M, N, K, x_bytes, w_bytes, o_bytes, m_align, budget_bytes):
    # Generous caps; shrink below until the double-buffered working set fits.
    tm = _balanced_tile(M, 1024, m_align)
    tn = _balanced_tile(N, 1024, 128)
    tk = _balanced_tile(K, 2048, 128)

    def working_set(tm, tn, tk):
        return (
            2 * tm * tk * x_bytes      # x tile, double buffered
            + 2 * tk * tn * w_bytes    # W tile, double buffered
            + 2 * tm * tn * o_bytes    # output tile, double buffered
            + tm * tn * 4              # f32 accumulator scratch
            + 2 * tn * 4               # bias tile (upper bound)
        )

    while working_set(tm, tn, tk) > budget_bytes:
        if tk >= max(tm, tn) and tk > 128:
            tk = max(128, _round_up(tk // 2, 128))
        elif tn >= tm and tn > 128:
            tn = max(128, _round_up(tn // 2, 128))
        elif tm > m_align:
            tm = max(m_align, _round_up(tm // 2, m_align))
        elif tk > 128:
            tk = max(128, _round_up(tk // 2, 128))
        elif tn > 128:
            tn = max(128, _round_up(tn // 2, 128))
        else:
            break  # smallest legal tiles; let the compiler cope

    # Expose >= 2 parallel output tiles so v7x's 2 TensorCores both get work.
    # Splitting M costs nothing extra in weight traffic (W block index is
    # independent of i), so this is safe on single-TC chips too.
    if _cdiv(M, tm) * _cdiv(N, tn) < 2 and M >= 256:
        tm = _round_up(_cdiv(M, 2), m_align)

    return tm, tn, tk


# ---------------------------------------------------------------------------
# Forward wrapper
# ---------------------------------------------------------------------------
def linear_forward(x, weight, bias=None, *, use_bf16_inputs=False):
    """x: [..., K], weight: [N, K] (PyTorch layout), bias: [N] -> [..., N].

    use_bf16_inputs=True casts x and W to bf16 for the MXU (f32 accumulation
    kept).  ~2x MXU rate and half the HBM traffic; opt-in to preserve the
    original f32 nn.Linear semantics by default.
    """
    *lead, K = x.shape
    N, Kw = weight.shape
    assert K == Kw, f"in_features mismatch: x has {K}, weight has {Kw}"
    M = int(math.prod(lead)) if lead else 1
    out_dtype = x.dtype
    has_bias = bias is not None

    if M == 0:
        return jnp.zeros((*lead, N), dtype=out_dtype)

    # Tiny problems: Pallas per-grid-step overhead + masked partial stores
    # dwarf the work; let XLA's fused dot handle them.
    if M < 128 or N < 128 or K < 128:
        x2 = x.reshape(M, K)
        w2 = weight
        if use_bf16_inputs:
            x2 = x2.astype(jnp.bfloat16)
            w2 = w2.astype(jnp.bfloat16)
        y = lax.dot_general(
            x2, w2,
            dimension_numbers=(((1,), (1,)), ((), ())),
            preferred_element_type=jnp.float32,
        )
        if has_bias:
            y = y + bias.astype(jnp.float32)
        return y.astype(out_dtype).reshape(*lead, N)

    x2 = x.reshape(M, K)
    w2 = weight
    if use_bf16_inputs:
        x2 = x2.astype(jnp.bfloat16)
        w2 = w2.astype(jnp.bfloat16)
    # Pre-transpose the weight ONCE to (K, N): the kernel then runs a plain
    # (tm,tk)@(tk,tn) matmul with no per-step in-VMEM transpose.  For a static
    # model weight this transpose (and the pad/cast below) should be hoisted
    # to load time by jitting with the weight as a constant.
    w2 = w2.T  # (K, N)

    x_bytes = jnp.dtype(x2.dtype).itemsize
    w_bytes = jnp.dtype(w2.dtype).itemsize
    o_bytes = jnp.dtype(out_dtype).itemsize
    # Sub-32-bit dtypes pack two rows per sublane -> align tm to 16 then.
    m_align = 16 if min(x_bytes, o_bytes) < 4 else 8

    vmem_limit = _vmem_limit_bytes()
    tile_budget = max(16 * 1024 * 1024, vmem_limit - 8 * 1024 * 1024)
    tm, tn, tk = _pick_tiles(M, N, K, x_bytes, w_bytes, o_bytes, m_align,
                             tile_budget)

    M_p, N_p, K_p = _round_up(M, tm), _round_up(N, tn), _round_up(K, tk)

    # Zero-pad up to tile multiples (padded K contributes zero to the dot).
    if (M_p, K_p) != (M, K):
        x2 = jnp.pad(x2, ((0, M_p - M), (0, K_p - K)))
    if (K_p, N_p) != (K, N):
        w2 = jnp.pad(w2, ((0, K_p - K), (0, N_p - N)))

    grid = (M_p // tm, N_p // tn, K_p // tk)

    in_specs = [
        pl.BlockSpec((tm, tk), lambda i, j, k: (i, k)),   # x tile
        pl.BlockSpec((tk, tn), lambda i, j, k: (k, j)),   # W tile (K,N layout)
    ]
    operands = [x2, w2]
    if has_bias:
        b2 = bias if N_p == N else jnp.pad(bias, (0, N_p - N))
        b2 = b2.reshape(1, N_p)
        in_specs.append(pl.BlockSpec((1, tn), lambda i, j, k: (0, j)))
        operands.append(b2)

    flops = 2 * M_p * N_p * K_p
    bytes_accessed = (
        M_p * K_p * x_bytes * grid[1]      # x re-streamed per N tile
        + K_p * N_p * w_bytes * grid[0]    # W re-streamed per M tile
        + M_p * N_p * o_bytes
        + (N_p * 4 if has_bias else 0)
    )

    out = pl.pallas_call(
        _make_linear_kernel(has_bias),
        out_shape=jax.ShapeDtypeStruct((M_p, N_p), out_dtype),
        grid_spec=pltpu.PrefetchScalarGridSpec(
            num_scalar_prefetch=0,
            grid=grid,
            in_specs=in_specs,
            out_specs=pl.BlockSpec((tm, tn), lambda i, j, k: (i, j)),
            scratch_shapes=[pltpu.VMEM((tm, tn), jnp.float32)],
        ),
        compiler_params=pltpu.CompilerParams(
            dimension_semantics=("parallel", "parallel", "arbitrary"),
            vmem_limit_bytes=vmem_limit,
        ),
        cost_estimate=pl.CostEstimate(
            flops=flops, transcendentals=0, bytes_accessed=bytes_accessed
        ),
    )(*operands)

    if (M_p, N_p) != (M, N):
        out = out[:M, :N]
    return out.reshape(*lead, N)


# ---------------------------------------------------------------------------
# Self-test
# ---------------------------------------------------------------------------
if __name__ == "__main__":
    key = jax.random.PRNGKey(0)
    k1, k2, k3, k4 = jax.random.split(key, 4)

    def make_inputs(k, lead_shape, in_features, out_features):
        kx, kw, kb = jax.random.split(k, 3)
        x = jax.random.normal(kx, (*lead_shape, in_features), dtype=jnp.float32)
        w = jax.random.normal(kw, (out_features, in_features), dtype=jnp.float32)
        w = w * (1.0 / math.sqrt(in_features))
        b = jax.random.normal(kb, (out_features,), dtype=jnp.float32)
        return x, w, b

    # 1) Tiny module-demo shape (batch=2, seq=8, in=32, out=16) -> XLA fallback.
    x, w, b = make_inputs(k1, (2, 8), 32, 16)
    y = jax.block_until_ready(linear_forward(x, w, b))
    y_ref = x @ w.T + b
    assert y.shape == (2, 8, 16)
    assert jnp.allclose(y, y_ref, atol=1e-4, rtol=1e-4)

    # 2) MXU-aligned shape -> tiled Pallas path (weight-resident, M split in 2
    #    for the v7x parallel axes).
    x, w, b = make_inputs(k2, (2, 256), 1024, 512)
    y = jax.block_until_ready(linear_forward(x, w, b))
    y_ref = x @ w.T + b
    assert y.shape == (2, 256, 512)
    assert jnp.allclose(y, y_ref, atol=2e-2, rtol=2e-2)

    # 3) Ragged (non-tile-multiple) shape, no bias -> bias-less kernel variant,
    #    balanced tiles + zero padding + slice.
    x, w, _ = make_inputs(k3, (2, 72), 200, 136)
    y = jax.block_until_ready(linear_forward(x, w, None))
    y_ref = x @ w.T
    assert y.shape == (2, 72, 136)
    assert jnp.allclose(y, y_ref, atol=2e-2, rtol=2e-2)

    # 4) bf16 MXU inputs (f32 accumulation) on the same Pallas path.
    x, w, b = make_inputs(k4, (2, 256), 1024, 512)
    y = jax.block_until_ready(linear_forward(x, w, b, use_bf16_inputs=True))
    y_ref = x @ w.T + b
    assert y.shape == (2, 256, 512)
    assert jnp.allclose(y, y_ref, atol=1e-1, rtol=1e-1)

    print("KERNEL_OK")
</pallas_src>

<mosaic_0001>
module attributes {stable_mosaic.version = 11 : i64} {
  func.func @kernel(%arg0: i32, %arg1: i32, %arg2: i32, %arg3: memref<256x1024xf32, #tpu.memory_space<vmem>>, %arg4: memref<1024x512xf32, #tpu.memory_space<vmem>>, %arg5: memref<1x512xf32, #tpu.memory_space<vmem>>, %arg6: memref<256x512xf32, #tpu.memory_space<vmem>>, %arg7: memref<256x512xf32, #tpu.memory_space<vmem>>) attributes {dimension_semantics = [#tpu.dimension_semantics<parallel>, #tpu.dimension_semantics<parallel>, #tpu.dimension_semantics<arbitrary>], iteration_bounds = array<i64: 2, 1, 1>, scalar_prefetch = 0 : i64, scratch_operands = 1 : i64, tpu.core_type = #tpu.core_type<tc>, window_params = [{transform_indices = @transform_0, window_bounds = array<i64: 256, 1024>}, {transform_indices = @transform_1, window_bounds = array<i64: 1024, 512>}, {transform_indices = @transform_2, window_bounds = array<i64: 1, 512>}, {transform_indices = @transform_3, window_bounds = array<i64: 256, 512>}]} {
    %c0_i32 = arith.constant 0 : i32
    %0 = arith.cmpi eq, %arg2, %c0_i32 : i32
    %1 = arith.extui %0 : i1 to i32
    %c0_i32_0 = arith.constant 0 : i32
    %2 = arith.cmpi ne, %1, %c0_i32_0 : i32
    scf.if %2 {
      %cst_10 = arith.constant 0.000000e+00 : f32
      %12 = vector.broadcast %cst_10 : f32 to vector<256x512xf32>
      %c0_11 = arith.constant 0 : index
      %c0_12 = arith.constant 0 : index
      %13 = vector.load %arg7[%c0_11, %c0_12] : memref<256x512xf32, #tpu.memory_space<vmem>>, vector<256x512xf32>
      tpu.vector_store %arg7[%c0_11, %c0_12], %12 {strides = array<i32>} : memref<256x512xf32, #tpu.memory_space<vmem>>, vector<256x512xf32>,
    } else {
    }
    %c0 = arith.constant 0 : index
    %c0_1 = arith.constant 0 : index
    %3 = vector.load %arg7[%c0, %c0_1] : memref<256x512xf32, #tpu.memory_space<vmem>>, vector<256x512xf32>
    %c0_2 = arith.constant 0 : index
    %c0_3 = arith.constant 0 : index
    %4 = vector.load %arg3[%c0_2, %c0_3] : memref<256x1024xf32, #tpu.memory_space<vmem>>, vector<256x1024xf32>
    %c0_4 = arith.constant 0 : index
    %c0_5 = arith.constant 0 : index
    %5 = vector.load %arg4[%c0_4, %c0_5] : memref<1024x512xf32, #tpu.memory_space<vmem>>, vector<1024x512xf32>
    %cst = arith.constant dense<0.000000e+00> : vector<256x512xf32>
    %6 = tpu.matmul %4, %5, %cst {dimension_numbers = #tpu.dot_dimension_numbers<[1], [0], [0], [1], [0, 0, 1, 1], [], []>} : vector<256x1024xf32>, vector<1024x512xf32>, vector<256x512xf32> -> vector<256x512xf32>
    %7 = arith.addf %3, %6 : vector<256x512xf32>
    %c0_6 = arith.constant 0 : index
    %c0_7 = arith.constant 0 : index
    %8 = vector.load %arg7[%c0_6, %c0_7] : memref<256x512xf32, #tpu.memory_space<vmem>>, vector<256x512xf32>
    tpu.vector_store %arg7[%c0_6, %c0_7], %7 {strides = array<i32>} : memref<256x512xf32, #tpu.memory_space<vmem>>, vector<256x512xf32>,
    %c0_i32_8 = arith.constant 0 : i32
    %9 = arith.cmpi eq, %arg2, %c0_i32_8 : i32
    %10 = arith.extui %9 : i1 to i32
    %c0_i32_9 = arith.constant 0 : i32
    %11 = arith.cmpi ne, %10, %c0_i32_9 : i32
    scf.if %11 {
      %c0_10 = arith.constant 0 : index
      %c0_11 = arith.constant 0 : index
      %12 = vector.load %arg7[%c0_10, %c0_11] : memref<256x512xf32, #tpu.memory_space<vmem>>, vector<256x512xf32>
      %c0_12 = arith.constant 0 : index
      %c0_13 = arith.constant 0 : index
      %13 = vector.load %arg5[%c0_12, %c0_13] : memref<1x512xf32, #tpu.memory_space<vmem>>, vector<1x512xf32>
      %14 = vector.broadcast %13 : vector<1x512xf32> to vector<256x512xf32>
      %15 = arith.addf %12, %14 : vector<256x512xf32>
      %c0_14 = arith.constant 0 : index
      %c0_15 = arith.constant 0 : index
      %16 = vector.load %arg6[%c0_14, %c0_15] : memref<256x512xf32, #tpu.memory_space<vmem>>, vector<256x512xf32>
      tpu.vector_store %arg6[%c0_14, %c0_15], %15 {strides = array<i32>} : memref<256x512xf32, #tpu.memory_space<vmem>>, vector<256x512xf32>,
    } else {
    }
    return
  }
  func.func @transform_0(%arg0: i32, %arg1: i32, %arg2: i32) -> (i32, i32) {
    %c0_i32 = arith.constant 0 : i32
    return %arg0, %arg2 : i32, i32
  }
  func.func @transform_1(%arg0: i32, %arg1: i32, %arg2: i32) -> (i32, i32) {
    %c0_i32 = arith.constant 0 : i32
    return %arg2, %arg1 : i32, i32
  }
  func.func @transform_2(%arg0: i32, %arg1: i32, %arg2: i32) -> (i32, i32) {
    %c0_i32 = arith.constant 0 : i32
    %c0_i32_0 = arith.constant 0 : i32
    return %c0_i32, %arg1 : i32, i32
  }
  func.func @transform_3(%arg0: i32, %arg1: i32, %arg2: i32) -> (i32, i32) {
    %c0_i32 = arith.constant 0 : i32
    return %arg0, %arg1 : i32, i32
  }
}

</mosaic_0001>

<bundles_post_ra>
// kernel: tpu_custom_call.1
= control target key start
LH: loop header
LB: loop body
LE: loop exit
PB: predicated region body
PF: predicated region fallthrough
CT: control target
= control target key end

     0   :  { %8 = vsyncpa [#allocation4], 0  ;;  %s6147_s0 = inlined_call_operand.hbm [shape: f32[512,1024], index: 0, kind: input, shape index: {}]   ;;  %s6148_s1 = inlined_call_operand.hbm [shape: f32[1024,512], index: 1, kind: input, shape index: {}]   ;;  %s6149_s2 = inlined_call_operand.hbm [shape: f32[1,512], index: 2, kind: input, shape index: {}]   ;;  %s6150_s3 = inlined_call_operand.hbm [shape: f32[512,512], index: 3, kind: output, shape index: {}]  }
   0x1   :  { %10 = vsyncpa [#allocation4 + $0x1], 0 }
   0x2   :  { %11 = vsyncpa [#allocation7], 0 }
   0x3   :  { %12 = vsyncpa [#allocation5], 0 }
   0x4   :  { %14 = vsyncpa [#allocation5 + $0x1], 0  ;;  %s5366_s12 = smov 0   ;;  %s5368_s13 = smov 0  }
   0x5   :  { %s5370_s14 = smov 0   ;;  %s5372_s15 = smov 0  }
   0x6   :  { %s5374_s16 = smov 0   ;;  %s5376_s17 = smov 0  }
   0x7 LB: > { %s4152_s18 = sadd.s32 4294967295, %s5334_s17   ;;  %s4153_s19 = sadd.s32 4294967294, %s5334_s17   ;;  %s5334_s17 = sphi %s5376_s17, %s20_s17   ;;  %s5330_s16 = sphi %s5374_s16, %s6172_s16   ;;  %s5326_s15 = sphi %s5372_s15, %s6171_s15   ;;  %s5322_s14 = sphi %s5370_s14, %s6170_s14   ;;  %s5318_s13 = sphi %s5368_s13, %s6169_s13   ;;  %s5314_s12 = sphi %s5366_s12, %s6168_s12  }
   0x8   : > { %p61_p0 = scmp.ne.s32.totalorder %s5318_s13, %s5314_s12  ;;  %p5400_p1 = scmp.eq.s32.totalorder %s4152_s18, 0 }
   0x9   : > { %p5404_p2 = scmp.eq.s32.totalorder %s4152_s18, 1  ;;  %p147_p3 = scmp.eq.s32.totalorder %s4153_s19, 1 }
   0xa   : > { %s6155_s20 = scalar_select %p5400_p1, 1, 0 }
   0xb   : > { %p5410_p4 = por %p5400_p1, %p61_p0  ;;  %p4154_p5 = scmp.ge.s32.totalorder %s5334_s17, 1 }
   0xc   : > { %p5415_p6 = por %p147_p3, %p61_p0  ;;  %p154_p7 = scmp.lt.s32.totalorder %s5334_s17, 3 }
   0xd   : > { %s6157_s22 = scalar_select %p5410_p4, 1, 0 }
   0xe   : > { %s6158_s23 = scalar_select %p5415_p6, 1, 0 }
   0xf   : > { %p5420_p8 = pnand %p4154_p5, %p154_p7  ;;  %s5336_s25 = smov [#allocation6]  }
  0x10   : > { %s172_s26 = sshll.u32 %s5336_s25, 4  ;;  %s5337_s28 = smov [#allocation8]   ;;  %s5424_s26 = int_to_ptr.vmem [resolvable:$true] %s172_s26 }
  0x11   : > { %p5085_p9 = pneg %p5420_p8  ;;  %s189_s29 = sshll.u32 %s5337_s28, 4  ;;  %s5435_s29 = int_to_ptr.vmem [resolvable:$true] %s189_s29 }
  0x12   : > { %s5162_s5 = scalar_lea.hbm %s6148_s1, 65536 }
  0x13   : > { %p5431_p11 = pnand %p5085_p9, %p5400_p1  ;;  %p5163_p12 = scmp.ne.s32.totalorder %s6148_s1, %s5162_s5 }
  0x14   : > { %p5169_p5 = scmp.lt.u32.totalorder %s5162_s5, %s6148_s1 }
  0x15   : > { %p5164_p13 = pneg %p5431_p11 }
  0x17   : > { %p5165_p0 = pnand %p5164_p13, %p5163_p12 }
  0x19   : > { %p5166_p3 = pneg %p5165_p0 }
  0x1b   : > { %p5171_p7 = pnand %p5169_p5, %p5166_p3 }
  0x1d   : > { %5174 = shalt.err (!%p5171_p7)
}
  0x1e   : > { %s5175_s10 = scalar_lea.vmem %s5424_s26, 65536  ;;  %p5183_p1 = scmp.lt.s32.totalorder %s5424_s26, %s5424_s26 }
  0x1f   : > { %p5176_p9 = scmp.ne.s32.totalorder %s5424_s26, %s5175_s10  ;;  %p5184_p12 = scmp.lt.s32.totalorder %s5175_s10, %s5175_s10 }
  0x21   : > { %p5178_p10 = pnand %p5176_p9, %p5164_p13  ;;  %p5185_p0 = por %p5184_p12, %p5183_p1 }
  0x23   : > { %p5179_p6 = pneg %p5178_p10 }
  0x25   : > { %p5186_p4 = pnand %p5185_p0, %p5179_p6 }
  0x27   : > { %5189 = shalt.err (!%p5186_p4)
}
  0x28   : > { %s5338_s11 = smov 512   ;;  %s5339_s18 = smov 32  }
  0x29   : > { %5088 = dma.hbm_to_vmem [thread:$0]  (!%p5431_p11), %s6148_s1, 65536, %s5424_s26, [#allocation7], %s5338_s11, %s5338_s11, %s5339_s18  }
  0x2a   : > { %s5190_s4 = scalar_lea.hbm %s6149_s2, 64 }
  0x2b   : > { %p5191_p1 = scmp.ne.s32.totalorder %s6149_s2, %s5190_s4  ;;  %p5197_p10 = scmp.lt.u32.totalorder %s5190_s4, %s6149_s2 }
  0x2d   : > { %p5193_p4 = pnand %p5191_p1, %p5164_p13 }
  0x2f   : > { %p5194_p6 = pneg %p5193_p4 }
  0x31   : > { %p5199_p3 = pnand %p5197_p10, %p5194_p6 }
  0x33   : > { %5202 = shalt.err (!%p5199_p3)
}
  0x34   : > { %s5203_s26 = scalar_lea.vmem %s5435_s29, 64  ;;  %p5211_p12 = scmp.lt.s32.totalorder %s5435_s29, %s5435_s29 }
  0x35   : > { %p5204_p5 = scmp.ne.s32.totalorder %s5435_s29, %s5203_s26  ;;  %p5212_p0 = scmp.lt.s32.totalorder %s5203_s26, %s5203_s26 }
  0x37   : > { %p5206_p7 = pnand %p5204_p5, %p5164_p13  ;;  %p5213_p1 = por %p5212_p0, %p5211_p12 }
  0x39   : > { %p5207_p9 = pneg %p5206_p7 }
  0x3b   : > { %p5214_p4 = pnand %p5213_p1, %p5207_p9 }
  0x3d   : > { %5217 = shalt.err (!%p5214_p4)
}
  0x3e   : > { %5091 = dma.hbm_to_vmem [thread:$0]  (!%p5431_p11), %s6149_s2, 64, %s5435_s29, [#allocation7]  }
  0x3f   : > { %s39_s11 = sadd.s32 1, %s5330_s16  ;;  %s48_s18 = sadd.s32 1, %s5322_s14 }
  0x40   : > { %p41_p13 = scmp.ge.s32.totalorder %s39_s11, 2  ;;  %p55_p6 = scmp.ne.s32.totalorder %s5322_s14, %s5318_s13 }
  0x41   : > { %p56_p10 = scmp.eq.s32.totalorder %s5334_s17, 0  ;;  %p5102_p3 = scmp.lt.s32.totalorder %s5334_s17, 2 }
  0x42   : > { %s6174_s11 = smov (%p41_p13, %s39_s11), 0  ;;  %p5499_p7 = por %p5404_p2, %p55_p6 }
  0x43   : > { %p57_p5 = por %p56_p10, %p55_p6  ;;  %s43_s19 = ssub.s32 %s5330_s16, %s6174_s11 }
  0x44   : > { %s6161_s27 = scalar_select %p5499_p7, 1, 0 }
  0x45   : > { %s200_s25 = sand.u32 1, %s5322_s14   ;;  %p46_p9 = scmp.eq.s32.totalorder %s43_s19, 0 }
  0x46   : > { %s4158_s29 = sshll.u32 %s200_s25, 11  ;;  %s4174_s28 = sshll.u32 %s5330_s16, 15 }
  0x47   : > { %s5508_s30 = scalar_select %p46_p9, %s5322_s14, %s48_s18  }
  0x48   : > { %s5513_s6 = scalar_lea.hbm %s6147_s0, %s4174_s28  ;;  %s204_s21 = scalar_lea.vmem [#allocation3], %s4158_s29 }
  0x49   : > { %s214_s7 = sshll.u32 %s204_s21, 4  ;;  %p5517_p2 = pnand %p5102_p3, %p57_p5  ;;  %s5521_s7 = int_to_ptr.vmem [resolvable:$true] %s214_s7 }
  0x4a   : > { %s5523_s26 = scalar_lea.sflag [#allocation4], %s200_s25  ;;  %s5218_s9 = scalar_lea.hbm %s5513_s6, 32768 }
  0x4b   : > { %p5219_p11 = scmp.ne.s32.totalorder %s5513_s6, %s5218_s9  ;;  %p5220_p12 = pneg %p5517_p2 }
  0x4c   : > { %s5223_s19 = scalar_lea.hbm %s6147_s0, 65536  ;;  %p5224_p4 = scmp.lt.u32.totalorder %s5513_s6, %s6147_s0 }
  0x4d   : > { %p5221_p0 = pnand %p5220_p12, %p5219_p11  ;;  %p5225_p13 = scmp.lt.u32.totalorder %s5223_s19, %s5218_s9 }
  0x4e   : > { %p5227_p10 = scmp.lt.u32.totalorder %s5218_s9, %s5513_s6 }
  0x4f   : > { %p5222_p1 = pneg %p5221_p0  ;;  %p5226_p6 = por %p5225_p13, %p5224_p4 }
  0x51   : > { %p5228_p3 = por %p5227_p10, %p5226_p6 }
  0x53   : > { %p5229_p5 = pnand %p5228_p3, %p5222_p1 }
  0x55   : > { %5232 = shalt.err (!%p5229_p5)
}
  0x56   : > { %s5233_s25 = scalar_lea.vmem %s5521_s7, 32768  ;;  %s5340_s4 = smov [#allocation3]  }
  0x57   : > { %p5234_p9 = scmp.ne.s32.totalorder %s5521_s7, %s5233_s25  ;;  %s5238_s5 = sshll.u32 %s5340_s4, 4  ;;  %s5239_s5 = int_to_ptr.vmem [resolvable:$false] %s5238_s5 }
  0x58   : > { %s5240_s21 = scalar_lea.vmem %s5239_s5, 65536  ;;  %p5241_p7 = scmp.lt.s32.totalorder %s5521_s7, %s5239_s5 }
  0x59   : > { %p5236_p11 = pnand %p5234_p9, %p5220_p12  ;;  %p5242_p4 = scmp.lt.s32.totalorder %s5240_s21, %s5233_s25 }
  0x5b   : > { %p5237_p0 = pneg %p5236_p11  ;;  %p5243_p13 = por %p5242_p4, %p5241_p7 }
  0x5d   : > { %p5244_p6 = pnand %p5243_p13, %p5237_p0 }
  0x5f   : > { %5247 = shalt.err (!%p5244_p6)
}
  0x60   : > { %s5341_s9 = smov 1024   ;;  %s5342_s10 = smov 64  }
  0x61   : > { %5095 = dma.hbm_to_vmem [thread:$0]  (!%p5517_p2), %s5513_s6, 32768, %s5521_s7, %s5523_s26, %s5341_s9, %s5341_s9, %s5342_s10  }
  0x62   : > { %226 = sbr.rel (%p5420_p8) target bundleno = 916 (0x394), region = 32  ;;  %s5554_s18 = sand.u32 (!%p5420_p8), 1, %s5318_s13  }
  0x63   : > { %s4163_s19 = sshll.u32 (!%p5420_p8), %s5554_s18, 11  ;;  %s229_s29 = scalar_lea.sflag (!%p5420_p8), [#allocation4], %s5554_s18 }
  0x64   : > { %s5558_s28 = scalar_lea.vmem (!%p5420_p8), [#allocation3], %s4163_s19  ;;  %p6163_p7 = scmp.ne.s32.totalorder (!%p5420_p8), %s6157_s22, 0 }
  0x69   : > { %5301 = dma.done.wait (%p6163_p7), %s229_s29, 32768  }
  0x6a   : > { %5303 = vsyncadd (%p6163_p7), %s229_s29, 4294934528  ;;  %p6164_p2 = scmp.ne.s32.totalorder %s6155_s20, 0 }
  0x6c   : > { %5305 = dma.done.wait (%p6164_p2), [#allocation7], 65600  }
  0x6d   : > { %5307 = vsyncadd (%p6164_p2), [#allocation7], 4294901696  ;;  %v787_v0 = vld [vmem:[#allocation6 + $0x8] sm:$0xff]  ;;  %v789_v2 = vld [vmem:[#allocation6 + $0x18] sm:$0xff]  ;;  %s4166_s20 = sshll.u32 %s5554_s18, 10  ;;  %s4176_s24 = sshll.u32 %s5326_s15, 14 }
  0x6e   : > { %v791_v1 = vld [vmem:[#allocation6 + $0x28] sm:$0xff]  ;;  %v793_v4 = vld [vmem:[#allocation6 + $0x38] sm:$0xff]  ;;  %v786_v5 = vld [vmem:[#allocation6] sm:$0xff]  ;;  %s5836_s22 = scalar_lea.vmem [#allocation9], %s4166_s20  ;;  %s6091_s8 = scalar_lea.hbm %s6150_s3, %s4176_s24 }
  0x6f   : > { %v4177_v3 = vpack.c.bf16 %v791_v1, %v787_v0  ;;  %v790_v6 = vld [vmem:[#allocation6 + $0x20] sm:$0xff]  ;;  %v4433_v7 = vpack.c.bf16 %v793_v4, %v789_v2  ;;  %v788_v9 = vld [vmem:[#allocation6 + $0x10] sm:$0xff]  ;;  %v795_v11 = vld [vmem:[#allocation6 + $0x48] sm:$0xff]  ;;  %s4036_s6 = sshll.u32 %s5836_s22, 4  ;;  %s4020_s26 = scalar_lea.sflag [#allocation5], %s5554_s18  ;;  %s6093_s6 = int_to_ptr.vmem [resolvable:$true] %s4036_s6 }
  0x70   : > { %v4179_v8 = vpack.c.bf16 %v790_v6, %v786_v5  ;;  %v792_v10 = vld [vmem:[#allocation6 + $0x30] sm:$0xff]  ;;  %v799_v13 = vld [vmem:[#allocation6 + $0x68] sm:$0xff]  ;;  %v797_v14 = vld [vmem:[#allocation6 + $0x58] sm:$0xff]  ;;  %s5248_s25 = scalar_lea.vmem %s6093_s6, 16384  ;;  %p6165_p12 = scmp.ne.s32.totalorder %s6161_s27, 0 }
  0x71   : > { %4178 = vmatprep.subr.bf16.mxu0 %v4177_v3  ;;  %v4435_v12 = vpack.c.bf16 %v792_v10, %v788_v9  ;;  %v801_v15 = vld [vmem:[#allocation6 + $0x78] sm:$0xff]  ;;  %4434 = vmatprep.subr.bf16.mxu1 %v4433_v7  ;;  %v4181_v16 = vpack.c.bf16 %v799_v13, %v795_v11  ;;  %v794_v18 = vld [vmem:[#allocation6 + $0x40] sm:$0xff]  ;;  %v796_v20 = vld [vmem:[#allocation6 + $0x50] sm:$0xff]  ;;  %p5249_p8 = scmp.ne.s32.totalorder %s6093_s6, %s5248_s25  ;;  %s5343_s4 = smov [#allocation9]  }
  0x72   : > { %4180 = vmatpush1.bf16.msra.mxu0 %v4179_v8  ;;  %v4437_v17 = vpack.c.bf16 %v801_v15, %v797_v14  ;;  %v798_v19 = vld [vmem:[#allocation6 + $0x60] sm:$0xff]  ;;  %v800_v22 = vld [vmem:[#allocation6 + $0x70] sm:$0xff]  ;;  %v803_v23 = vld [vmem:[#allocation6 + $0x88] sm:$0xff]  ;;  %s5252_s5 = sshll.u32 %s5343_s4, 4  ;;  %s5253_s5 = int_to_ptr.vmem [resolvable:$false] %s5252_s5 }
  0x73   : > { %4436 = vmatpush1.bf16.msra.mxu1 %v4435_v12  ;;  %v4183_v21 = vpack.c.bf16 %v798_v19, %v794_v18  ;;  %v807_v24 = vld [vmem:[#allocation6 + $0xa8] sm:$0xff]  ;;  %4182 = vmatprep.subr.bf16.mxu0 %v4181_v16  ;;  %v4439_v25 = vpack.c.bf16 %v800_v22, %v796_v20  ;;  %v805_v27 = vld [vmem:[#allocation6 + $0x98] sm:$0xff]  ;;  %v802_v29 = vld [vmem:[#allocation6 + $0x80] sm:$0xff]  ;;  %p5250_p1 = pnand %p5249_p8, %p6165_p12  ;;  %s5254_s21 = scalar_lea.vmem %s5253_s5, 32768 }
  0x74   : > { %4438 = vmatprep.subr.bf16.mxu1 %v4437_v17  ;;  %v4185_v26 = vpack.c.bf16 %v807_v24, %v803_v23  ;;  %v809_v28 = vld [vmem:[#allocation6 + $0xb8] sm:$0xff]  ;;  %v806_v31 = vld [vmem:[#allocation6 + $0xa0] sm:$0xff]  ;;  %v804_v32 = vld [vmem:[#allocation6 + $0x90] sm:$0xff]  ;;  %p5255_p3 = scmp.lt.s32.totalorder %s6093_s6, %s5253_s5  ;;  %p5256_p5 = scmp.lt.s32.totalorder %s5254_s21, %s5248_s25 }
  0x75   : > { %v4441_v30 = vpack.c.bf16 %v809_v28, %v805_v27  ;;  %v808_v33 = vld [vmem:[#allocation6 + $0xb0] sm:$0xff]  ;;  %v4187_v34 = vpack.c.bf16 %v806_v31, %v802_v29  ;;  %v811_v35 = vld [vmem:[#allocation6 + $0xc8] sm:$0xff]  ;;  %v813_v37 = vld [vmem:[#allocation6 + $0xd8] sm:$0xff]  ;;  %p5251_p10 = pneg %p5250_p1 }
  0x76   : > { %4184 = vmatpush1.bf16.msra.mxu0 %v4183_v21  ;;  %v815_v36 = vld [vmem:[#allocation6 + $0xe8] sm:$0xff]  ;;  %v4443_v38 = vpack.c.bf16 %v808_v33, %v804_v32  ;;  %v817_v40 = vld [vmem:[#allocation6 + $0xf8] sm:$0xff]  ;;  %v810_v41 = vld [vmem:[#allocation6 + $0xc0] sm:$0xff]  ;;  %p5257_p9 = por %p5256_p5, %p5255_p3 }
  0x77   : > { %4440 = vmatpush1.bf16.msra.mxu1 %v4439_v25  ;;  %4186 = vmatprep.subr.bf16.mxu0 %v4185_v26  ;;  %v4189_v39 = vpack.c.bf16 %v815_v36, %v811_v35  ;;  %v814_v42 = vld [vmem:[#allocation6 + $0xe0] sm:$0xff]  ;;  %v4445_v43 = vpack.c.bf16 %v817_v40, %v813_v37  ;;  %v812_v44 = vld [vmem:[#allocation6 + $0xd0] sm:$0xff]  ;;  %v819_v46 = vld [vmem:[#allocation6 + $0x108] sm:$0xff] }
  0x78   : > { %4442 = vmatprep.subr.bf16.mxu1 %v4441_v30  ;;  %v816_v45 = vld [vmem:[#allocation6 + $0xf0] sm:$0xff]  ;;  %v823_v47 = vld [vmem:[#allocation6 + $0x128] sm:$0xff]  ;;  %v821_v48 = vld [vmem:[#allocation6 + $0x118] sm:$0xff]  ;;  %v4191_v50 = vpack.c.bf16 %v814_v42, %v810_v41  ;;  %p5258_p11 = pnand %p5257_p9, %p5251_p10 }
  0x79   : > { %v825_v49 = vld [vmem:[#allocation6 + $0x138] sm:$0xff]  ;;  %v4447_v51 = vpack.c.bf16 %v816_v45, %v812_v44  ;;  %v4193_v52 = vpack.c.bf16 %v823_v47, %v819_v46  ;;  %v818_v53 = vld [vmem:[#allocation6 + $0x100] sm:$0xff]  ;;  %v820_v55 = vld [vmem:[#allocation6 + $0x110] sm:$0xff] }
  0x7a   : > { %4188 = vmatpush1.bf16.msra.mxu0 %v4187_v34  ;;  %v822_v54 = vld [vmem:[#allocation6 + $0x120] sm:$0xff]  ;;  %v4449_v56 = vpack.c.bf16 %v825_v49, %v821_v48  ;;  %v824_v57 = vld [vmem:[#allocation6 + $0x130] sm:$0xff]  ;;  %v827_v58 = vld [vmem:[#allocation6 + $0x148] sm:$0xff] }
  0x7b   : > { %4444 = vmatpush1.bf16.msra.mxu1 %v4443_v38  ;;  %4190 = vmatprep.subr.bf16.mxu0 %v4189_v39  ;;  %v831_v59 = vld [vmem:[#allocation6 + $0x168] sm:$0xff]  ;;  %v829_v60 = vld [vmem:[#allocation6 + $0x158] sm:$0xff]  ;;  %v4195_v62 = vpack.c.bf16 %v822_v54, %v818_v53  ;;  %v4451_v63 = vpack.c.bf16 %v824_v57, %v820_v55  ;;  %v826_v1 = vld [vmem:[#allocation6 + $0x140] sm:$0xff] }
  0x7c   : > { %4446 = vmatprep.subr.bf16.mxu1 %v4445_v43  ;;  %v833_v61 = vld [vmem:[#allocation6 + $0x178] sm:$0xff]  ;;  %v4197_v0 = vpack.c.bf16 %v831_v59, %v827_v58  ;;  %v830_v2 = vld [vmem:[#allocation6 + $0x160] sm:$0xff]  ;;  %v828_v3 = vld [vmem:[#allocation6 + $0x150] sm:$0xff] }
  0x7d   : > { %v4453_v4 = vpack.c.bf16 %v833_v61, %v829_v60  ;;  %v832_v5 = vld [vmem:[#allocation6 + $0x170] sm:$0xff]  ;;  %v835_v6 = vld [vmem:[#allocation6 + $0x188] sm:$0xff]  ;;  %v837_v8 = vld [vmem:[#allocation6 + $0x198] sm:$0xff]  ;;  %v4199_v10 = vpack.c.bf16 %v830_v2, %v826_v1 }
  0x7e   : > { %4192 = vmatpush1.bf16.msra.mxu0 %v4191_v50  ;;  %v839_v7 = vld [vmem:[#allocation6 + $0x1a8] sm:$0xff]  ;;  %v841_v9 = vld [vmem:[#allocation6 + $0x1b8] sm:$0xff]  ;;  %v4455_v11 = vpack.c.bf16 %v832_v5, %v828_v3  ;;  %v834_v13 = vld [vmem:[#allocation6 + $0x180] sm:$0xff] }
  0x7f   : > { %4448 = vmatpush1.bf16.msra.mxu1 %v4447_v51  ;;  %4194 = vmatprep.subr.bf16.mxu0 %v4193_v52  ;;  %v4201_v12 = vpack.c.bf16 %v839_v7, %v835_v6  ;;  %v838_v14 = vld [vmem:[#allocation6 + $0x1a0] sm:$0xff]  ;;  %v836_v15 = vld [vmem:[#allocation6 + $0x190] sm:$0xff]  ;;  %v4457_v16 = vpack.c.bf16 %v841_v9, %v837_v8  ;;  %v843_v18 = vld [vmem:[#allocation6 + $0x1c8] sm:$0xff] }
  0x80   : > { %4450 = vmatprep.subr.bf16.mxu1 %v4449_v56  ;;  %v840_v17 = vld [vmem:[#allocation6 + $0x1b0] sm:$0xff]  ;;  %v847_v19 = vld [vmem:[#allocation6 + $0x1e8] sm:$0xff]  ;;  %v845_v20 = vld [vmem:[#allocation6 + $0x1d8] sm:$0xff]  ;;  %v4203_v22 = vpack.c.bf16 %v838_v14, %v834_v13 }
  0x81   : > { %v849_v21 = vld [vmem:[#allocation6 + $0x1f8] sm:$0xff]  ;;  %v4459_v23 = vpack.c.bf16 %v840_v17, %v836_v15  ;;  %v4205_v24 = vpack.c.bf16 %v847_v19, %v843_v18  ;;  %v842_v25 = vld [vmem:[#allocation6 + $0x1c0] sm:$0xff]  ;;  %v844_v27 = vld [vmem:[#allocation6 + $0x1d0] sm:$0xff] }
  0x82   : > { %4196 = vmatpush1.bf16.msra.mxu0 %v4195_v62  ;;  %v846_v26 = vld [vmem:[#allocation6 + $0x1e0] sm:$0xff]  ;;  %v4461_v28 = vpack.c.bf16 %v849_v21, %v845_v20  ;;  %v848_v29 = vld [vmem:[#allocation6 + $0x1f0] sm:$0xff]  ;;  %v851_v30 = vld [vmem:[#allocation6 + $0x208] sm:$0xff] }
  0x83   : > { %4452 = vmatpush1.bf16.msra.mxu1 %v4451_v63  ;;  %4198 = vmatprep.subr.bf16.mxu0 %v4197_v0  ;;  %v855_v31 = vld [vmem:[#allocation6 + $0x228] sm:$0xff]  ;;  %v853_v32 = vld [vmem:[#allocation6 + $0x218] sm:$0xff]  ;;  %v4207_v34 = vpack.c.bf16 %v846_v26, %v842_v25  ;;  %v4463_v35 = vpack.c.bf16 %v848_v29, %v844_v27  ;;  %v850_v37 = vld [vmem:[#allocation6 + $0x200] sm:$0xff] }
  0x84   : > { %4454 = vmatprep.subr.bf16.mxu1 %v4453_v4  ;;  %v857_v33 = vld [vmem:[#allocation6 + $0x238] sm:$0xff]  ;;  %v4209_v36 = vpack.c.bf16 %v855_v31, %v851_v30  ;;  %v854_v38 = vld [vmem:[#allocation6 + $0x220] sm:$0xff]  ;;  %v852_v39 = vld [vmem:[#allocation6 + $0x210] sm:$0xff] }
  0x85   : > { %v4465_v40 = vpack.c.bf16 %v857_v33, %v853_v32  ;;  %v856_v41 = vld [vmem:[#allocation6 + $0x230] sm:$0xff]  ;;  %v859_v42 = vld [vmem:[#allocation6 + $0x248] sm:$0xff]  ;;  %v861_v44 = vld [vmem:[#allocation6 + $0x258] sm:$0xff]  ;;  %v4211_v46 = vpack.c.bf16 %v854_v38, %v850_v37 }
  0x86   : > { %4200 = vmatpush1.bf16.msra.mxu0 %v4199_v10  ;;  %v863_v43 = vld [vmem:[#allocation6 + $0x268] sm:$0xff]  ;;  %v865_v45 = vld [vmem:[#allocation6 + $0x278] sm:$0xff]  ;;  %v4467_v47 = vpack.c.bf16 %v856_v41, %v852_v39  ;;  %v858_v49 = vld [vmem:[#allocation6 + $0x240] sm:$0xff] }
  0x87   : > { %4456 = vmatpush1.bf16.msra.mxu1 %v4455_v11  ;;  %4202 = vmatprep.subr.bf16.mxu0 %v4201_v12  ;;  %v4213_v48 = vpack.c.bf16 %v863_v43, %v859_v42  ;;  %v862_v50 = vld [vmem:[#allocation6 + $0x260] sm:$0xff]  ;;  %v860_v51 = vld [vmem:[#allocation6 + $0x250] sm:$0xff]  ;;  %v4469_v52 = vpack.c.bf16 %v865_v45, %v861_v44  ;;  %v867_v54 = vld [vmem:[#allocation6 + $0x288] sm:$0xff] }
  0x88   : > { %4458 = vmatprep.subr.bf16.mxu1 %v4457_v16  ;;  %v864_v53 = vld [vmem:[#allocation6 + $0x270] sm:$0xff]  ;;  %v871_v55 = vld [vmem:[#allocation6 + $0x2a8] sm:$0xff]  ;;  %v869_v56 = vld [vmem:[#allocation6 + $0x298] sm:$0xff]  ;;  %v4215_v58 = vpack.c.bf16 %v862_v50, %v858_v49 }
  0x89   : > { %v873_v57 = vld [vmem:[#allocation6 + $0x2b8] sm:$0xff]  ;;  %v4471_v59 = vpack.c.bf16 %v864_v53, %v860_v51  ;;  %v4217_v60 = vpack.c.bf16 %v871_v55, %v867_v54  ;;  %v866_v61 = vld [vmem:[#allocation6 + $0x280] sm:$0xff]  ;;  %v868_v63 = vld [vmem:[#allocation6 + $0x290] sm:$0xff] }
  0x8a   : > { %4204 = vmatpush1.bf16.msra.mxu0 %v4203_v22  ;;  %v870_v62 = vld [vmem:[#allocation6 + $0x2a0] sm:$0xff]  ;;  %v4473_v0 = vpack.c.bf16 %v873_v57, %v869_v56  ;;  %v872_v1 = vld [vmem:[#allocation6 + $0x2b0] sm:$0xff]  ;;  %v875_v2 = vld [vmem:[#allocation6 + $0x2c8] sm:$0xff] }
  0x8b   : > { %4460 = vmatpush1.bf16.msra.mxu1 %v4459_v23  ;;  %4206 = vmatprep.subr.bf16.mxu0 %v4205_v24  ;;  %v879_v3 = vld [vmem:[#allocation6 + $0x2e8] sm:$0xff]  ;;  %v877_v4 = vld [vmem:[#allocation6 + $0x2d8] sm:$0xff]  ;;  %v4219_v6 = vpack.c.bf16 %v870_v62, %v866_v61  ;;  %v874_v7 = vld [vmem:[#allocation6 + $0x2c0] sm:$0xff]  ;;  %v4475_v8 = vpack.c.bf16 %v872_v1, %v868_v63 }
  0x8c   : > { %4462 = vmatprep.subr.bf16.mxu1 %v4461_v28  ;;  %v881_v5 = vld [vmem:[#allocation6 + $0x2f8] sm:$0xff]  ;;  %v4221_v9 = vpack.c.bf16 %v879_v3, %v875_v2  ;;  %v878_v10 = vld [vmem:[#allocation6 + $0x2e0] sm:$0xff]  ;;  %v876_v11 = vld [vmem:[#allocation6 + $0x2d0] sm:$0xff] }
  0x8d   : > { %v880_v12 = vld [vmem:[#allocation6 + $0x2f0] sm:$0xff]  ;;  %v4477_v13 = vpack.c.bf16 %v881_v5, %v877_v4  ;;  %v883_v14 = vld [vmem:[#allocation6 + $0x308] sm:$0xff]  ;;  %v885_v17 = vld [vmem:[#allocation6 + $0x318] sm:$0xff]  ;;  %v4223_v19 = vpack.c.bf16 %v878_v10, %v874_v7 }
  0x8e   : > { %4208 = vmatpush1.bf16.msra.mxu0 %v4207_v34  ;;  %v887_v15 = vld [vmem:[#allocation6 + $0x328] sm:$0xff]  ;;  %v889_v18 = vld [vmem:[#allocation6 + $0x338] sm:$0xff]  ;;  %v4479_v20 = vpack.c.bf16 %v880_v12, %v876_v11  ;;  %v882_v22 = vld [vmem:[#allocation6 + $0x300] sm:$0xff] }
  0x8f   : > { %4464 = vmatpush1.bf16.msra.mxu1 %v4463_v35  ;;  %4210 = vmatprep.subr.bf16.mxu0 %v4209_v36  ;;  %v531_v16 = vld [vmem:[%s5558_s28 + $0x8] sm:$0xff]  ;;  %v4225_v21 = vpack.c.bf16 %v887_v15, %v883_v14  ;;  %v886_v23 = vld [vmem:[#allocation6 + $0x320] sm:$0xff]  ;;  %v884_v24 = vld [vmem:[#allocation6 + $0x310] sm:$0xff]  ;;  %v4481_v25 = vpack.c.bf16 %v889_v18, %v885_v17 }
  0x90   : > { %4466 = vmatprep.subr.bf16.mxu1 %v4465_v40  ;;  %1362 = vmatprep.mubr.f32.mxu0 %v531_v16  ;;  %v888_v26 = vld [vmem:[#allocation6 + $0x330] sm:$0xff]  ;;  %v891_v27 = vld [vmem:[#allocation6 + $0x348] sm:$0xff]  ;;  %v893_v29 = vld [vmem:[#allocation6 + $0x358] sm:$0xff]  ;;  %v4227_v31 = vpack.c.bf16 %v886_v23, %v882_v22 }
  0x91   : > { %2390 = vmatprep.mubr.f32.mxu1 %v531_v16  ;;  %v895_v28 = vld [vmem:[#allocation6 + $0x368] sm:$0xff]  ;;  %v897_v30 = vld [vmem:[#allocation6 + $0x378] sm:$0xff]  ;;  %v4483_v32 = vpack.c.bf16 %v888_v26, %v884_v24  ;;  %v890_v34 = vld [vmem:[#allocation6 + $0x340] sm:$0xff] }
  0x92   : > { %4212 = vmatpush1.bf16.msra.mxu0 %v4211_v46  ;;  %v4229_v33 = vpack.c.bf16 %v895_v28, %v891_v27  ;;  %v894_v35 = vld [vmem:[#allocation6 + $0x360] sm:$0xff]  ;;  %v892_v36 = vld [vmem:[#allocation6 + $0x350] sm:$0xff]  ;;  %v4485_v37 = vpack.c.bf16 %v897_v30, %v893_v29  ;;  %v899_v39 = vld [vmem:[#allocation6 + $0x388] sm:$0xff] }
  0x93   : > { %4468 = vmatpush1.bf16.msra.mxu1 %v4467_v47  ;;  %4214 = vmatprep.subr.bf16.mxu0 %v4213_v48  ;;  %v896_v38 = vld [vmem:[#allocation6 + $0x370] sm:$0xff]  ;;  %v903_v40 = vld [vmem:[#allocation6 + $0x3a8] sm:$0xff]  ;;  %v901_v41 = vld [vmem:[#allocation6 + $0x398] sm:$0xff]  ;;  %v4231_v43 = vpack.c.bf16 %v894_v35, %v890_v34 }
  0x94   : > { %4470 = vmatprep.subr.bf16.mxu1 %v4469_v52  ;;  %v905_v42 = vld [vmem:[#allocation6 + $0x3b8] sm:$0xff]  ;;  %v4487_v44 = vpack.c.bf16 %v896_v38, %v892_v36  ;;  %v4233_v45 = vpack.c.bf16 %v903_v40, %v899_v39  ;;  %v898_v46 = vld [vmem:[#allocation6 + $0x380] sm:$0xff]  ;;  %v900_v48 = vld [vmem:[#allocation6 + $0x390] sm:$0xff] }
  0x95   : > { %v902_v47 = vld [vmem:[#allocation6 + $0x3a0] sm:$0xff]  ;;  %v4489_v49 = vpack.c.bf16 %v905_v42, %v901_v41  ;;  %v904_v50 = vld [vmem:[#allocation6 + $0x3b0] sm:$0xff]  ;;  %v907_v51 = vld [vmem:[#allocation6 + $0x3c8] sm:$0xff] }
  0x96   : > { %4216 = vmatpush1.bf16.msra.mxu0 %v4215_v58  ;;  %v911_v52 = vld [vmem:[#allocation6 + $0x3e8] sm:$0xff]  ;;  %v909_v53 = vld [vmem:[#allocation6 + $0x3d8] sm:$0xff]  ;;  %v4235_v55 = vpack.c.bf16 %v902_v47, %v898_v46  ;;  %v4491_v56 = vpack.c.bf16 %v904_v50, %v900_v48  ;;  %v906_v58 = vld [vmem:[#allocation6 + $0x3c0] sm:$0xff] }
  0x97   : > { %4472 = vmatpush1.bf16.msra.mxu1 %v4471_v59  ;;  %4218 = vmatprep.subr.bf16.mxu0 %v4217_v60  ;;  %v913_v54 = vld [vmem:[#allocation6 + $0x3f8] sm:$0xff]  ;;  %v4237_v57 = vpack.c.bf16 %v911_v52, %v907_v51  ;;  %v910_v59 = vld [vmem:[#allocation6 + $0x3e0] sm:$0xff]  ;;  %v908_v60 = vld [vmem:[#allocation6 + $0x3d0] sm:$0xff] }
  0x98   : > { %4474 = vmatprep.subr.bf16.mxu1 %v4473_v0  ;;  %v4493_v61 = vpack.c.bf16 %v913_v54, %v909_v53  ;;  %v912_v62 = vld [vmem:[#allocation6 + $0x3f0] sm:$0xff]  ;;  %v915_v63 = vld [vmem:[#allocation6 + $0x408] sm:$0xff]  ;;  %v917_v1 = vld [vmem:[#allocation6 + $0x418] sm:$0xff]  ;;  %v4239_v3 = vpack.c.bf16 %v910_v59, %v906_v58 }
  0x99   : > { %v919_v0 = vld [vmem:[#allocation6 + $0x428] sm:$0xff]  ;;  %v921_v2 = vld [vmem:[#allocation6 + $0x438] sm:$0xff]  ;;  %v4495_v4 = vpack.c.bf16 %v912_v62, %v908_v60  ;;  %v918_v7 = vld [vmem:[#allocation6 + $0x420] sm:$0xff] }
  0x9a   : > { %4220 = vmatpush1.bf16.msra.mxu0 %v4219_v6  ;;  %v4241_v5 = vpack.c.bf16 %v919_v0, %v915_v63  ;;  %v914_v6 = vld [vmem:[#allocation6 + $0x400] sm:$0xff]  ;;  %v920_v10 = vld [vmem:[#allocation6 + $0x430] sm:$0xff]  ;;  %v923_v11 = vld [vmem:[#allocation6 + $0x448] sm:$0xff] }
  0x9b   : > { %4476 = vmatpush1.bf16.msra.mxu1 %v4475_v8  ;;  %4222 = vmatprep.subr.bf16.mxu0 %v4221_v9  ;;  %v4497_v8 = vpack.c.bf16 %v921_v2, %v917_v1  ;;  %v916_v9 = vld [vmem:[#allocation6 + $0x410] sm:$0xff]  ;;  %v927_v12 = vld [vmem:[#allocation6 + $0x468] sm:$0xff]  ;;  %v4243_v14 = vpack.c.bf16 %v918_v7, %v914_v6  ;;  %v925_v15 = vld [vmem:[#allocation6 + $0x458] sm:$0xff] }
  0x9c   : > { %4478 = vmatprep.subr.bf16.mxu1 %v4477_v13  ;;  %v530_v13 = vld [vmem:[%s5558_s28] sm:$0xff]  ;;  %v929_v16 = vld [vmem:[#allocation6 + $0x478] sm:$0xff]  ;;  %v4499_v17 = vpack.c.bf16 %v920_v10, %v916_v9  ;;  %v539_v18 = vld [vmem:[%s5558_s28 + $0x48] sm:$0xff] }
  0x9d   : > { %v924_v22 = vld [vmem:[#allocation6 + $0x450] sm:$0xff]  ;;  %v4501_v23 = vpack.c.bf16 %v929_v16, %v925_v15  ;;  %v935_v26 = vld [vmem:[#allocation6 + $0x4a8] sm:$0xff]  ;;  %v538_v27 = vld [vmem:[%s5558_s28 + $0x40] sm:$0xff] }
  0x9e   : > { %4224 = vmatpush1.bf16.msra.mxu0 %v4223_v19  ;;  %v4245_v19 = vpack.c.bf16 %v927_v12, %v923_v11  ;;  %v928_v24 = vld [vmem:[#allocation6 + $0x470] sm:$0xff]  ;;  %v933_v28 = vld [vmem:[#allocation6 + $0x498] sm:$0xff]  ;;  %v547_v30 = vld [vmem:[%s5558_s28 + $0x88] sm:$0xff] }
  0x9f   : > { %4480 = vmatpush1.bf16.msra.mxu1 %v4479_v20  ;;  %4226 = vmatprep.subr.bf16.mxu0 %v4225_v21  ;;  %v922_v20 = vld [vmem:[#allocation6 + $0x440] sm:$0xff]  ;;  %v937_v29 = vld [vmem:[#allocation6 + $0x4b8] sm:$0xff]  ;;  %v932_v36 = vld [vmem:[#allocation6 + $0x490] sm:$0xff] }
  0xa0   : > { %4482 = vmatprep.subr.bf16.mxu1 %v4481_v25  ;;  %v926_v21 = vld [vmem:[#allocation6 + $0x460] sm:$0xff]  ;;  %v931_v25 = vld [vmem:[#allocation6 + $0x488] sm:$0xff]  ;;  %v936_v38 = vld [vmem:[#allocation6 + $0x4b0] sm:$0xff] }
  0xa1   : > { %v930_v34 = vld [vmem:[#allocation6 + $0x480] sm:$0xff]  ;;  %v939_v39 = vld [vmem:[#allocation6 + $0x4c8] sm:$0xff]  ;;  %v941_v42 = vld [vmem:[#allocation6 + $0x4d8] sm:$0xff]  ;;  %v4507_v46 = vpack.c.bf16 %v936_v38, %v932_v36 }
  0xa2   : > { %4228 = vmatpush1.bf16.msra.mxu0 %v4227_v31  ;;  %v4247_v31 = vpack.c.bf16 %v926_v21, %v922_v20  ;;  %v934_v35 = vld [vmem:[#allocation6 + $0x4a0] sm:$0xff]  ;;  %v943_v40 = vld [vmem:[#allocation6 + $0x4e8] sm:$0xff]  ;;  %v940_v50 = vld [vmem:[#allocation6 + $0x4d0] sm:$0xff] }
  0xa3   : > { %4484 = vmatpush1.bf16.msra.mxu1 %v4483_v32  ;;  %4230 = vmatprep.subr.bf16.mxu0 %v4229_v33  ;;  %v4503_v32 = vpack.c.bf16 %v928_v24, %v924_v22  ;;  %v4249_v33 = vpack.c.bf16 %v935_v26, %v931_v25  ;;  %v546_v41 = vld [vmem:[%s5558_s28 + $0x80] sm:$0xff]  ;;  %v4253_v47 = vpack.c.bf16 %v943_v40, %v939_v39  ;;  %v944_v52 = vld [vmem:[#allocation6 + $0x4f0] sm:$0xff]  ;;  %v947_v53 = vld [vmem:[#allocation6 + $0x508] sm:$0xff] }
  0xa4   : > { %4486 = vmatprep.subr.bf16.mxu1 %v4485_v37  ;;  %v4505_v37 = vpack.c.bf16 %v937_v29, %v933_v28  ;;  %v938_v48 = vld [vmem:[#allocation6 + $0x4c0] sm:$0xff]  ;;  %v951_v54 = vld [vmem:[#allocation6 + $0x528] sm:$0xff]  ;;  %v4511_v60 = vpack.c.bf16 %v944_v52, %v940_v50  ;;  %v948_v0 = vld [vmem:[#allocation6 + $0x510] sm:$0xff] }
  0xa5   : > { %v563_v58 = vld [vmem:[%s5558_s28 + $0x108] sm:$0xff]  ;;  %v946_v62 = vld [vmem:[#allocation6 + $0x500] sm:$0xff]  ;;  %v952_v2 = vld [vmem:[#allocation6 + $0x530] sm:$0xff] }
  0xa6   : > { %4232 = vmatpush1.bf16.msra.mxu0 %v4231_v43  ;;  %v945_v43 = vld [vmem:[#allocation6 + $0x4f8] sm:$0xff]  ;;  %v950_v63 = vld [vmem:[#allocation6 + $0x520] sm:$0xff]  ;;  %v4515_v10 = vpack.c.bf16 %v952_v2, %v948_v0  ;;  %v960_v16 = vld [vmem:[#allocation6 + $0x570] sm:$0xff] }
  0xa7   : > { %4488 = vmatpush1.bf16.msra.mxu1 %v4487_v44  ;;  %4234 = vmatprep.subr.bf16.mxu0 %v4233_v45  ;;  %v555_v44 = vld [vmem:[%s5558_s28 + $0xc8] sm:$0xff]  ;;  %v4251_v45 = vpack.c.bf16 %v934_v35, %v930_v34  ;;  %v4509_v51 = vpack.c.bf16 %v945_v43, %v941_v42  ;;  %v957_v6 = vld [vmem:[#allocation6 + $0x558] sm:$0xff]  ;;  %v4259_v9 = vpack.c.bf16 %v950_v63, %v946_v62  ;;  %v954_v12 = vld [vmem:[#allocation6 + $0x540] sm:$0xff] }
  0xa8   : > { %4490 = vmatprep.subr.bf16.mxu1 %v4489_v49  ;;  %v942_v49 = vld [vmem:[#allocation6 + $0x4e0] sm:$0xff]  ;;  %v961_v7 = vld [vmem:[#allocation6 + $0x578] sm:$0xff]  ;;  %v579_v22 = vld [vmem:[%s5558_s28 + $0x188] sm:$0xff] }
  0xa9   : > { %v4255_v59 = vpack.c.bf16 %v942_v49, %v938_v48  ;;  %v4517_v15 = vpack.c.bf16 %v961_v7, %v957_v6  ;;  %v965_v20 = vld [vmem:[#allocation6 + $0x598] sm:$0xff]  ;;  %v962_v26 = vld [vmem:[#allocation6 + $0x580] sm:$0xff]  ;;  %v964_v28 = vld [vmem:[#allocation6 + $0x590] sm:$0xff] }
  0xaa   : > { %4236 = vmatpush1.bf16.msra.mxu0 %v4235_v55  ;;  %v554_v55 = vld [vmem:[%s5558_s28 + $0xc0] sm:$0xff]  ;;  %v969_v21 = vld [vmem:[#allocation6 + $0x5b8] sm:$0xff]  ;;  %v587_v36 = vld [vmem:[%s5558_s28 + $0x1c8] sm:$0xff] }
  0xab   : > { %4492 = vmatpush1.bf16.msra.mxu1 %v4491_v56  ;;  %4238 = vmatprep.subr.bf16.mxu0 %v4237_v57  ;;  %v949_v56 = vld [vmem:[#allocation6 + $0x518] sm:$0xff]  ;;  %v4521_v29 = vpack.c.bf16 %v969_v21, %v965_v20  ;;  %v970_v40 = vld [vmem:[#allocation6 + $0x5c0] sm:$0xff]  ;;  %v972_v42 = vld [vmem:[#allocation6 + $0x5d0] sm:$0xff] }
  0xac   : > { %4494 = vmatprep.subr.bf16.mxu1 %v4493_v61  ;;  %v953_v57 = vld [vmem:[#allocation6 + $0x538] sm:$0xff]  ;;  %v4257_v61 = vpack.c.bf16 %v951_v54, %v947_v53  ;;  %v595_v50 = vld [vmem:[%s5558_s28 + $0x208] sm:$0xff]  ;;  %v978_v54 = vld [vmem:[#allocation6 + $0x600] sm:$0xff] }
  0xad   : > { %v4513_v1 = vpack.c.bf16 %v953_v57, %v949_v56  ;;  %v973_v34 = vld [vmem:[#allocation6 + $0x5d8] sm:$0xff]  ;;  %v980_v56 = vld [vmem:[#allocation6 + $0x610] sm:$0xff]  ;;  %v603_v0 = vld [vmem:[%s5558_s28 + $0x248] sm:$0xff] }
  0xae   : > { %4240 = vmatpush1.bf16.msra.mxu0 %v4239_v3  ;;  %v955_v3 = vld [vmem:[#allocation6 + $0x548] sm:$0xff]  ;;  %v977_v35 = vld [vmem:[#allocation6 + $0x5f8] sm:$0xff]  ;;  %v988_v6 = vld [vmem:[#allocation6 + $0x650] sm:$0xff] }
  0xaf   : > { %4496 = vmatpush1.bf16.msra.mxu1 %v4495_v4  ;;  %4242 = vmatprep.subr.bf16.mxu0 %v4241_v5  ;;  %v959_v4 = vld [vmem:[#allocation6 + $0x568] sm:$0xff]  ;;  %v562_v5 = vld [vmem:[%s5558_s28 + $0x100] sm:$0xff]  ;;  %v4525_v43 = vpack.c.bf16 %v977_v35, %v973_v34  ;;  %v981_v48 = vld [vmem:[#allocation6 + $0x618] sm:$0xff] }
  0xb0   : > { %4498 = vmatprep.subr.bf16.mxu1 %v4497_v8  ;;  %v571_v8 = vld [vmem:[%s5558_s28 + $0x148] sm:$0xff]  ;;  %v4261_v11 = vpack.c.bf16 %v959_v4, %v955_v3  ;;  %v985_v49 = vld [vmem:[#allocation6 + $0x638] sm:$0xff]  ;;  %v986_v4 = vld [vmem:[#allocation6 + $0x640] sm:$0xff] }
  0xb1   : > { %1363 = vmatmul.mubr.f32.vlgmr.msra.gmra.mrb[0].mxu0 %v530_v13  ;;  %v4529_v57 = vpack.c.bf16 %v985_v49, %v981_v48  ;;  %v989_v62 = vld [vmem:[#allocation6 + $0x658] sm:$0xff]  ;;  %v996_v20 = vld [vmem:[#allocation6 + $0x690] sm:$0xff] }
  0xb2   : > { %2391 = vmatmul.mubr.f32.vlgmr.msra.gmra.mrb[0].mxu1 %v530_v13  ;;  %4244 = vmatpush1.bf16.msra.mxu0 %v4243_v14  ;;  %v958_v13 = vld [vmem:[#allocation6 + $0x560] sm:$0xff]  ;;  %v956_v14 = vld [vmem:[#allocation6 + $0x550] sm:$0xff]  ;;  %v993_v63 = vld [vmem:[#allocation6 + $0x678] sm:$0xff] }
  0xb3   : > { %4500 = vmatpush1.bf16.msra.mxu1 %v4499_v17  ;;  %1368 = vmatprep.mubr.f32.mxu0 %v539_v18  ;;  %v963_v17 = vld [vmem:[#allocation6 + $0x588] sm:$0xff]  ;;  %v4519_v24 = vpack.c.bf16 %v960_v16, %v956_v14  ;;  %v4533_v7 = vpack.c.bf16 %v993_v63, %v989_v62  ;;  %v1004_v34 = vld [vmem:[#allocation6 + $0x6d0] sm:$0xff] }
  0xb4   : > { %2396 = vmatprep.mubr.f32.mxu1 %v539_v18  ;;  %4246 = vmatprep.subr.bf16.mxu0 %v4245_v19  ;;  %v967_v18 = vld [vmem:[#allocation6 + $0x5a8] sm:$0xff]  ;;  %v570_v19 = vld [vmem:[%s5558_s28 + $0x140] sm:$0xff]  ;;  %v1012_v48 = vld [vmem:[#allocation6 + $0x710] sm:$0xff] }
  0xb5   : > { %1369 = vmatmul.mubr.f32.gmra.mrb[2].mxu0 %v538_v27  ;;  %4502 = vmatprep.subr.bf16.mxu1 %v4501_v23  ;;  %v4263_v23 = vpack.c.bf16 %v958_v13, %v954_v12  ;;  %v4265_v25 = vpack.c.bf16 %v967_v18, %v963_v17  ;;  %v997_v12 = vld [vmem:[#allocation6 + $0x698] sm:$0xff]  ;;  %v611_v14 = vld [vmem:[%s5558_s28 + $0x288] sm:$0xff]  ;;  %v994_v18 = vld [vmem:[#allocation6 + $0x680] sm:$0xff] }
  0xb6   : > { %2397 = vmatmul.mubr.f32.gmra.mrb[2].mxu1 %v538_v27  ;;  %1374 = vmatprep.mubr.f32.mxu0 %v547_v30  ;;  %v966_v27 = vld [vmem:[#allocation6 + $0x5a0] sm:$0xff]  ;;  %v1001_v13 = vld [vmem:[#allocation6 + $0x6b8] sm:$0xff]  ;;  %v1020_v62 = vld [vmem:[#allocation6 + $0x750] sm:$0xff] }
  0xb7   : > { %2402 = vmatprep.mubr.f32.mxu1 %v547_v30  ;;  %4248 = vmatpush1.bf16.msra.mxu0 %v4247_v31  ;;  %v968_v30 = vld [vmem:[#allocation6 + $0x5b0] sm:$0xff]  ;;  %v971_v31 = vld [vmem:[#allocation6 + $0x5c8] sm:$0xff]  ;;  %v4537_v21 = vpack.c.bf16 %v1001_v13, %v997_v12 }
  0xb8   : > { %4504 = vmatpush1.bf16.msra.mxu1 %v4503_v32  ;;  %4250 = vmatprep.subr.bf16.mxu0 %v4249_v33  ;;  %v975_v32 = vld [vmem:[#allocation6 + $0x5e8] sm:$0xff]  ;;  %v578_v33 = vld [vmem:[%s5558_s28 + $0x180] sm:$0xff]  ;;  %v4523_v38 = vpack.c.bf16 %v968_v30, %v964_v28  ;;  %v1028_v12 = vld [vmem:[#allocation6 + $0x790] sm:$0xff] }
  0xb9   : > { %1375 = vmatmul.mubr.f32.gmra.mrb[4].mxu0 %v546_v41  ;;  %4506 = vmatprep.subr.bf16.mxu1 %v4505_v37  ;;  %v4267_v37 = vpack.c.bf16 %v966_v27, %v962_v26  ;;  %v4269_v39 = vpack.c.bf16 %v975_v32, %v971_v31  ;;  %v1005_v26 = vld [vmem:[#allocation6 + $0x6d8] sm:$0xff]  ;;  %v619_v28 = vld [vmem:[%s5558_s28 + $0x2c8] sm:$0xff]  ;;  %v1002_v32 = vld [vmem:[#allocation6 + $0x6c0] sm:$0xff] }
  0xba   : > { %2403 = vmatmul.mubr.f32.gmra.mrb[4].mxu1 %v546_v41  ;;  %1380 = vmatprep.mubr.f32.mxu0 %v555_v44  ;;  %v974_v41 = vld [vmem:[#allocation6 + $0x5e0] sm:$0xff]  ;;  %v1009_v27 = vld [vmem:[#allocation6 + $0x6f8] sm:$0xff] }
  0xbb   : > { %2408 = vmatprep.mubr.f32.mxu1 %v555_v44  ;;  %4252 = vmatpush1.bf16.msra.mxu0 %v4251_v45  ;;  %v976_v44 = vld [vmem:[#allocation6 + $0x5f0] sm:$0xff]  ;;  %v979_v45 = vld [vmem:[#allocation6 + $0x608] sm:$0xff]  ;;  %v4541_v35 = vpack.c.bf16 %v1009_v27, %v1005_v26 }
  0xbc   : > { %4508 = vmatpush1.bf16.msra.mxu1 %v4507_v46  ;;  %4254 = vmatprep.subr.bf16.mxu0 %v4253_v47  ;;  %v983_v46 = vld [vmem:[#allocation6 + $0x628] sm:$0xff]  ;;  %v586_v47 = vld [vmem:[%s5558_s28 + $0x1c0] sm:$0xff]  ;;  %v4527_v52 = vpack.c.bf16 %v976_v44, %v972_v42  ;;  %v1036_v26 = vld [vmem:[#allocation6 + $0x7d0] sm:$0xff] }
  0xbd   : > { %1381 = vmatmul.mubr.f32.gmra.mrb[6].mxu0 %v554_v55  ;;  %4510 = vmatprep.subr.bf16.mxu1 %v4509_v51  ;;  %v4271_v51 = vpack.c.bf16 %v974_v41, %v970_v40  ;;  %v4273_v53 = vpack.c.bf16 %v983_v46, %v979_v45  ;;  %v1013_v40 = vld [vmem:[#allocation6 + $0x718] sm:$0xff]  ;;  %v627_v42 = vld [vmem:[%s5558_s28 + $0x308] sm:$0xff]  ;;  %v1010_v46 = vld [vmem:[#allocation6 + $0x700] sm:$0xff] }
  0xbe   : > { %2409 = vmatmul.mubr.f32.gmra.mrb[6].mxu1 %v554_v55  ;;  %1386 = vmatprep.mubr.f32.mxu0 %v563_v58  ;;  %v982_v55 = vld [vmem:[#allocation6 + $0x620] sm:$0xff]  ;;  %v1017_v41 = vld [vmem:[#allocation6 + $0x738] sm:$0xff] }
  0xbf   : > { %2414 = vmatprep.mubr.f32.mxu1 %v563_v58  ;;  %4256 = vmatpush1.bf16.msra.mxu0 %v4255_v59  ;;  %v984_v58 = vld [vmem:[#allocation6 + $0x630] sm:$0xff]  ;;  %v987_v59 = vld [vmem:[#allocation6 + $0x648] sm:$0xff]  ;;  %v4545_v49 = vpack.c.bf16 %v1017_v41, %v1013_v40  ;;  %v666_v41 = vld [vmem:[%s5558_s28 + $0x440] sm:$0xff] }
  0xc0   : > { %4512 = vmatpush1.bf16.msra.mxu1 %v4511_v60  ;;  %4258 = vmatprep.subr.bf16.mxu0 %v4257_v61  ;;  %v991_v60 = vld [vmem:[#allocation6 + $0x668] sm:$0xff]  ;;  %v594_v61 = vld [vmem:[%s5558_s28 + $0x200] sm:$0xff]  ;;  %v4531_v2 = vpack.c.bf16 %v984_v58, %v980_v56 }
  0xc1   : > { %1387 = vmatmul.mubr.f32.gmra.mrb[8].mxu0 %v562_v5  ;;  %4514 = vmatprep.subr.bf16.mxu1 %v4513_v1  ;;  %v4275_v1 = vpack.c.bf16 %v982_v55, %v978_v54  ;;  %v4277_v3 = vpack.c.bf16 %v991_v60, %v987_v59  ;;  %v1021_v54 = vld [vmem:[#allocation6 + $0x758] sm:$0xff]  ;;  %v635_v56 = vld [vmem:[%s5558_s28 + $0x348] sm:$0xff]  ;;  %v1018_v60 = vld [vmem:[#allocation6 + $0x740] sm:$0xff] }
  0xc2   : > { %2415 = vmatmul.mubr.f32.gmra.mrb[8].mxu1 %v562_v5  ;;  %1392 = vmatprep.mubr.f32.mxu0 %v571_v8  ;;  %v990_v5 = vld [vmem:[#allocation6 + $0x660] sm:$0xff]  ;;  %v1025_v55 = vld [vmem:[#allocation6 + $0x778] sm:$0xff]  ;;  %v667_v40 = vld [vmem:[%s5558_s28 + $0x448] sm:$0xff] }
  0xc3   : > { %2420 = vmatprep.mubr.f32.mxu1 %v571_v8  ;;  %4260 = vmatpush1.bf16.msra.mxu0 %v4259_v9  ;;  %v992_v8 = vld [vmem:[#allocation6 + $0x670] sm:$0xff]  ;;  %v995_v9 = vld [vmem:[#allocation6 + $0x688] sm:$0xff]  ;;  %v4549_v63 = vpack.c.bf16 %v1025_v55, %v1021_v54  ;;  %v722_v55 = vld [vmem:[%s5558_s28 + $0x600] sm:$0xff] }
  0xc4   : > { %4516 = vmatpush1.bf16.msra.mxu1 %v4515_v10  ;;  %4262 = vmatprep.subr.bf16.mxu0 %v4261_v11  ;;  %v999_v10 = vld [vmem:[#allocation6 + $0x6a8] sm:$0xff]  ;;  %v602_v11 = vld [vmem:[%s5558_s28 + $0x240] sm:$0xff]  ;;  %v4535_v16 = vpack.c.bf16 %v992_v8, %v988_v6 }
  0xc5   : > { %1393 = vmatmul.mubr.f32.gmra.mrb[10].mxu0 %v570_v19  ;;  %4518 = vmatprep.subr.bf16.mxu1 %v4517_v15  ;;  %v4279_v15 = vpack.c.bf16 %v990_v5, %v986_v4  ;;  %v4281_v17 = vpack.c.bf16 %v999_v10, %v995_v9  ;;  %v1029_v4 = vld [vmem:[#allocation6 + $0x798] sm:$0xff]  ;;  %v643_v6 = vld [vmem:[%s5558_s28 + $0x388] sm:$0xff]  ;;  %v1026_v10 = vld [vmem:[#allocation6 + $0x780] sm:$0xff] }
  0xc6   : > { %2421 = vmatmul.mubr.f32.gmra.mrb[10].mxu1 %v570_v19  ;;  %1398 = vmatprep.mubr.f32.mxu0 %v579_v22  ;;  %v998_v19 = vld [vmem:[#allocation6 + $0x6a0] sm:$0xff]  ;;  %v1033_v5 = vld [vmem:[#allocation6 + $0x7b8] sm:$0xff]  ;;  %v723_v54 = vld [vmem:[%s5558_s28 + $0x608] sm:$0xff] }
  0xc7   : > { %2426 = vmatprep.mubr.f32.mxu1 %v579_v22  ;;  %4264 = vmatpush1.bf16.msra.mxu0 %v4263_v23  ;;  %v1000_v22 = vld [vmem:[#allocation6 + $0x6b0] sm:$0xff]  ;;  %v1003_v23 = vld [vmem:[#allocation6 + $0x6c8] sm:$0xff]  ;;  %v4553_v13 = vpack.c.bf16 %v1033_v5, %v1029_v4  ;;  %v778_v5 = vld [vmem:[%s5558_s28 + $0x7c0] sm:$0xff] }
  0xc8   : > { %4520 = vmatpush1.bf16.msra.mxu1 %v4519_v24  ;;  %4266 = vmatprep.subr.bf16.mxu0 %v4265_v25  ;;  %v1007_v24 = vld [vmem:[#allocation6 + $0x6e8] sm:$0xff]  ;;  %v610_v25 = vld [vmem:[%s5558_s28 + $0x280] sm:$0xff]  ;;  %v4539_v30 = vpack.c.bf16 %v1000_v22, %v996_v20 }
  0xc9   : > { %1399 = vmatmul.mubr.f32.gmra.mrb[12].mxu0 %v578_v33  ;;  %4522 = vmatprep.subr.bf16.mxu1 %v4521_v29  ;;  %v4283_v29 = vpack.c.bf16 %v998_v19, %v994_v18  ;;  %v4285_v31 = vpack.c.bf16 %v1007_v24, %v1003_v23  ;;  %v1037_v18 = vld [vmem:[#allocation6 + $0x7d8] sm:$0xff]  ;;  %v651_v20 = vld [vmem:[%s5558_s28 + $0x3c8] sm:$0xff]  ;;  %v1034_v24 = vld [vmem:[#allocation6 + $0x7c0] sm:$0xff] }
  0xca   : > { %2427 = vmatmul.mubr.f32.gmra.mrb[12].mxu1 %v578_v33  ;;  %1404 = vmatprep.mubr.f32.mxu0 %v587_v36  ;;  %v1006_v33 = vld [vmem:[#allocation6 + $0x6e0] sm:$0xff]  ;;  %v1041_v19 = vld [vmem:[#allocation6 + $0x7f8] sm:$0xff]  ;;  %v779_v4 = vld [vmem:[%s5558_s28 + $0x7c8] sm:$0xff] }
  0xcb   : > { %2432 = vmatprep.mubr.f32.mxu1 %v587_v36  ;;  %4268 = vmatpush1.bf16.msra.mxu0 %v4267_v37  ;;  %v1008_v36 = vld [vmem:[#allocation6 + $0x6f0] sm:$0xff]  ;;  %v1011_v37 = vld [vmem:[#allocation6 + $0x708] sm:$0xff]  ;;  %v4557_v27 = vpack.c.bf16 %v1041_v19, %v1037_v18  ;;  %v541_v18 = vld [vmem:[%s5558_s28 + $0x58] sm:$0xff] }
  0xcc   : > { %4524 = vmatpush1.bf16.msra.mxu1 %v4523_v38  ;;  %4270 = vmatprep.subr.bf16.mxu0 %v4269_v39  ;;  %v1015_v38 = vld [vmem:[#allocation6 + $0x728] sm:$0xff]  ;;  %v618_v39 = vld [vmem:[%s5558_s28 + $0x2c0] sm:$0xff]  ;;  %v4543_v44 = vpack.c.bf16 %v1008_v36, %v1004_v34 }
  0xcd   : > { %1405 = vmatmul.mubr.f32.gmra.mrb[14].mxu0 %v586_v47  ;;  %4526 = vmatprep.subr.bf16.mxu1 %v4525_v43  ;;  %v4287_v43 = vpack.c.bf16 %v1006_v33, %v1002_v32  ;;  %v4289_v45 = vpack.c.bf16 %v1015_v38, %v1011_v37  ;;  %v1045_v32 = vld [vmem:[#allocation6 + $0x818] sm:$0xff]  ;;  %v659_v34 = vld [vmem:[%s5558_s28 + $0x408] sm:$0xff] }
  0xce   : > { %2433 = vmatmul.mubr.f32.gmra.mrb[14].mxu1 %v586_v47  ;;  %1410 = vmatprep.mubr.f32.mxu0 %v595_v50  ;;  %v1014_v47 = vld [vmem:[#allocation6 + $0x720] sm:$0xff]  ;;  %v1049_v33 = vld [vmem:[#allocation6 + $0x838] sm:$0xff] }
  0xcf   : > { %2438 = vmatprep.mubr.f32.mxu1 %v595_v50  ;;  %4272 = vmatpush1.bf16.msra.mxu0 %v4271_v51  ;;  %v1016_v50 = vld [vmem:[#allocation6 + $0x730] sm:$0xff]  ;;  %v1019_v51 = vld [vmem:[#allocation6 + $0x748] sm:$0xff]  ;;  %v4561_v38 = vpack.c.bf16 %v1049_v33, %v1045_v32 }
  0xd0   : > { %4528 = vmatpush1.bf16.msra.mxu1 %v4527_v52  ;;  %4274 = vmatprep.subr.bf16.mxu0 %v4273_v53  ;;  %v1023_v52 = vld [vmem:[#allocation6 + $0x768] sm:$0xff]  ;;  %v626_v53 = vld [vmem:[%s5558_s28 + $0x300] sm:$0xff]  ;;  %v4547_v58 = vpack.c.bf16 %v1016_v50, %v1012_v48 }
  0xd1   : > { %1411 = vmatmul.mubr.f32.gmra.mrb[16].mxu0 %v594_v61  ;;  %4530 = vmatprep.subr.bf16.mxu1 %v4529_v57  ;;  %v4291_v57 = vpack.c.bf16 %v1014_v47, %v1010_v46  ;;  %v4293_v59 = vpack.c.bf16 %v1023_v52, %v1019_v51  ;;  %v691_v46 = vld [vmem:[%s5558_s28 + $0x508] sm:$0xff]  ;;  %v690_v47 = vld [vmem:[%s5558_s28 + $0x500] sm:$0xff] }
  0xd2   : > { %2439 = vmatmul.mubr.f32.gmra.mrb[16].mxu1 %v594_v61  ;;  %1416 = vmatprep.mubr.f32.mxu0 %v603_v0  ;;  %v1022_v61 = vld [vmem:[#allocation6 + $0x760] sm:$0xff]  ;;  %v699_v48 = vld [vmem:[%s5558_s28 + $0x548] sm:$0xff] }
  0xd3   : > { %2444 = vmatprep.mubr.f32.mxu1 %v603_v0  ;;  %4276 = vmatpush1.bf16.msra.mxu0 %v4275_v1  ;;  %v1024_v0 = vld [vmem:[#allocation6 + $0x770] sm:$0xff]  ;;  %v1027_v1 = vld [vmem:[#allocation6 + $0x788] sm:$0xff]  ;;  %v706_v51 = vld [vmem:[%s5558_s28 + $0x580] sm:$0xff] }
  0xd4   : > { %4532 = vmatpush1.bf16.msra.mxu1 %v4531_v2  ;;  %4278 = vmatprep.subr.bf16.mxu0 %v4277_v3  ;;  %v1031_v2 = vld [vmem:[#allocation6 + $0x7a8] sm:$0xff]  ;;  %v634_v3 = vld [vmem:[%s5558_s28 + $0x340] sm:$0xff]  ;;  %v4551_v8 = vpack.c.bf16 %v1024_v0, %v1020_v62 }
  0xd5   : > { %1417 = vmatmul.mubr.f32.gmra.mrb[18].mxu0 %v602_v11  ;;  %4534 = vmatprep.subr.bf16.mxu1 %v4533_v7  ;;  %v4295_v7 = vpack.c.bf16 %v1022_v61, %v1018_v60  ;;  %v4297_v9 = vpack.c.bf16 %v1031_v2, %v1027_v1  ;;  %v707_v50 = vld [vmem:[%s5558_s28 + $0x588] sm:$0xff]  ;;  %v746_v61 = vld [vmem:[%s5558_s28 + $0x6c0] sm:$0xff] }
  0xd6   : > { %2445 = vmatmul.mubr.f32.gmra.mrb[18].mxu1 %v602_v11  ;;  %1422 = vmatprep.mubr.f32.mxu0 %v611_v14  ;;  %v1030_v11 = vld [vmem:[#allocation6 + $0x7a0] sm:$0xff]  ;;  %v715_v52 = vld [vmem:[%s5558_s28 + $0x5c8] sm:$0xff] }
  0xd7   : > { %2450 = vmatprep.mubr.f32.mxu1 %v611_v14  ;;  %4280 = vmatpush1.bf16.msra.mxu0 %v4279_v15  ;;  %v1032_v14 = vld [vmem:[#allocation6 + $0x7b0] sm:$0xff]  ;;  %v1035_v15 = vld [vmem:[#allocation6 + $0x7c8] sm:$0xff]  ;;  %v762_v1 = vld [vmem:[%s5558_s28 + $0x740] sm:$0xff] }
  0xd8   : > { %4536 = vmatpush1.bf16.msra.mxu1 %v4535_v16  ;;  %4282 = vmatprep.subr.bf16.mxu0 %v4281_v17  ;;  %v1039_v16 = vld [vmem:[#allocation6 + $0x7e8] sm:$0xff]  ;;  %v642_v17 = vld [vmem:[%s5558_s28 + $0x380] sm:$0xff]  ;;  %v4555_v22 = vpack.c.bf16 %v1032_v14, %v1028_v12 }
  0xd9   : > { %1423 = vmatmul.mubr.f32.gmra.mrb[20].mxu0 %v610_v25  ;;  %4538 = vmatprep.subr.bf16.mxu1 %v4537_v21  ;;  %v4299_v21 = vpack.c.bf16 %v1030_v11, %v1026_v10  ;;  %v4301_v23 = vpack.c.bf16 %v1039_v16, %v1035_v15  ;;  %v747_v60 = vld [vmem:[%s5558_s28 + $0x6c8] sm:$0xff]  ;;  %v1048_v10 = vld [vmem:[#allocation6 + $0x830] sm:$0xff]  ;;  %v1053_v15 = vld [vmem:[#allocation6 + $0x858] sm:$0xff] }
  0xda   : > { %2451 = vmatmul.mubr.f32.gmra.mrb[20].mxu1 %v610_v25  ;;  %1428 = vmatprep.mubr.f32.mxu0 %v619_v28  ;;  %v1038_v25 = vld [vmem:[#allocation6 + $0x7e0] sm:$0xff]  ;;  %v755_v62 = vld [vmem:[%s5558_s28 + $0x708] sm:$0xff]  ;;  %v1057_v16 = vld [vmem:[#allocation6 + $0x878] sm:$0xff] }
  0xdb   : > { %2456 = vmatprep.mubr.f32.mxu1 %v619_v28  ;;  %4284 = vmatpush1.bf16.msra.mxu0 %v4283_v29  ;;  %v1040_v28 = vld [vmem:[#allocation6 + $0x7f0] sm:$0xff]  ;;  %v1043_v29 = vld [vmem:[#allocation6 + $0x808] sm:$0xff] }
  0xdc   : > { %4540 = vmatpush1.bf16.msra.mxu1 %v4539_v30  ;;  %4286 = vmatprep.subr.bf16.mxu0 %v4285_v31  ;;  %v1047_v30 = vld [vmem:[#allocation6 + $0x828] sm:$0xff]  ;;  %v650_v31 = vld [vmem:[%s5558_s28 + $0x3c0] sm:$0xff]  ;;  %v4559_v36 = vpack.c.bf16 %v1040_v28, %v1036_v26  ;;  %v1061_v28 = vld [vmem:[#allocation6 + $0x898] sm:$0xff] }
  0xdd   : > { %1429 = vmatmul.mubr.f32.gmra.mrb[22].mxu0 %v618_v39  ;;  %4542 = vmatprep.subr.bf16.mxu1 %v4541_v35  ;;  %v4303_v35 = vpack.c.bf16 %v1038_v25, %v1034_v24  ;;  %v4305_v37 = vpack.c.bf16 %v1047_v30, %v1043_v29  ;;  %v763_v0 = vld [vmem:[%s5558_s28 + $0x748] sm:$0xff]  ;;  %v1056_v24 = vld [vmem:[#allocation6 + $0x870] sm:$0xff]  ;;  %v1065_v29 = vld [vmem:[#allocation6 + $0x8b8] sm:$0xff] }
  0xde   : > { %2457 = vmatmul.mubr.f32.gmra.mrb[22].mxu1 %v618_v39  ;;  %1434 = vmatprep.mubr.f32.mxu0 %v627_v42  ;;  %v658_v39 = vld [vmem:[%s5558_s28 + $0x400] sm:$0xff]  ;;  %v771_v2 = vld [vmem:[%s5558_s28 + $0x788] sm:$0xff]  ;;  %v549_v30 = vld [vmem:[%s5558_s28 + $0x98] sm:$0xff] }
  0xdf   : > { %2462 = vmatprep.mubr.f32.mxu1 %v627_v42  ;;  %4288 = vmatpush1.bf16.msra.mxu0 %v4287_v43  ;;  %v675_v42 = vld [vmem:[%s5558_s28 + $0x488] sm:$0xff]  ;;  %v674_v43 = vld [vmem:[%s5558_s28 + $0x480] sm:$0xff] }
  0xe0   : > { %4544 = vmatpush1.bf16.msra.mxu1 %v4543_v44  ;;  %4290 = vmatprep.subr.bf16.mxu0 %v4289_v45  ;;  %v683_v44 = vld [vmem:[%s5558_s28 + $0x4c8] sm:$0xff]  ;;  %v682_v45 = vld [vmem:[%s5558_s28 + $0x4c0] sm:$0xff] }
  0xe1   : > { %1435 = vmatmul.mubr.f32.gmra.mrb[24].mxu0 %v626_v53  ;;  %4546 = vmatprep.subr.bf16.mxu1 %v4545_v49  ;;  %v698_v49 = vld [vmem:[%s5558_s28 + $0x540] sm:$0xff]  ;;  %v1051_v11 = vld [vmem:[#allocation6 + $0x848] sm:$0xff] }
  0xe2   : > { %2463 = vmatmul.mubr.f32.gmra.mrb[24].mxu1 %v626_v53  ;;  %1440 = vmatprep.mubr.f32.mxu0 %v635_v56  ;;  %v714_v53 = vld [vmem:[%s5558_s28 + $0x5c0] sm:$0xff]  ;;  %v1055_v12 = vld [vmem:[#allocation6 + $0x868] sm:$0xff] }
  0xe3   : > { %2468 = vmatprep.mubr.f32.mxu1 %v635_v56  ;;  %4292 = vmatpush1.bf16.msra.mxu0 %v4291_v57  ;;  %v731_v56 = vld [vmem:[%s5558_s28 + $0x648] sm:$0xff]  ;;  %v730_v57 = vld [vmem:[%s5558_s28 + $0x640] sm:$0xff]  ;;  %v4309_v19 = vpack.c.bf16 %v1055_v12, %v1051_v11 }
  0xe4   : > { %4548 = vmatpush1.bf16.msra.mxu1 %v4547_v58  ;;  %4294 = vmatprep.subr.bf16.mxu0 %v4293_v59  ;;  %v739_v58 = vld [vmem:[%s5558_s28 + $0x688] sm:$0xff]  ;;  %v738_v59 = vld [vmem:[%s5558_s28 + $0x680] sm:$0xff] }
  0xe5   : > { %1441 = vmatmul.mubr.f32.gmra.mrb[26].mxu0 %v634_v3  ;;  %4550 = vmatprep.subr.bf16.mxu1 %v4549_v63  ;;  %v754_v63 = vld [vmem:[%s5558_s28 + $0x700] sm:$0xff]  ;;  %v1059_v25 = vld [vmem:[#allocation6 + $0x888] sm:$0xff] }
  0xe6   : > { %2469 = vmatmul.mubr.f32.gmra.mrb[26].mxu1 %v634_v3  ;;  %1446 = vmatprep.mubr.f32.mxu0 %v643_v6  ;;  %v770_v3 = vld [vmem:[%s5558_s28 + $0x780] sm:$0xff]  ;;  %v1063_v26 = vld [vmem:[#allocation6 + $0x8a8] sm:$0xff] }
  0xe7   : > { %2474 = vmatprep.mubr.f32.mxu1 %v643_v6  ;;  %4296 = vmatpush1.bf16.msra.mxu0 %v4295_v7  ;;  %v533_v6 = vld [vmem:[%s5558_s28 + $0x18] sm:$0xff]  ;;  %v1042_v7 = vld [vmem:[#allocation6 + $0x800] sm:$0xff]  ;;  %v4313_v33 = vpack.c.bf16 %v1063_v26, %v1059_v25 }
  0xe8   : > { %4552 = vmatpush1.bf16.msra.mxu1 %v4551_v8  ;;  %4298 = vmatprep.subr.bf16.mxu0 %v4297_v9  ;;  %v1046_v8 = vld [vmem:[#allocation6 + $0x820] sm:$0xff]  ;;  %v1044_v9 = vld [vmem:[#allocation6 + $0x810] sm:$0xff] }
  0xe9   : > { %1447 = vmatmul.mubr.f32.gmra.mrb[28].mxu0 %v642_v17  ;;  %4554 = vmatprep.subr.bf16.mxu1 %v4553_v13  ;;  %v532_v13 = vld [vmem:[%s5558_s28 + $0x10] sm:$0xff]  ;;  %v4307_v14 = vpack.c.bf16 %v1046_v8, %v1042_v7  ;;  %v1089_v7 = vld [vmem:[#allocation6 + $0x978] sm:$0xff]  ;;  %v1082_v12 = vld [vmem:[#allocation6 + $0x940] sm:$0xff] }
  0xea   : > { %2475 = vmatmul.mubr.f32.gmra.mrb[28].mxu1 %v642_v17  ;;  %1452 = vmatprep.mubr.f32.mxu0 %v651_v20  ;;  %v4563_v17 = vpack.c.bf16 %v1048_v10, %v1044_v9  ;;  %v573_v8 = vld [vmem:[%s5558_s28 + $0x158] sm:$0xff]  ;;  %v1090_v26 = vld [vmem:[#allocation6 + $0x980] sm:$0xff] }
  0xeb   : > { %2480 = vmatprep.mubr.f32.mxu1 %v651_v20  ;;  %4300 = vmatpush1.bf16.msra.mxu0 %v4299_v21  ;;  %v1050_v20 = vld [vmem:[#allocation6 + $0x840] sm:$0xff] }
  0xec   : > { %4556 = vmatpush1.bf16.msra.mxu1 %v4555_v22  ;;  %4302 = vmatprep.subr.bf16.mxu0 %v4301_v23  ;;  %v1054_v21 = vld [vmem:[#allocation6 + $0x860] sm:$0xff]  ;;  %v1052_v22 = vld [vmem:[#allocation6 + $0x850] sm:$0xff]  ;;  %v4565_v23 = vpack.c.bf16 %v1057_v16, %v1053_v15 }
  0xed   : > { %1453 = vmatmul.mubr.f32.gmra.mrb[30].mxu0 %v650_v31  ;;  %4558 = vmatprep.subr.bf16.mxu1 %v4557_v27  ;;  %v540_v27 = vld [vmem:[%s5558_s28 + $0x50] sm:$0xff]  ;;  %v4567_v32 = vpack.c.bf16 %v1056_v24, %v1052_v22  ;;  %v581_v22 = vld [vmem:[%s5558_s28 + $0x198] sm:$0xff] }
  0xee   : > { %2481 = vmatmul.mubr.f32.gmra.mrb[30].mxu1 %v650_v31  ;;  %1458 = vmatprep.mubr.f32.mxu0 %v659_v34  ;;  %v4311_v31 = vpack.c.bf16 %v1054_v21, %v1050_v20  ;;  %v1088_v16 = vld [vmem:[#allocation6 + $0x970] sm:$0xff]  ;;  %v1093_v20 = vld [vmem:[#allocation6 + $0x998] sm:$0xff] }
  0xef   : > { %2486 = vmatprep.mubr.f32.mxu1 %v659_v34  ;;  %4304 = vmatpush1.bf16.msra.mxu0 %v4303_v35  ;;  %v1058_v34 = vld [vmem:[#allocation6 + $0x880] sm:$0xff]  ;;  %v1097_v21 = vld [vmem:[#allocation6 + $0x9b8] sm:$0xff] }
  0xf0   : > { %4560 = vmatpush1.bf16.msra.mxu1 %v4559_v36  ;;  %4306 = vmatprep.subr.bf16.mxu0 %v4305_v37  ;;  %v1062_v35 = vld [vmem:[#allocation6 + $0x8a0] sm:$0xff]  ;;  %v1060_v36 = vld [vmem:[#allocation6 + $0x890] sm:$0xff]  ;;  %v4569_v37 = vpack.c.bf16 %v1065_v29, %v1061_v28  ;;  %v4585_v29 = vpack.c.bf16 %v1097_v21, %v1093_v20 }
  0xf1   : > { %1459 = vmatmul.mubr.f32.gmra.mrb[32].mxu0 %v658_v39  ;;  %4562 = vmatprep.subr.bf16.mxu1 %v4561_v38  ;;  %v1064_v38 = vld [vmem:[#allocation6 + $0x8b0] sm:$0xff] }
  0xf2   : > { %2487 = vmatmul.mubr.f32.gmra.mrb[32].mxu1 %v658_v39  ;;  %1464 = vmatprep.mubr.f32.mxu0 %v667_v40  ;;  %v1067_v39 = vld [vmem:[#allocation6 + $0x8c8] sm:$0xff]  ;;  %v1092_v28 = vld [vmem:[#allocation6 + $0x990] sm:$0xff] }
  0xf3   : > { %2492 = vmatprep.mubr.f32.mxu1 %v667_v40  ;;  %v1071_v40 = vld [vmem:[#allocation6 + $0x8e8] sm:$0xff]  ;;  %v1124_v20 = vld [vmem:[#allocation6 + $0xa90] sm:$0xff] }
  0xf5   : > { %1465 = vmatmul.mubr.f32.gmra.mrb[34].mxu0 %v666_v41 }
  0xf6   : > { %2493 = vmatmul.mubr.f32.gmra.mrb[34].mxu1 %v666_v41  ;;  %1470 = vmatprep.mubr.f32.mxu0 %v675_v42  ;;  %v548_v41 = vld [vmem:[%s5558_s28 + $0x90] sm:$0xff] }
  0xf7   : > { %2498 = vmatprep.mubr.f32.mxu1 %v675_v42  ;;  %v1069_v42 = vld [vmem:[#allocation6 + $0x8d8] sm:$0xff] }
  0xf9   : > { %1471 = vmatmul.mubr.f32.gmra.mrb[36].mxu0 %v674_v43 }
  0xfa   : > { %2499 = vmatmul.mubr.f32.gmra.mrb[36].mxu1 %v674_v43  ;;  %1476 = vmatprep.mubr.f32.mxu0 %v683_v44  ;;  %v1073_v43 = vld [vmem:[#allocation6 + $0x8f8] sm:$0xff] }
  0xfb   : > { %2504 = vmatprep.mubr.f32.mxu1 %v683_v44  ;;  %v557_v44 = vld [vmem:[%s5558_s28 + $0xd8] sm:$0xff] }
  0xfd   : > { %1477 = vmatmul.mubr.f32.gmra.mrb[38].mxu0 %v682_v45 }
  0xfe   : > { %2505 = vmatmul.mubr.f32.gmra.mrb[38].mxu1 %v682_v45  ;;  %1482 = vmatprep.mubr.f32.mxu0 %v691_v46  ;;  %v4315_v45 = vpack.c.bf16 %v1062_v35, %v1058_v34  ;;  %v1101_v34 = vld [vmem:[#allocation6 + $0x9d8] sm:$0xff] }
  0xff   : > { %2510 = vmatprep.mubr.f32.mxu1 %v691_v46  ;;  %v4571_v46 = vpack.c.bf16 %v1064_v38, %v1060_v36  ;;  %v1105_v35 = vld [vmem:[#allocation6 + $0x9f8] sm:$0xff] }
 0x100   : > { %v589_v36 = vld [vmem:[%s5558_s28 + $0x1d8] sm:$0xff] }
 0x101   : > { %1483 = vmatmul.mubr.f32.gmra.mrb[40].mxu0 %v690_v47 }
 0x102   : > { %2511 = vmatmul.mubr.f32.gmra.mrb[40].mxu1 %v690_v47  ;;  %1488 = vmatprep.mubr.f32.mxu0 %v699_v48  ;;  %v4317_v47 = vpack.c.bf16 %v1071_v40, %v1067_v39  ;;  %v1098_v40 = vld [vmem:[#allocation6 + $0x9c0] sm:$0xff] }
 0x103   : > { %2516 = vmatprep.mubr.f32.mxu1 %v699_v48  ;;  %v1066_v48 = vld [vmem:[#allocation6 + $0x8c0] sm:$0xff] }
 0x105   : > { %1489 = vmatmul.mubr.f32.gmra.mrb[42].mxu0 %v698_v49 }
 0x106   : > { %2517 = vmatmul.mubr.f32.gmra.mrb[42].mxu1 %v698_v49  ;;  %1494 = vmatprep.mubr.f32.mxu0 %v707_v50  ;;  %v1070_v49 = vld [vmem:[#allocation6 + $0x8e0] sm:$0xff] }
 0x107   : > { %2522 = vmatprep.mubr.f32.mxu1 %v707_v50  ;;  %v1068_v50 = vld [vmem:[#allocation6 + $0x8d0] sm:$0xff] }
 0x109   : > { %1495 = vmatmul.mubr.f32.gmra.mrb[44].mxu0 %v706_v51 }
 0x10a   : > { %2523 = vmatmul.mubr.f32.gmra.mrb[44].mxu1 %v706_v51  ;;  %1500 = vmatprep.mubr.f32.mxu0 %v715_v52  ;;  %v4573_v51 = vpack.c.bf16 %v1073_v43, %v1069_v42  ;;  %v1100_v42 = vld [vmem:[#allocation6 + $0x9d0] sm:$0xff]  ;;  %v4589_v43 = vpack.c.bf16 %v1105_v35, %v1101_v34 }
 0x10b   : > { %2528 = vmatprep.mubr.f32.mxu1 %v715_v52  ;;  %v1072_v52 = vld [vmem:[#allocation6 + $0x8f0] sm:$0xff] }
 0x10c   : > { %v1132_v34 = vld [vmem:[#allocation6 + $0xad0] sm:$0xff] }
 0x10d   : > { %1501 = vmatmul.mubr.f32.gmra.mrb[46].mxu0 %v714_v53 }
 0x10e   : > { %2529 = vmatmul.mubr.f32.gmra.mrb[46].mxu1 %v714_v53  ;;  %1506 = vmatprep.mubr.f32.mxu0 %v723_v54  ;;  %v1075_v53 = vld [vmem:[#allocation6 + $0x908] sm:$0xff] }
 0x10f   : > { %2534 = vmatprep.mubr.f32.mxu1 %v723_v54  ;;  %v1079_v54 = vld [vmem:[#allocation6 + $0x928] sm:$0xff] }
 0x111   : > { %1507 = vmatmul.mubr.f32.gmra.mrb[48].mxu0 %v722_v55 }
 0x112   : > { %2535 = vmatmul.mubr.f32.gmra.mrb[48].mxu1 %v722_v55  ;;  %1512 = vmatprep.mubr.f32.mxu0 %v731_v56  ;;  %v556_v55 = vld [vmem:[%s5558_s28 + $0xd0] sm:$0xff] }
 0x113   : > { %2540 = vmatprep.mubr.f32.mxu1 %v731_v56  ;;  %v1077_v56 = vld [vmem:[#allocation6 + $0x918] sm:$0xff] }
 0x115   : > { %1513 = vmatmul.mubr.f32.gmra.mrb[50].mxu0 %v730_v57 }
 0x116   : > { %2541 = vmatmul.mubr.f32.gmra.mrb[50].mxu1 %v730_v57  ;;  %1518 = vmatprep.mubr.f32.mxu0 %v739_v58  ;;  %v1081_v57 = vld [vmem:[#allocation6 + $0x938] sm:$0xff] }
 0x117   : > { %2546 = vmatprep.mubr.f32.mxu1 %v739_v58  ;;  %v565_v58 = vld [vmem:[%s5558_s28 + $0x118] sm:$0xff] }
 0x119   : > { %1519 = vmatmul.mubr.f32.gmra.mrb[52].mxu0 %v738_v59 }
 0x11a   : > { %2547 = vmatmul.mubr.f32.gmra.mrb[52].mxu1 %v738_v59  ;;  %1524 = vmatprep.mubr.f32.mxu0 %v747_v60  ;;  %v4319_v59 = vpack.c.bf16 %v1070_v49, %v1066_v48  ;;  %v1109_v48 = vld [vmem:[#allocation6 + $0xa18] sm:$0xff] }
 0x11b   : > { %2552 = vmatprep.mubr.f32.mxu1 %v747_v60  ;;  %v4575_v60 = vpack.c.bf16 %v1072_v52, %v1068_v50  ;;  %v1113_v49 = vld [vmem:[#allocation6 + $0xa38] sm:$0xff] }
 0x11c   : > { %v597_v50 = vld [vmem:[%s5558_s28 + $0x218] sm:$0xff] }
 0x11d   : > { %1525 = vmatmul.mubr.f32.gmra.mrb[54].mxu0 %v746_v61 }
 0x11e   : > { %2553 = vmatmul.mubr.f32.gmra.mrb[54].mxu1 %v746_v61  ;;  %1530 = vmatprep.mubr.f32.mxu0 %v755_v62  ;;  %v4321_v61 = vpack.c.bf16 %v1079_v54, %v1075_v53  ;;  %v1106_v54 = vld [vmem:[#allocation6 + $0xa00] sm:$0xff] }
 0x11f   : > { %2558 = vmatprep.mubr.f32.mxu1 %v755_v62  ;;  %v1074_v62 = vld [vmem:[#allocation6 + $0x900] sm:$0xff] }
 0x121   : > { %1531 = vmatmul.mubr.f32.gmra.mrb[56].mxu0 %v754_v63 }
 0x122   : > { %2559 = vmatmul.mubr.f32.gmra.mrb[56].mxu1 %v754_v63  ;;  %1536 = vmatprep.mubr.f32.mxu0 %v763_v0  ;;  %v1078_v63 = vld [vmem:[#allocation6 + $0x920] sm:$0xff] }
 0x123   : > { %2564 = vmatprep.mubr.f32.mxu1 %v763_v0  ;;  %v1076_v0 = vld [vmem:[#allocation6 + $0x910] sm:$0xff]  ;;  %v4323_v9 = vpack.c.bf16 %v1078_v63, %v1074_v62  ;;  %v1117_v62 = vld [vmem:[#allocation6 + $0xa58] sm:$0xff] }
 0x124   : > { %v1121_v63 = vld [vmem:[#allocation6 + $0xa78] sm:$0xff] }
 0x125   : > { %1537 = vmatmul.mubr.f32.gmra.mrb[58].mxu0 %v762_v1 }
 0x126   : > { %2565 = vmatmul.mubr.f32.gmra.mrb[58].mxu1 %v762_v1  ;;  %1542 = vmatprep.mubr.f32.mxu0 %v771_v2  ;;  %v4577_v1 = vpack.c.bf16 %v1081_v57, %v1077_v56  ;;  %v1108_v56 = vld [vmem:[#allocation6 + $0xa10] sm:$0xff]  ;;  %v4593_v57 = vpack.c.bf16 %v1113_v49, %v1109_v48 }
 0x127   : > { %2570 = vmatprep.mubr.f32.mxu1 %v771_v2  ;;  %v1080_v2 = vld [vmem:[#allocation6 + $0x930] sm:$0xff] }
 0x128   : > { %v4579_v10 = vpack.c.bf16 %v1080_v2, %v1076_v0  ;;  %v605_v0 = vld [vmem:[%s5558_s28 + $0x258] sm:$0xff]  ;;  %v1140_v48 = vld [vmem:[#allocation6 + $0xb10] sm:$0xff] }
 0x129   : > { %1543 = vmatmul.mubr.f32.gmra.mrb[60].mxu0 %v770_v3 }
 0x12a   : > { %2571 = vmatmul.mubr.f32.gmra.mrb[60].mxu1 %v770_v3  ;;  %1548 = vmatprep.mubr.f32.mxu0 %v779_v4  ;;  %v1083_v3 = vld [vmem:[#allocation6 + $0x948] sm:$0xff] }
 0x12b   : > { %2576 = vmatprep.mubr.f32.mxu1 %v779_v4  ;;  %v1087_v4 = vld [vmem:[#allocation6 + $0x968] sm:$0xff] }
 0x12c   : > { %v4325_v11 = vpack.c.bf16 %v1087_v4, %v1083_v3  ;;  %v1114_v4 = vld [vmem:[#allocation6 + $0xa40] sm:$0xff] }
 0x12d   : > { %1549 = vmatmul.mubr.f32.gmra.mrb[62].mxu0 %v778_v5 }
 0x12e   : > { %2577 = vmatmul.mubr.f32.gmra.mrb[62].mxu1 %v778_v5  ;;  %1619 = vmatprep.mubr.f32.mxu0 %v533_v6  ;;  %v564_v5 = vld [vmem:[%s5558_s28 + $0x110] sm:$0xff] }
 0x12f   : > { %2647 = vmatprep.mubr.f32.mxu1 %v533_v6  ;;  %v1085_v6 = vld [vmem:[#allocation6 + $0x958] sm:$0xff] }
 0x130   : > { %v4581_v15 = vpack.c.bf16 %v1089_v7, %v1085_v6  ;;  %v1116_v6 = vld [vmem:[#allocation6 + $0xa50] sm:$0xff]  ;;  %v4597_v7 = vpack.c.bf16 %v1121_v63, %v1117_v62 }
 0x131   : > { %1620 = vmatmul.mubr.f32.vlgmr.msra.gmra.mrb[0].mxu0 %v532_v13  ;;  %v1148_v62 = vld [vmem:[#allocation6 + $0xb50] sm:$0xff] }
 0x132   : > { %2648 = vmatmul.mubr.f32.vlgmr.msra.gmra.mrb[0].mxu1 %v532_v13  ;;  %4308 = vmatpush1.bf16.msra.mxu0 %v4307_v14  ;;  %v1086_v13 = vld [vmem:[#allocation6 + $0x960] sm:$0xff]  ;;  %v1084_v14 = vld [vmem:[#allocation6 + $0x950] sm:$0xff] }
 0x133   : > { %4564 = vmatpush1.bf16.msra.mxu1 %v4563_v17  ;;  %1625 = vmatprep.mubr.f32.mxu0 %v541_v18  ;;  %v1091_v17 = vld [vmem:[#allocation6 + $0x988] sm:$0xff]  ;;  %v4583_v24 = vpack.c.bf16 %v1088_v16, %v1084_v14  ;;  %v613_v14 = vld [vmem:[%s5558_s28 + $0x298] sm:$0xff] }
 0x134   : > { %2653 = vmatprep.mubr.f32.mxu1 %v541_v18  ;;  %4310 = vmatprep.subr.bf16.mxu0 %v4309_v19  ;;  %v1095_v18 = vld [vmem:[#allocation6 + $0x9a8] sm:$0xff]  ;;  %v572_v19 = vld [vmem:[%s5558_s28 + $0x150] sm:$0xff] }
 0x135   : > { %1626 = vmatmul.mubr.f32.gmra.mrb[2].mxu0 %v540_v27  ;;  %4566 = vmatprep.subr.bf16.mxu1 %v4565_v23  ;;  %v4327_v23 = vpack.c.bf16 %v1086_v13, %v1082_v12  ;;  %v4329_v25 = vpack.c.bf16 %v1095_v18, %v1091_v17  ;;  %v1125_v12 = vld [vmem:[#allocation6 + $0xa98] sm:$0xff]  ;;  %v1122_v18 = vld [vmem:[#allocation6 + $0xa80] sm:$0xff] }
 0x136   : > { %2654 = vmatmul.mubr.f32.gmra.mrb[2].mxu1 %v540_v27  ;;  %1631 = vmatprep.mubr.f32.mxu0 %v549_v30  ;;  %v1094_v27 = vld [vmem:[#allocation6 + $0x9a0] sm:$0xff]  ;;  %v1129_v13 = vld [vmem:[#allocation6 + $0xab8] sm:$0xff] }
 0x137   : > { %2659 = vmatprep.mubr.f32.mxu1 %v549_v30  ;;  %4312 = vmatpush1.bf16.msra.mxu0 %v4311_v31  ;;  %v1096_v30 = vld [vmem:[#allocation6 + $0x9b0] sm:$0xff]  ;;  %v1099_v31 = vld [vmem:[#allocation6 + $0x9c8] sm:$0xff]  ;;  %v4601_v21 = vpack.c.bf16 %v1129_v13, %v1125_v12 }
 0x138   : > { %4568 = vmatpush1.bf16.msra.mxu1 %v4567_v32  ;;  %4314 = vmatprep.subr.bf16.mxu0 %v4313_v33  ;;  %v1103_v32 = vld [vmem:[#allocation6 + $0x9e8] sm:$0xff]  ;;  %v580_v33 = vld [vmem:[%s5558_s28 + $0x190] sm:$0xff]  ;;  %v4587_v38 = vpack.c.bf16 %v1096_v30, %v1092_v28  ;;  %v621_v28 = vld [vmem:[%s5558_s28 + $0x2d8] sm:$0xff] }
 0x139   : > { %1632 = vmatmul.mubr.f32.gmra.mrb[4].mxu0 %v548_v41  ;;  %4570 = vmatprep.subr.bf16.mxu1 %v4569_v37  ;;  %v4331_v37 = vpack.c.bf16 %v1094_v27, %v1090_v26  ;;  %v4333_v39 = vpack.c.bf16 %v1103_v32, %v1099_v31  ;;  %v1133_v26 = vld [vmem:[#allocation6 + $0xad8] sm:$0xff]  ;;  %v1130_v32 = vld [vmem:[#allocation6 + $0xac0] sm:$0xff]  ;;  %v1156_v12 = vld [vmem:[#allocation6 + $0xb90] sm:$0xff] }
 0x13a   : > { %2660 = vmatmul.mubr.f32.gmra.mrb[4].mxu1 %v548_v41  ;;  %1637 = vmatprep.mubr.f32.mxu0 %v557_v44  ;;  %v1102_v41 = vld [vmem:[#allocation6 + $0x9e0] sm:$0xff]  ;;  %v1137_v27 = vld [vmem:[#allocation6 + $0xaf8] sm:$0xff] }
 0x13b   : > { %2665 = vmatprep.mubr.f32.mxu1 %v557_v44  ;;  %4316 = vmatpush1.bf16.msra.mxu0 %v4315_v45  ;;  %v1104_v44 = vld [vmem:[#allocation6 + $0x9f0] sm:$0xff]  ;;  %v1107_v45 = vld [vmem:[#allocation6 + $0xa08] sm:$0xff]  ;;  %v4605_v35 = vpack.c.bf16 %v1137_v27, %v1133_v26 }
 0x13c   : > { %4572 = vmatpush1.bf16.msra.mxu1 %v4571_v46  ;;  %4318 = vmatprep.subr.bf16.mxu0 %v4317_v47  ;;  %v1111_v46 = vld [vmem:[#allocation6 + $0xa28] sm:$0xff]  ;;  %v588_v47 = vld [vmem:[%s5558_s28 + $0x1d0] sm:$0xff]  ;;  %v4591_v52 = vpack.c.bf16 %v1104_v44, %v1100_v42  ;;  %v629_v42 = vld [vmem:[%s5558_s28 + $0x318] sm:$0xff] }
 0x13d   : > { %1638 = vmatmul.mubr.f32.gmra.mrb[6].mxu0 %v556_v55  ;;  %4574 = vmatprep.subr.bf16.mxu1 %v4573_v51  ;;  %v4335_v51 = vpack.c.bf16 %v1102_v41, %v1098_v40  ;;  %v4337_v53 = vpack.c.bf16 %v1111_v46, %v1107_v45  ;;  %v1141_v40 = vld [vmem:[#allocation6 + $0xb18] sm:$0xff]  ;;  %v1138_v46 = vld [vmem:[#allocation6 + $0xb00] sm:$0xff]  ;;  %v1164_v26 = vld [vmem:[#allocation6 + $0xbd0] sm:$0xff] }
 0x13e   : > { %2666 = vmatmul.mubr.f32.gmra.mrb[6].mxu1 %v556_v55  ;;  %1643 = vmatprep.mubr.f32.mxu0 %v565_v58  ;;  %v1110_v55 = vld [vmem:[#allocation6 + $0xa20] sm:$0xff]  ;;  %v1145_v41 = vld [vmem:[#allocation6 + $0xb38] sm:$0xff] }
 0x13f   : > { %2671 = vmatprep.mubr.f32.mxu1 %v565_v58  ;;  %4320 = vmatpush1.bf16.msra.mxu0 %v4319_v59  ;;  %v1112_v58 = vld [vmem:[#allocation6 + $0xa30] sm:$0xff]  ;;  %v1115_v59 = vld [vmem:[#allocation6 + $0xa48] sm:$0xff]  ;;  %v4609_v49 = vpack.c.bf16 %v1145_v41, %v1141_v40  ;;  %v669_v40 = vld [vmem:[%s5558_s28 + $0x458] sm:$0xff] }
 0x140   : > { %4576 = vmatpush1.bf16.msra.mxu1 %v4575_v60  ;;  %4322 = vmatprep.subr.bf16.mxu0 %v4321_v61  ;;  %v1119_v60 = vld [vmem:[#allocation6 + $0xa68] sm:$0xff]  ;;  %v596_v61 = vld [vmem:[%s5558_s28 + $0x210] sm:$0xff]  ;;  %v4595_v2 = vpack.c.bf16 %v1112_v58, %v1108_v56  ;;  %v637_v56 = vld [vmem:[%s5558_s28 + $0x358] sm:$0xff] }
 0x141   : > { %1644 = vmatmul.mubr.f32.gmra.mrb[8].mxu0 %v564_v5  ;;  %4578 = vmatprep.subr.bf16.mxu1 %v4577_v1  ;;  %v4339_v1 = vpack.c.bf16 %v1110_v55, %v1106_v54  ;;  %v4341_v3 = vpack.c.bf16 %v1119_v60, %v1115_v59  ;;  %v1149_v54 = vld [vmem:[#allocation6 + $0xb58] sm:$0xff]  ;;  %v1146_v60 = vld [vmem:[#allocation6 + $0xb40] sm:$0xff]  ;;  %v668_v41 = vld [vmem:[%s5558_s28 + $0x450] sm:$0xff] }
 0x142   : > { %2672 = vmatmul.mubr.f32.gmra.mrb[8].mxu1 %v564_v5  ;;  %1649 = vmatprep.mubr.f32.mxu0 %v573_v8  ;;  %v1118_v5 = vld [vmem:[#allocation6 + $0xa60] sm:$0xff]  ;;  %v1153_v55 = vld [vmem:[#allocation6 + $0xb78] sm:$0xff] }
 0x143   : > { %2677 = vmatprep.mubr.f32.mxu1 %v573_v8  ;;  %4324 = vmatpush1.bf16.msra.mxu0 %v4323_v9  ;;  %v1120_v8 = vld [vmem:[#allocation6 + $0xa70] sm:$0xff]  ;;  %v1123_v9 = vld [vmem:[#allocation6 + $0xa88] sm:$0xff]  ;;  %v4613_v63 = vpack.c.bf16 %v1153_v55, %v1149_v54  ;;  %v725_v54 = vld [vmem:[%s5558_s28 + $0x618] sm:$0xff] }
 0x144   : > { %4580 = vmatpush1.bf16.msra.mxu1 %v4579_v10  ;;  %4326 = vmatprep.subr.bf16.mxu0 %v4325_v11  ;;  %v1127_v10 = vld [vmem:[#allocation6 + $0xaa8] sm:$0xff]  ;;  %v604_v11 = vld [vmem:[%s5558_s28 + $0x250] sm:$0xff]  ;;  %v4599_v16 = vpack.c.bf16 %v1120_v8, %v1116_v6  ;;  %v645_v6 = vld [vmem:[%s5558_s28 + $0x398] sm:$0xff] }
 0x145   : > { %1650 = vmatmul.mubr.f32.gmra.mrb[10].mxu0 %v572_v19  ;;  %4582 = vmatprep.subr.bf16.mxu1 %v4581_v15  ;;  %v4343_v15 = vpack.c.bf16 %v1118_v5, %v1114_v4  ;;  %v4345_v17 = vpack.c.bf16 %v1127_v10, %v1123_v9  ;;  %v1157_v4 = vld [vmem:[#allocation6 + $0xb98] sm:$0xff]  ;;  %v1154_v10 = vld [vmem:[#allocation6 + $0xb80] sm:$0xff]  ;;  %v724_v55 = vld [vmem:[%s5558_s28 + $0x610] sm:$0xff] }
 0x146   : > { %2678 = vmatmul.mubr.f32.gmra.mrb[10].mxu1 %v572_v19  ;;  %1655 = vmatprep.mubr.f32.mxu0 %v581_v22  ;;  %v1126_v19 = vld [vmem:[#allocation6 + $0xaa0] sm:$0xff]  ;;  %v1161_v5 = vld [vmem:[#allocation6 + $0xbb8] sm:$0xff] }
 0x147   : > { %2683 = vmatprep.mubr.f32.mxu1 %v581_v22  ;;  %4328 = vmatpush1.bf16.msra.mxu0 %v4327_v23  ;;  %v1128_v22 = vld [vmem:[#allocation6 + $0xab0] sm:$0xff]  ;;  %v1131_v23 = vld [vmem:[#allocation6 + $0xac8] sm:$0xff]  ;;  %v4617_v13 = vpack.c.bf16 %v1161_v5, %v1157_v4  ;;  %v781_v4 = vld [vmem:[%s5558_s28 + $0x7d8] sm:$0xff] }
 0x148   : > { %4584 = vmatpush1.bf16.msra.mxu1 %v4583_v24  ;;  %4330 = vmatprep.subr.bf16.mxu0 %v4329_v25  ;;  %v1135_v24 = vld [vmem:[#allocation6 + $0xae8] sm:$0xff]  ;;  %v612_v25 = vld [vmem:[%s5558_s28 + $0x290] sm:$0xff]  ;;  %v4603_v30 = vpack.c.bf16 %v1128_v22, %v1124_v20  ;;  %v653_v20 = vld [vmem:[%s5558_s28 + $0x3d8] sm:$0xff] }
 0x149   : > { %1656 = vmatmul.mubr.f32.gmra.mrb[12].mxu0 %v580_v33  ;;  %4586 = vmatprep.subr.bf16.mxu1 %v4585_v29  ;;  %v4347_v29 = vpack.c.bf16 %v1126_v19, %v1122_v18  ;;  %v4349_v31 = vpack.c.bf16 %v1135_v24, %v1131_v23  ;;  %v1165_v18 = vld [vmem:[#allocation6 + $0xbd8] sm:$0xff]  ;;  %v1162_v24 = vld [vmem:[#allocation6 + $0xbc0] sm:$0xff]  ;;  %v780_v5 = vld [vmem:[%s5558_s28 + $0x7d0] sm:$0xff] }
 0x14a   : > { %2684 = vmatmul.mubr.f32.gmra.mrb[12].mxu1 %v580_v33  ;;  %1661 = vmatprep.mubr.f32.mxu0 %v589_v36  ;;  %v1134_v33 = vld [vmem:[#allocation6 + $0xae0] sm:$0xff]  ;;  %v1169_v19 = vld [vmem:[#allocation6 + $0xbf8] sm:$0xff] }
 0x14b   : > { %2689 = vmatprep.mubr.f32.mxu1 %v589_v36  ;;  %4332 = vmatpush1.bf16.msra.mxu0 %v4331_v37  ;;  %v1136_v36 = vld [vmem:[#allocation6 + $0xaf0] sm:$0xff]  ;;  %v1139_v37 = vld [vmem:[#allocation6 + $0xb08] sm:$0xff]  ;;  %v4621_v27 = vpack.c.bf16 %v1169_v19, %v1165_v18 }
 0x14c   : > { %4588 = vmatpush1.bf16.msra.mxu1 %v4587_v38  ;;  %4334 = vmatprep.subr.bf16.mxu0 %v4333_v39  ;;  %v1143_v38 = vld [vmem:[#allocation6 + $0xb28] sm:$0xff]  ;;  %v620_v39 = vld [vmem:[%s5558_s28 + $0x2d0] sm:$0xff]  ;;  %v4607_v44 = vpack.c.bf16 %v1136_v36, %v1132_v34  ;;  %v661_v34 = vld [vmem:[%s5558_s28 + $0x418] sm:$0xff] }
 0x14d   : > { %1662 = vmatmul.mubr.f32.gmra.mrb[14].mxu0 %v588_v47  ;;  %4590 = vmatprep.subr.bf16.mxu1 %v4589_v43  ;;  %v4351_v43 = vpack.c.bf16 %v1134_v33, %v1130_v32  ;;  %v4353_v45 = vpack.c.bf16 %v1143_v38, %v1139_v37  ;;  %v1173_v32 = vld [vmem:[#allocation6 + $0xc18] sm:$0xff]  ;;  %v543_v18 = vld [vmem:[%s5558_s28 + $0x68] sm:$0xff] }
 0x14e   : > { %2690 = vmatmul.mubr.f32.gmra.mrb[14].mxu1 %v588_v47  ;;  %1667 = vmatprep.mubr.f32.mxu0 %v597_v50  ;;  %v1142_v47 = vld [vmem:[#allocation6 + $0xb20] sm:$0xff]  ;;  %v1177_v33 = vld [vmem:[#allocation6 + $0xc38] sm:$0xff] }
 0x14f   : > { %2695 = vmatprep.mubr.f32.mxu1 %v597_v50  ;;  %4336 = vmatpush1.bf16.msra.mxu0 %v4335_v51  ;;  %v1144_v50 = vld [vmem:[#allocation6 + $0xb30] sm:$0xff]  ;;  %v1147_v51 = vld [vmem:[#allocation6 + $0xb48] sm:$0xff]  ;;  %v4625_v38 = vpack.c.bf16 %v1177_v33, %v1173_v32 }
 0x150   : > { %4592 = vmatpush1.bf16.msra.mxu1 %v4591_v52  ;;  %4338 = vmatprep.subr.bf16.mxu0 %v4337_v53  ;;  %v1151_v52 = vld [vmem:[#allocation6 + $0xb68] sm:$0xff]  ;;  %v628_v53 = vld [vmem:[%s5558_s28 + $0x310] sm:$0xff]  ;;  %v4611_v58 = vpack.c.bf16 %v1144_v50, %v1140_v48  ;;  %v701_v48 = vld [vmem:[%s5558_s28 + $0x558] sm:$0xff] }
 0x151   : > { %1668 = vmatmul.mubr.f32.gmra.mrb[16].mxu0 %v596_v61  ;;  %4594 = vmatprep.subr.bf16.mxu1 %v4593_v57  ;;  %v4355_v57 = vpack.c.bf16 %v1142_v47, %v1138_v46  ;;  %v4357_v59 = vpack.c.bf16 %v1151_v52, %v1147_v51  ;;  %v693_v46 = vld [vmem:[%s5558_s28 + $0x518] sm:$0xff]  ;;  %v692_v47 = vld [vmem:[%s5558_s28 + $0x510] sm:$0xff] }
 0x152   : > { %2696 = vmatmul.mubr.f32.gmra.mrb[16].mxu1 %v596_v61  ;;  %1673 = vmatprep.mubr.f32.mxu0 %v605_v0  ;;  %v1150_v61 = vld [vmem:[#allocation6 + $0xb60] sm:$0xff]  ;;  %v709_v50 = vld [vmem:[%s5558_s28 + $0x598] sm:$0xff]  ;;  %v708_v51 = vld [vmem:[%s5558_s28 + $0x590] sm:$0xff] }
 0x153   : > { %2701 = vmatprep.mubr.f32.mxu1 %v605_v0  ;;  %4340 = vmatpush1.bf16.msra.mxu0 %v4339_v1  ;;  %v1152_v0 = vld [vmem:[#allocation6 + $0xb70] sm:$0xff]  ;;  %v1155_v1 = vld [vmem:[#allocation6 + $0xb88] sm:$0xff]  ;;  %v717_v52 = vld [vmem:[%s5558_s28 + $0x5d8] sm:$0xff] }
 0x154   : > { %4596 = vmatpush1.bf16.msra.mxu1 %v4595_v2  ;;  %4342 = vmatprep.subr.bf16.mxu0 %v4341_v3  ;;  %v1159_v2 = vld [vmem:[#allocation6 + $0xba8] sm:$0xff]  ;;  %v636_v3 = vld [vmem:[%s5558_s28 + $0x350] sm:$0xff]  ;;  %v4615_v8 = vpack.c.bf16 %v1152_v0, %v1148_v62  ;;  %v757_v62 = vld [vmem:[%s5558_s28 + $0x718] sm:$0xff] }
 0x155   : > { %1674 = vmatmul.mubr.f32.gmra.mrb[18].mxu0 %v604_v11  ;;  %4598 = vmatprep.subr.bf16.mxu1 %v4597_v7  ;;  %v4359_v7 = vpack.c.bf16 %v1150_v61, %v1146_v60  ;;  %v4361_v9 = vpack.c.bf16 %v1159_v2, %v1155_v1  ;;  %v749_v60 = vld [vmem:[%s5558_s28 + $0x6d8] sm:$0xff]  ;;  %v748_v61 = vld [vmem:[%s5558_s28 + $0x6d0] sm:$0xff] }
 0x156   : > { %2702 = vmatmul.mubr.f32.gmra.mrb[18].mxu1 %v604_v11  ;;  %1679 = vmatprep.mubr.f32.mxu0 %v613_v14  ;;  %v1158_v11 = vld [vmem:[#allocation6 + $0xba0] sm:$0xff]  ;;  %v765_v0 = vld [vmem:[%s5558_s28 + $0x758] sm:$0xff]  ;;  %v764_v1 = vld [vmem:[%s5558_s28 + $0x750] sm:$0xff] }
 0x157   : > { %2707 = vmatprep.mubr.f32.mxu1 %v613_v14  ;;  %4344 = vmatpush1.bf16.msra.mxu0 %v4343_v15  ;;  %v1160_v14 = vld [vmem:[#allocation6 + $0xbb0] sm:$0xff]  ;;  %v1163_v15 = vld [vmem:[#allocation6 + $0xbc8] sm:$0xff]  ;;  %v773_v2 = vld [vmem:[%s5558_s28 + $0x798] sm:$0xff] }
 0x158   : > { %4600 = vmatpush1.bf16.msra.mxu1 %v4599_v16  ;;  %4346 = vmatprep.subr.bf16.mxu0 %v4345_v17  ;;  %v1167_v16 = vld [vmem:[#allocation6 + $0xbe8] sm:$0xff]  ;;  %v644_v17 = vld [vmem:[%s5558_s28 + $0x390] sm:$0xff]  ;;  %v4619_v22 = vpack.c.bf16 %v1160_v14, %v1156_v12 }
 0x159   : > { %1680 = vmatmul.mubr.f32.gmra.mrb[20].mxu0 %v612_v25  ;;  %4602 = vmatprep.subr.bf16.mxu1 %v4601_v21  ;;  %v4363_v21 = vpack.c.bf16 %v1158_v11, %v1154_v10  ;;  %v4365_v23 = vpack.c.bf16 %v1167_v16, %v1163_v15  ;;  %v1176_v10 = vld [vmem:[#allocation6 + $0xc30] sm:$0xff]  ;;  %v1179_v11 = vld [vmem:[#allocation6 + $0xc48] sm:$0xff]  ;;  %v1181_v15 = vld [vmem:[#allocation6 + $0xc58] sm:$0xff] }
 0x15a   : > { %2708 = vmatmul.mubr.f32.gmra.mrb[20].mxu1 %v612_v25  ;;  %1685 = vmatprep.mubr.f32.mxu0 %v621_v28  ;;  %v1166_v25 = vld [vmem:[#allocation6 + $0xbe0] sm:$0xff]  ;;  %v1183_v12 = vld [vmem:[#allocation6 + $0xc68] sm:$0xff]  ;;  %v1185_v16 = vld [vmem:[#allocation6 + $0xc78] sm:$0xff] }
 0x15b   : > { %2713 = vmatprep.mubr.f32.mxu1 %v621_v28  ;;  %4348 = vmatpush1.bf16.msra.mxu0 %v4347_v29  ;;  %v1168_v28 = vld [vmem:[#allocation6 + $0xbf0] sm:$0xff]  ;;  %v1171_v29 = vld [vmem:[#allocation6 + $0xc08] sm:$0xff]  ;;  %v4373_v19 = vpack.c.bf16 %v1183_v12, %v1179_v11  ;;  %v1210_v12 = vld [vmem:[#allocation6 + $0xd40] sm:$0xff] }
 0x15c   : > { %4604 = vmatpush1.bf16.msra.mxu1 %v4603_v30  ;;  %4350 = vmatprep.subr.bf16.mxu0 %v4349_v31  ;;  %v1175_v30 = vld [vmem:[#allocation6 + $0xc28] sm:$0xff]  ;;  %v652_v31 = vld [vmem:[%s5558_s28 + $0x3d0] sm:$0xff]  ;;  %v4623_v36 = vpack.c.bf16 %v1168_v28, %v1164_v26  ;;  %v1189_v28 = vld [vmem:[#allocation6 + $0xc98] sm:$0xff] }
 0x15d   : > { %1686 = vmatmul.mubr.f32.gmra.mrb[22].mxu0 %v620_v39  ;;  %4606 = vmatprep.subr.bf16.mxu1 %v4605_v35  ;;  %v4367_v35 = vpack.c.bf16 %v1166_v25, %v1162_v24  ;;  %v4369_v37 = vpack.c.bf16 %v1175_v30, %v1171_v29  ;;  %v1184_v24 = vld [vmem:[#allocation6 + $0xc70] sm:$0xff]  ;;  %v1187_v25 = vld [vmem:[#allocation6 + $0xc88] sm:$0xff]  ;;  %v1193_v29 = vld [vmem:[#allocation6 + $0xcb8] sm:$0xff] }
 0x15e   : > { %2714 = vmatmul.mubr.f32.gmra.mrb[22].mxu1 %v620_v39  ;;  %1691 = vmatprep.mubr.f32.mxu0 %v629_v42  ;;  %v660_v39 = vld [vmem:[%s5558_s28 + $0x410] sm:$0xff]  ;;  %v1191_v26 = vld [vmem:[#allocation6 + $0xca8] sm:$0xff] }
 0x15f   : > { %2719 = vmatprep.mubr.f32.mxu1 %v629_v42  ;;  %4352 = vmatpush1.bf16.msra.mxu0 %v4351_v43  ;;  %v677_v42 = vld [vmem:[%s5558_s28 + $0x498] sm:$0xff]  ;;  %v676_v43 = vld [vmem:[%s5558_s28 + $0x490] sm:$0xff]  ;;  %v551_v30 = vld [vmem:[%s5558_s28 + $0xa8] sm:$0xff]  ;;  %v4377_v33 = vpack.c.bf16 %v1191_v26, %v1187_v25 }
 0x160   : > { %4608 = vmatpush1.bf16.msra.mxu1 %v4607_v44  ;;  %4354 = vmatprep.subr.bf16.mxu0 %v4353_v45  ;;  %v685_v44 = vld [vmem:[%s5558_s28 + $0x4d8] sm:$0xff]  ;;  %v684_v45 = vld [vmem:[%s5558_s28 + $0x4d0] sm:$0xff]  ;;  %v1218_v26 = vld [vmem:[#allocation6 + $0xd80] sm:$0xff] }
 0x161   : > { %1692 = vmatmul.mubr.f32.gmra.mrb[24].mxu0 %v628_v53  ;;  %4610 = vmatprep.subr.bf16.mxu1 %v4609_v49  ;;  %v700_v49 = vld [vmem:[%s5558_s28 + $0x550] sm:$0xff] }
 0x162   : > { %2720 = vmatmul.mubr.f32.gmra.mrb[24].mxu1 %v628_v53  ;;  %1697 = vmatprep.mubr.f32.mxu0 %v637_v56  ;;  %v716_v53 = vld [vmem:[%s5558_s28 + $0x5d0] sm:$0xff] }
 0x163   : > { %2725 = vmatprep.mubr.f32.mxu1 %v637_v56  ;;  %4356 = vmatpush1.bf16.msra.mxu0 %v4355_v57  ;;  %v733_v56 = vld [vmem:[%s5558_s28 + $0x658] sm:$0xff]  ;;  %v732_v57 = vld [vmem:[%s5558_s28 + $0x650] sm:$0xff] }
 0x164   : > { %4612 = vmatpush1.bf16.msra.mxu1 %v4611_v58  ;;  %4358 = vmatprep.subr.bf16.mxu0 %v4357_v59  ;;  %v741_v58 = vld [vmem:[%s5558_s28 + $0x698] sm:$0xff]  ;;  %v740_v59 = vld [vmem:[%s5558_s28 + $0x690] sm:$0xff] }
 0x165   : > { %1698 = vmatmul.mubr.f32.gmra.mrb[26].mxu0 %v636_v3  ;;  %4614 = vmatprep.subr.bf16.mxu1 %v4613_v63  ;;  %v756_v63 = vld [vmem:[%s5558_s28 + $0x710] sm:$0xff] }
 0x166   : > { %2726 = vmatmul.mubr.f32.gmra.mrb[26].mxu1 %v636_v3  ;;  %1703 = vmatprep.mubr.f32.mxu0 %v645_v6  ;;  %v772_v3 = vld [vmem:[%s5558_s28 + $0x790] sm:$0xff] }
 0x167   : > { %2731 = vmatprep.mubr.f32.mxu1 %v645_v6  ;;  %4360 = vmatpush1.bf16.msra.mxu0 %v4359_v7  ;;  %v535_v6 = vld [vmem:[%s5558_s28 + $0x28] sm:$0xff]  ;;  %v1170_v7 = vld [vmem:[#allocation6 + $0xc00] sm:$0xff] }
 0x168   : > { %4616 = vmatpush1.bf16.msra.mxu1 %v4615_v8  ;;  %4362 = vmatprep.subr.bf16.mxu0 %v4361_v9  ;;  %v1174_v8 = vld [vmem:[#allocation6 + $0xc20] sm:$0xff]  ;;  %v1172_v9 = vld [vmem:[#allocation6 + $0xc10] sm:$0xff] }
 0x169   : > { %1704 = vmatmul.mubr.f32.gmra.mrb[28].mxu0 %v644_v17  ;;  %4618 = vmatprep.subr.bf16.mxu1 %v4617_v13  ;;  %v534_v13 = vld [vmem:[%s5558_s28 + $0x20] sm:$0xff]  ;;  %v4371_v14 = vpack.c.bf16 %v1174_v8, %v1170_v7  ;;  %v1217_v7 = vld [vmem:[#allocation6 + $0xd78] sm:$0xff]  ;;  %v575_v8 = vld [vmem:[%s5558_s28 + $0x168] sm:$0xff] }
 0x16a   : > { %2732 = vmatmul.mubr.f32.gmra.mrb[28].mxu1 %v644_v17  ;;  %1709 = vmatprep.mubr.f32.mxu0 %v653_v20  ;;  %v4627_v17 = vpack.c.bf16 %v1176_v10, %v1172_v9 }
 0x16b   : > { %2737 = vmatprep.mubr.f32.mxu1 %v653_v20  ;;  %4364 = vmatpush1.bf16.msra.mxu0 %v4363_v21  ;;  %v1178_v20 = vld [vmem:[#allocation6 + $0xc40] sm:$0xff] }
 0x16c   : > { %4620 = vmatpush1.bf16.msra.mxu1 %v4619_v22  ;;  %4366 = vmatprep.subr.bf16.mxu0 %v4365_v23  ;;  %v1182_v21 = vld [vmem:[#allocation6 + $0xc60] sm:$0xff]  ;;  %v1180_v22 = vld [vmem:[#allocation6 + $0xc50] sm:$0xff]  ;;  %v4629_v23 = vpack.c.bf16 %v1185_v16, %v1181_v15 }
 0x16d   : > { %1710 = vmatmul.mubr.f32.gmra.mrb[30].mxu0 %v652_v31  ;;  %4622 = vmatprep.subr.bf16.mxu1 %v4621_v27  ;;  %v542_v27 = vld [vmem:[%s5558_s28 + $0x60] sm:$0xff]  ;;  %v4631_v32 = vpack.c.bf16 %v1184_v24, %v1180_v22  ;;  %v1216_v16 = vld [vmem:[#allocation6 + $0xd70] sm:$0xff]  ;;  %v583_v22 = vld [vmem:[%s5558_s28 + $0x1a8] sm:$0xff] }
 0x16e   : > { %2738 = vmatmul.mubr.f32.gmra.mrb[30].mxu1 %v652_v31  ;;  %1715 = vmatprep.mubr.f32.mxu0 %v661_v34  ;;  %v4375_v31 = vpack.c.bf16 %v1182_v21, %v1178_v20  ;;  %v1221_v20 = vld [vmem:[#allocation6 + $0xd98] sm:$0xff] }
 0x16f   : > { %2743 = vmatprep.mubr.f32.mxu1 %v661_v34  ;;  %4368 = vmatpush1.bf16.msra.mxu0 %v4367_v35  ;;  %v1186_v34 = vld [vmem:[#allocation6 + $0xc80] sm:$0xff]  ;;  %v1225_v21 = vld [vmem:[#allocation6 + $0xdb8] sm:$0xff] }
 0x170   : > { %4624 = vmatpush1.bf16.msra.mxu1 %v4623_v36  ;;  %4370 = vmatprep.subr.bf16.mxu0 %v4369_v37  ;;  %v1190_v35 = vld [vmem:[#allocation6 + $0xca0] sm:$0xff]  ;;  %v1188_v36 = vld [vmem:[#allocation6 + $0xc90] sm:$0xff]  ;;  %v4633_v37 = vpack.c.bf16 %v1193_v29, %v1189_v28  ;;  %v4649_v29 = vpack.c.bf16 %v1225_v21, %v1221_v20 }
 0x171   : > { %1716 = vmatmul.mubr.f32.gmra.mrb[32].mxu0 %v660_v39  ;;  %4626 = vmatprep.subr.bf16.mxu1 %v4625_v38  ;;  %v1192_v38 = vld [vmem:[#allocation6 + $0xcb0] sm:$0xff] }
 0x172   : > { %2744 = vmatmul.mubr.f32.gmra.mrb[32].mxu1 %v660_v39  ;;  %1721 = vmatprep.mubr.f32.mxu0 %v669_v40  ;;  %v1195_v39 = vld [vmem:[#allocation6 + $0xcc8] sm:$0xff]  ;;  %v1220_v28 = vld [vmem:[#allocation6 + $0xd90] sm:$0xff] }
 0x173   : > { %2749 = vmatprep.mubr.f32.mxu1 %v669_v40  ;;  %v1199_v40 = vld [vmem:[#allocation6 + $0xce8] sm:$0xff]  ;;  %v1252_v20 = vld [vmem:[#allocation6 + $0xe90] sm:$0xff] }
 0x175   : > { %1722 = vmatmul.mubr.f32.gmra.mrb[34].mxu0 %v668_v41 }
 0x176   : > { %2750 = vmatmul.mubr.f32.gmra.mrb[34].mxu1 %v668_v41  ;;  %1727 = vmatprep.mubr.f32.mxu0 %v677_v42  ;;  %v550_v41 = vld [vmem:[%s5558_s28 + $0xa0] sm:$0xff] }
 0x177   : > { %2755 = vmatprep.mubr.f32.mxu1 %v677_v42  ;;  %v1197_v42 = vld [vmem:[#allocation6 + $0xcd8] sm:$0xff] }
 0x179   : > { %1728 = vmatmul.mubr.f32.gmra.mrb[36].mxu0 %v676_v43 }
 0x17a   : > { %2756 = vmatmul.mubr.f32.gmra.mrb[36].mxu1 %v676_v43  ;;  %1733 = vmatprep.mubr.f32.mxu0 %v685_v44  ;;  %v1201_v43 = vld [vmem:[#allocation6 + $0xcf8] sm:$0xff] }
 0x17b   : > { %2761 = vmatprep.mubr.f32.mxu1 %v685_v44  ;;  %v559_v44 = vld [vmem:[%s5558_s28 + $0xe8] sm:$0xff] }
 0x17d   : > { %1734 = vmatmul.mubr.f32.gmra.mrb[38].mxu0 %v684_v45 }
 0x17e   : > { %2762 = vmatmul.mubr.f32.gmra.mrb[38].mxu1 %v684_v45  ;;  %1739 = vmatprep.mubr.f32.mxu0 %v693_v46  ;;  %v4379_v45 = vpack.c.bf16 %v1190_v35, %v1186_v34  ;;  %v1229_v34 = vld [vmem:[#allocation6 + $0xdd8] sm:$0xff] }
 0x17f   : > { %2767 = vmatprep.mubr.f32.mxu1 %v693_v46  ;;  %v4635_v46 = vpack.c.bf16 %v1192_v38, %v1188_v36  ;;  %v1233_v35 = vld [vmem:[#allocation6 + $0xdf8] sm:$0xff]  ;;  %v591_v36 = vld [vmem:[%s5558_s28 + $0x1e8] sm:$0xff] }
 0x181   : > { %1740 = vmatmul.mubr.f32.gmra.mrb[40].mxu0 %v692_v47 }
 0x182   : > { %2768 = vmatmul.mubr.f32.gmra.mrb[40].mxu1 %v692_v47  ;;  %1745 = vmatprep.mubr.f32.mxu0 %v701_v48  ;;  %v4381_v47 = vpack.c.bf16 %v1199_v40, %v1195_v39  ;;  %v1226_v40 = vld [vmem:[#allocation6 + $0xdc0] sm:$0xff] }
 0x183   : > { %2773 = vmatprep.mubr.f32.mxu1 %v701_v48  ;;  %v1194_v48 = vld [vmem:[#allocation6 + $0xcc0] sm:$0xff] }
 0x185   : > { %1746 = vmatmul.mubr.f32.gmra.mrb[42].mxu0 %v700_v49 }
 0x186   : > { %2774 = vmatmul.mubr.f32.gmra.mrb[42].mxu1 %v700_v49  ;;  %1751 = vmatprep.mubr.f32.mxu0 %v709_v50  ;;  %v1198_v49 = vld [vmem:[#allocation6 + $0xce0] sm:$0xff] }
 0x187   : > { %2779 = vmatprep.mubr.f32.mxu1 %v709_v50  ;;  %v1196_v50 = vld [vmem:[#allocation6 + $0xcd0] sm:$0xff] }
 0x189   : > { %1752 = vmatmul.mubr.f32.gmra.mrb[44].mxu0 %v708_v51 }
 0x18a   : > { %2780 = vmatmul.mubr.f32.gmra.mrb[44].mxu1 %v708_v51  ;;  %1757 = vmatprep.mubr.f32.mxu0 %v717_v52  ;;  %v4637_v51 = vpack.c.bf16 %v1201_v43, %v1197_v42  ;;  %v1228_v42 = vld [vmem:[#allocation6 + $0xdd0] sm:$0xff]  ;;  %v4653_v43 = vpack.c.bf16 %v1233_v35, %v1229_v34 }
 0x18b   : > { %2785 = vmatprep.mubr.f32.mxu1 %v717_v52  ;;  %v1200_v52 = vld [vmem:[#allocation6 + $0xcf0] sm:$0xff] }
 0x18c   : > { %v1260_v34 = vld [vmem:[#allocation6 + $0xed0] sm:$0xff] }
 0x18d   : > { %1758 = vmatmul.mubr.f32.gmra.mrb[46].mxu0 %v716_v53 }
 0x18e   : > { %2786 = vmatmul.mubr.f32.gmra.mrb[46].mxu1 %v716_v53  ;;  %1763 = vmatprep.mubr.f32.mxu0 %v725_v54  ;;  %v1203_v53 = vld [vmem:[#allocation6 + $0xd08] sm:$0xff] }
 0x18f   : > { %2791 = vmatprep.mubr.f32.mxu1 %v725_v54  ;;  %v1207_v54 = vld [vmem:[#allocation6 + $0xd28] sm:$0xff] }
 0x191   : > { %1764 = vmatmul.mubr.f32.gmra.mrb[48].mxu0 %v724_v55 }
 0x192   : > { %2792 = vmatmul.mubr.f32.gmra.mrb[48].mxu1 %v724_v55  ;;  %1769 = vmatprep.mubr.f32.mxu0 %v733_v56  ;;  %v558_v55 = vld [vmem:[%s5558_s28 + $0xe0] sm:$0xff] }
 0x193   : > { %2797 = vmatprep.mubr.f32.mxu1 %v733_v56  ;;  %v1205_v56 = vld [vmem:[#allocation6 + $0xd18] sm:$0xff] }
 0x195   : > { %1770 = vmatmul.mubr.f32.gmra.mrb[50].mxu0 %v732_v57 }
 0x196   : > { %2798 = vmatmul.mubr.f32.gmra.mrb[50].mxu1 %v732_v57  ;;  %1775 = vmatprep.mubr.f32.mxu0 %v741_v58  ;;  %v1209_v57 = vld [vmem:[#allocation6 + $0xd38] sm:$0xff] }
 0x197   : > { %2803 = vmatprep.mubr.f32.mxu1 %v741_v58  ;;  %v567_v58 = vld [vmem:[%s5558_s28 + $0x128] sm:$0xff] }
 0x199   : > { %1776 = vmatmul.mubr.f32.gmra.mrb[52].mxu0 %v740_v59 }
 0x19a   : > { %2804 = vmatmul.mubr.f32.gmra.mrb[52].mxu1 %v740_v59  ;;  %1781 = vmatprep.mubr.f32.mxu0 %v749_v60  ;;  %v4383_v59 = vpack.c.bf16 %v1198_v49, %v1194_v48  ;;  %v1237_v48 = vld [vmem:[#allocation6 + $0xe18] sm:$0xff] }
 0x19b   : > { %2809 = vmatprep.mubr.f32.mxu1 %v749_v60  ;;  %v4639_v60 = vpack.c.bf16 %v1200_v52, %v1196_v50  ;;  %v1241_v49 = vld [vmem:[#allocation6 + $0xe38] sm:$0xff]  ;;  %v599_v50 = vld [vmem:[%s5558_s28 + $0x228] sm:$0xff] }
 0x19d   : > { %1782 = vmatmul.mubr.f32.gmra.mrb[54].mxu0 %v748_v61 }
 0x19e   : > { %2810 = vmatmul.mubr.f32.gmra.mrb[54].mxu1 %v748_v61  ;;  %1787 = vmatprep.mubr.f32.mxu0 %v757_v62  ;;  %v4385_v61 = vpack.c.bf16 %v1207_v54, %v1203_v53  ;;  %v1234_v54 = vld [vmem:[#allocation6 + $0xe00] sm:$0xff] }
 0x19f   : > { %2815 = vmatprep.mubr.f32.mxu1 %v757_v62  ;;  %v1202_v62 = vld [vmem:[#allocation6 + $0xd00] sm:$0xff] }
 0x1a1   : > { %1788 = vmatmul.mubr.f32.gmra.mrb[56].mxu0 %v756_v63 }
 0x1a2   : > { %2816 = vmatmul.mubr.f32.gmra.mrb[56].mxu1 %v756_v63  ;;  %1793 = vmatprep.mubr.f32.mxu0 %v765_v0  ;;  %v1206_v63 = vld [vmem:[#allocation6 + $0xd20] sm:$0xff] }
 0x1a3   : > { %2821 = vmatprep.mubr.f32.mxu1 %v765_v0  ;;  %v1204_v0 = vld [vmem:[#allocation6 + $0xd10] sm:$0xff]  ;;  %v4387_v9 = vpack.c.bf16 %v1206_v63, %v1202_v62  ;;  %v1245_v62 = vld [vmem:[#allocation6 + $0xe58] sm:$0xff] }
 0x1a4   : > { %v1249_v63 = vld [vmem:[#allocation6 + $0xe78] sm:$0xff] }
 0x1a5   : > { %1794 = vmatmul.mubr.f32.gmra.mrb[58].mxu0 %v764_v1 }
 0x1a6   : > { %2822 = vmatmul.mubr.f32.gmra.mrb[58].mxu1 %v764_v1  ;;  %1799 = vmatprep.mubr.f32.mxu0 %v773_v2  ;;  %v4641_v1 = vpack.c.bf16 %v1209_v57, %v1205_v56  ;;  %v1236_v56 = vld [vmem:[#allocation6 + $0xe10] sm:$0xff]  ;;  %v4657_v57 = vpack.c.bf16 %v1241_v49, %v1237_v48 }
 0x1a7   : > { %2827 = vmatprep.mubr.f32.mxu1 %v773_v2  ;;  %v1208_v2 = vld [vmem:[#allocation6 + $0xd30] sm:$0xff] }
 0x1a8   : > { %v4643_v10 = vpack.c.bf16 %v1208_v2, %v1204_v0  ;;  %v607_v0 = vld [vmem:[%s5558_s28 + $0x268] sm:$0xff]  ;;  %v1268_v48 = vld [vmem:[#allocation6 + $0xf10] sm:$0xff] }
 0x1a9   : > { %1800 = vmatmul.mubr.f32.gmra.mrb[60].mxu0 %v772_v3 }
 0x1aa   : > { %2828 = vmatmul.mubr.f32.gmra.mrb[60].mxu1 %v772_v3  ;;  %1805 = vmatprep.mubr.f32.mxu0 %v781_v4  ;;  %v1211_v3 = vld [vmem:[#allocation6 + $0xd48] sm:$0xff] }
 0x1ab   : > { %2833 = vmatprep.mubr.f32.mxu1 %v781_v4  ;;  %v1215_v4 = vld [vmem:[#allocation6 + $0xd68] sm:$0xff] }
 0x1ac   : > { %v4389_v11 = vpack.c.bf16 %v1215_v4, %v1211_v3  ;;  %v1242_v4 = vld [vmem:[#allocation6 + $0xe40] sm:$0xff] }
 0x1ad   : > { %1806 = vmatmul.mubr.f32.gmra.mrb[62].mxu0 %v780_v5 }
 0x1ae   : > { %2834 = vmatmul.mubr.f32.gmra.mrb[62].mxu1 %v780_v5  ;;  %1876 = vmatprep.mubr.f32.mxu0 %v535_v6  ;;  %v566_v5 = vld [vmem:[%s5558_s28 + $0x120] sm:$0xff] }
 0x1af   : > { %2904 = vmatprep.mubr.f32.mxu1 %v535_v6  ;;  %v1213_v6 = vld [vmem:[#allocation6 + $0xd58] sm:$0xff] }
 0x1b0   : > { %v4645_v15 = vpack.c.bf16 %v1217_v7, %v1213_v6  ;;  %v1244_v6 = vld [vmem:[#allocation6 + $0xe50] sm:$0xff]  ;;  %v4661_v7 = vpack.c.bf16 %v1249_v63, %v1245_v62 }
 0x1b1   : > { %1877 = vmatmul.mubr.f32.vlgmr.msra.gmra.mrb[0].mxu0 %v534_v13  ;;  %v1276_v62 = vld [vmem:[#allocation6 + $0xf50] sm:$0xff] }
 0x1b2   : > { %2905 = vmatmul.mubr.f32.vlgmr.msra.gmra.mrb[0].mxu1 %v534_v13  ;;  %4372 = vmatpush1.bf16.msra.mxu0 %v4371_v14  ;;  %v1214_v13 = vld [vmem:[#allocation6 + $0xd60] sm:$0xff]  ;;  %v1212_v14 = vld [vmem:[#allocation6 + $0xd50] sm:$0xff] }
 0x1b3   : > { %4628 = vmatpush1.bf16.msra.mxu1 %v4627_v17  ;;  %1882 = vmatprep.mubr.f32.mxu0 %v543_v18  ;;  %v1219_v17 = vld [vmem:[#allocation6 + $0xd88] sm:$0xff]  ;;  %v4647_v24 = vpack.c.bf16 %v1216_v16, %v1212_v14 }
 0x1b4   : > { %2910 = vmatprep.mubr.f32.mxu1 %v543_v18  ;;  %4374 = vmatprep.subr.bf16.mxu0 %v4373_v19  ;;  %v1223_v18 = vld [vmem:[#allocation6 + $0xda8] sm:$0xff]  ;;  %v574_v19 = vld [vmem:[%s5558_s28 + $0x160] sm:$0xff] }
 0x1b5   : > { %1883 = vmatmul.mubr.f32.gmra.mrb[2].mxu0 %v542_v27  ;;  %4630 = vmatprep.subr.bf16.mxu1 %v4629_v23  ;;  %v4391_v23 = vpack.c.bf16 %v1214_v13, %v1210_v12  ;;  %v4393_v25 = vpack.c.bf16 %v1223_v18, %v1219_v17  ;;  %v1253_v12 = vld [vmem:[#allocation6 + $0xe98] sm:$0xff]  ;;  %v615_v14 = vld [vmem:[%s5558_s28 + $0x2a8] sm:$0xff]  ;;  %v1250_v18 = vld [vmem:[#allocation6 + $0xe80] sm:$0xff] }
 0x1b6   : > { %2911 = vmatmul.mubr.f32.gmra.mrb[2].mxu1 %v542_v27  ;;  %1888 = vmatprep.mubr.f32.mxu0 %v551_v30  ;;  %v1222_v27 = vld [vmem:[#allocation6 + $0xda0] sm:$0xff]  ;;  %v1257_v13 = vld [vmem:[#allocation6 + $0xeb8] sm:$0xff] }
 0x1b7   : > { %2916 = vmatprep.mubr.f32.mxu1 %v551_v30  ;;  %4376 = vmatpush1.bf16.msra.mxu0 %v4375_v31  ;;  %v1224_v30 = vld [vmem:[#allocation6 + $0xdb0] sm:$0xff]  ;;  %v1227_v31 = vld [vmem:[#allocation6 + $0xdc8] sm:$0xff]  ;;  %v4665_v21 = vpack.c.bf16 %v1257_v13, %v1253_v12 }
 0x1b8   : > { %4632 = vmatpush1.bf16.msra.mxu1 %v4631_v32  ;;  %4378 = vmatprep.subr.bf16.mxu0 %v4377_v33  ;;  %v1231_v32 = vld [vmem:[#allocation6 + $0xde8] sm:$0xff]  ;;  %v582_v33 = vld [vmem:[%s5558_s28 + $0x1a0] sm:$0xff]  ;;  %v4651_v38 = vpack.c.bf16 %v1224_v30, %v1220_v28  ;;  %v1284_v12 = vld [vmem:[#allocation6 + $0xf90] sm:$0xff] }
 0x1b9   : > { %1889 = vmatmul.mubr.f32.gmra.mrb[4].mxu0 %v550_v41  ;;  %4634 = vmatprep.subr.bf16.mxu1 %v4633_v37  ;;  %v4395_v37 = vpack.c.bf16 %v1222_v27, %v1218_v26  ;;  %v4397_v39 = vpack.c.bf16 %v1231_v32, %v1227_v31  ;;  %v1261_v26 = vld [vmem:[#allocation6 + $0xed8] sm:$0xff]  ;;  %v623_v28 = vld [vmem:[%s5558_s28 + $0x2e8] sm:$0xff]  ;;  %v1258_v32 = vld [vmem:[#allocation6 + $0xec0] sm:$0xff] }
 0x1ba   : > { %2917 = vmatmul.mubr.f32.gmra.mrb[4].mxu1 %v550_v41  ;;  %1894 = vmatprep.mubr.f32.mxu0 %v559_v44  ;;  %v1230_v41 = vld [vmem:[#allocation6 + $0xde0] sm:$0xff]  ;;  %v1265_v27 = vld [vmem:[#allocation6 + $0xef8] sm:$0xff] }
 0x1bb   : > { %2922 = vmatprep.mubr.f32.mxu1 %v559_v44  ;;  %4380 = vmatpush1.bf16.msra.mxu0 %v4379_v45  ;;  %v1232_v44 = vld [vmem:[#allocation6 + $0xdf0] sm:$0xff]  ;;  %v1235_v45 = vld [vmem:[#allocation6 + $0xe08] sm:$0xff]  ;;  %v4669_v35 = vpack.c.bf16 %v1265_v27, %v1261_v26 }
 0x1bc   : > { %4636 = vmatpush1.bf16.msra.mxu1 %v4635_v46  ;;  %4382 = vmatprep.subr.bf16.mxu0 %v4381_v47  ;;  %v1239_v46 = vld [vmem:[#allocation6 + $0xe28] sm:$0xff]  ;;  %v590_v47 = vld [vmem:[%s5558_s28 + $0x1e0] sm:$0xff]  ;;  %v4655_v52 = vpack.c.bf16 %v1232_v44, %v1228_v42  ;;  %v1292_v27 = vld [vmem:[#allocation6 + $0xfd0] sm:$0xff] }
 0x1bd   : > { %1895 = vmatmul.mubr.f32.gmra.mrb[6].mxu0 %v558_v55  ;;  %4638 = vmatprep.subr.bf16.mxu1 %v4637_v51  ;;  %v4399_v51 = vpack.c.bf16 %v1230_v41, %v1226_v40  ;;  %v4401_v53 = vpack.c.bf16 %v1239_v46, %v1235_v45  ;;  %v1269_v40 = vld [vmem:[#allocation6 + $0xf18] sm:$0xff]  ;;  %v631_v42 = vld [vmem:[%s5558_s28 + $0x328] sm:$0xff]  ;;  %v1266_v46 = vld [vmem:[#allocation6 + $0xf00] sm:$0xff] }
 0x1be   : > { %2923 = vmatmul.mubr.f32.gmra.mrb[6].mxu1 %v558_v55  ;;  %1900 = vmatprep.mubr.f32.mxu0 %v567_v58  ;;  %v1238_v55 = vld [vmem:[#allocation6 + $0xe20] sm:$0xff]  ;;  %v1273_v41 = vld [vmem:[#allocation6 + $0xf38] sm:$0xff] }
 0x1bf   : > { %2928 = vmatprep.mubr.f32.mxu1 %v567_v58  ;;  %4384 = vmatpush1.bf16.msra.mxu0 %v4383_v59  ;;  %v1240_v58 = vld [vmem:[#allocation6 + $0xe30] sm:$0xff]  ;;  %v1243_v59 = vld [vmem:[#allocation6 + $0xe48] sm:$0xff]  ;;  %v4673_v49 = vpack.c.bf16 %v1273_v41, %v1269_v40  ;;  %v694_v41 = vld [vmem:[%s5558_s28 + $0x520] sm:$0xff] }
 0x1c0   : > { %4640 = vmatpush1.bf16.msra.mxu1 %v4639_v60  ;;  %4386 = vmatprep.subr.bf16.mxu0 %v4385_v61  ;;  %v1247_v60 = vld [vmem:[#allocation6 + $0xe68] sm:$0xff]  ;;  %v598_v61 = vld [vmem:[%s5558_s28 + $0x220] sm:$0xff]  ;;  %v4659_v2 = vpack.c.bf16 %v1240_v58, %v1236_v56 }
 0x1c1   : > { %1901 = vmatmul.mubr.f32.gmra.mrb[8].mxu0 %v566_v5  ;;  %4642 = vmatprep.subr.bf16.mxu1 %v4641_v1  ;;  %v4403_v1 = vpack.c.bf16 %v1238_v55, %v1234_v54  ;;  %v4405_v3 = vpack.c.bf16 %v1247_v60, %v1243_v59  ;;  %v1277_v54 = vld [vmem:[#allocation6 + $0xf58] sm:$0xff]  ;;  %v639_v56 = vld [vmem:[%s5558_s28 + $0x368] sm:$0xff]  ;;  %v1274_v60 = vld [vmem:[#allocation6 + $0xf40] sm:$0xff] }
 0x1c2   : > { %2929 = vmatmul.mubr.f32.gmra.mrb[8].mxu1 %v566_v5  ;;  %1906 = vmatprep.mubr.f32.mxu0 %v575_v8  ;;  %v1246_v5 = vld [vmem:[#allocation6 + $0xe60] sm:$0xff]  ;;  %v1281_v55 = vld [vmem:[#allocation6 + $0xf78] sm:$0xff]  ;;  %v695_v40 = vld [vmem:[%s5558_s28 + $0x528] sm:$0xff] }
 0x1c3   : > { %2934 = vmatprep.mubr.f32.mxu1 %v575_v8  ;;  %4388 = vmatpush1.bf16.msra.mxu0 %v4387_v9  ;;  %v1248_v8 = vld [vmem:[#allocation6 + $0xe70] sm:$0xff]  ;;  %v1251_v9 = vld [vmem:[#allocation6 + $0xe88] sm:$0xff]  ;;  %v4677_v63 = vpack.c.bf16 %v1281_v55, %v1277_v54  ;;  %v750_v55 = vld [vmem:[%s5558_s28 + $0x6e0] sm:$0xff] }
 0x1c4   : > { %4644 = vmatpush1.bf16.msra.mxu1 %v4643_v10  ;;  %4390 = vmatprep.subr.bf16.mxu0 %v4389_v11  ;;  %v1255_v10 = vld [vmem:[#allocation6 + $0xea8] sm:$0xff]  ;;  %v606_v11 = vld [vmem:[%s5558_s28 + $0x260] sm:$0xff]  ;;  %v4663_v16 = vpack.c.bf16 %v1248_v8, %v1244_v6 }
 0x1c5   : > { %1907 = vmatmul.mubr.f32.gmra.mrb[10].mxu0 %v574_v19  ;;  %4646 = vmatprep.subr.bf16.mxu1 %v4645_v15  ;;  %v4407_v15 = vpack.c.bf16 %v1246_v5, %v1242_v4  ;;  %v4409_v17 = vpack.c.bf16 %v1255_v10, %v1251_v9  ;;  %v1285_v4 = vld [vmem:[#allocation6 + $0xf98] sm:$0xff]  ;;  %v647_v6 = vld [vmem:[%s5558_s28 + $0x3a8] sm:$0xff]  ;;  %v1282_v10 = vld [vmem:[#allocation6 + $0xf80] sm:$0xff] }
 0x1c6   : > { %2935 = vmatmul.mubr.f32.gmra.mrb[10].mxu1 %v574_v19  ;;  %1912 = vmatprep.mubr.f32.mxu0 %v583_v22  ;;  %v1254_v19 = vld [vmem:[#allocation6 + $0xea0] sm:$0xff]  ;;  %v1289_v5 = vld [vmem:[#allocation6 + $0xfb8] sm:$0xff]  ;;  %v751_v54 = vld [vmem:[%s5558_s28 + $0x6e8] sm:$0xff] }
 0x1c7   : > { %2940 = vmatprep.mubr.f32.mxu1 %v583_v22  ;;  %4392 = vmatpush1.bf16.msra.mxu0 %v4391_v23  ;;  %v1256_v22 = vld [vmem:[#allocation6 + $0xeb0] sm:$0xff]  ;;  %v1259_v23 = vld [vmem:[#allocation6 + $0xec8] sm:$0xff]  ;;  %v4681_v13 = vpack.c.bf16 %v1289_v5, %v1285_v4  ;;  %v553_v4 = vld [vmem:[%s5558_s28 + $0xb8] sm:$0xff] }
 0x1c8   : > { %4648 = vmatpush1.bf16.msra.mxu1 %v4647_v24  ;;  %4394 = vmatprep.subr.bf16.mxu0 %v4393_v25  ;;  %v1263_v24 = vld [vmem:[#allocation6 + $0xee8] sm:$0xff]  ;;  %v614_v25 = vld [vmem:[%s5558_s28 + $0x2a0] sm:$0xff]  ;;  %v4667_v30 = vpack.c.bf16 %v1256_v22, %v1252_v20  ;;  %v552_v5 = vld [vmem:[%s5558_s28 + $0xb0] sm:$0xff] }
 0x1c9   : > { %1913 = vmatmul.mubr.f32.gmra.mrb[12].mxu0 %v582_v33  ;;  %4650 = vmatprep.subr.bf16.mxu1 %v4649_v29  ;;  %v4411_v29 = vpack.c.bf16 %v1254_v19, %v1250_v18  ;;  %v4413_v31 = vpack.c.bf16 %v1263_v24, %v1259_v23  ;;  %v1293_v18 = vld [vmem:[#allocation6 + $0xfd8] sm:$0xff]  ;;  %v655_v20 = vld [vmem:[%s5558_s28 + $0x3e8] sm:$0xff]  ;;  %v1290_v24 = vld [vmem:[#allocation6 + $0xfc0] sm:$0xff] }
 0x1ca   : > { %2941 = vmatmul.mubr.f32.gmra.mrb[12].mxu1 %v582_v33  ;;  %1918 = vmatprep.mubr.f32.mxu0 %v591_v36  ;;  %v1262_v33 = vld [vmem:[#allocation6 + $0xee0] sm:$0xff]  ;;  %v1297_v19 = vld [vmem:[#allocation6 + $0xff8] sm:$0xff] }
 0x1cb   : > { %2946 = vmatprep.mubr.f32.mxu1 %v591_v36  ;;  %4396 = vmatpush1.bf16.msra.mxu0 %v4395_v37  ;;  %v1264_v36 = vld [vmem:[#allocation6 + $0xef0] sm:$0xff]  ;;  %v1267_v37 = vld [vmem:[#allocation6 + $0xf08] sm:$0xff]  ;;  %v4685_v26 = vpack.c.bf16 %v1297_v19, %v1293_v18  ;;  %v609_v18 = vld [vmem:[%s5558_s28 + $0x278] sm:$0xff] }
 0x1cc   : > { %4652 = vmatpush1.bf16.msra.mxu1 %v4651_v38  ;;  %4398 = vmatprep.subr.bf16.mxu0 %v4397_v39  ;;  %v1271_v38 = vld [vmem:[#allocation6 + $0xf28] sm:$0xff]  ;;  %v622_v39 = vld [vmem:[%s5558_s28 + $0x2e0] sm:$0xff]  ;;  %v4671_v44 = vpack.c.bf16 %v1264_v36, %v1260_v34  ;;  %v608_v19 = vld [vmem:[%s5558_s28 + $0x270] sm:$0xff] }
 0x1cd   : > { %1919 = vmatmul.mubr.f32.gmra.mrb[14].mxu0 %v590_v47  ;;  %4654 = vmatprep.subr.bf16.mxu1 %v4653_v43  ;;  %v4415_v43 = vpack.c.bf16 %v1262_v33, %v1258_v32  ;;  %v4417_v45 = vpack.c.bf16 %v1271_v38, %v1267_v37  ;;  %v662_v33 = vld [vmem:[%s5558_s28 + $0x420] sm:$0xff]  ;;  %v671_v34 = vld [vmem:[%s5558_s28 + $0x468] sm:$0xff] }
 0x1ce   : > { %2947 = vmatmul.mubr.f32.gmra.mrb[14].mxu1 %v590_v47  ;;  %1924 = vmatprep.mubr.f32.mxu0 %v599_v50  ;;  %v1270_v47 = vld [vmem:[#allocation6 + $0xf20] sm:$0xff]  ;;  %v679_v36 = vld [vmem:[%s5558_s28 + $0x4a8] sm:$0xff] }
 0x1cf   : > { %2952 = vmatprep.mubr.f32.mxu1 %v599_v50  ;;  %4400 = vmatpush1.bf16.msra.mxu0 %v4399_v51  ;;  %v1272_v50 = vld [vmem:[#allocation6 + $0xf30] sm:$0xff]  ;;  %v1275_v51 = vld [vmem:[#allocation6 + $0xf48] sm:$0xff]  ;;  %v678_v37 = vld [vmem:[%s5558_s28 + $0x4a0] sm:$0xff] }
 0x1d0   : > { %4656 = vmatpush1.bf16.msra.mxu1 %v4655_v52  ;;  %4402 = vmatprep.subr.bf16.mxu0 %v4401_v53  ;;  %v1279_v52 = vld [vmem:[#allocation6 + $0xf68] sm:$0xff]  ;;  %v630_v53 = vld [vmem:[%s5558_s28 + $0x320] sm:$0xff]  ;;  %v4675_v58 = vpack.c.bf16 %v1272_v50, %v1268_v48 }
 0x1d1   : > { %1925 = vmatmul.mubr.f32.gmra.mrb[16].mxu0 %v598_v61  ;;  %4658 = vmatprep.subr.bf16.mxu1 %v4657_v57  ;;  %v4419_v57 = vpack.c.bf16 %v1270_v47, %v1266_v46  ;;  %v4421_v59 = vpack.c.bf16 %v1279_v52, %v1275_v51  ;;  %v687_v38 = vld [vmem:[%s5558_s28 + $0x4e8] sm:$0xff]  ;;  %v718_v47 = vld [vmem:[%s5558_s28 + $0x5e0] sm:$0xff] }
 0x1d2   : > { %2953 = vmatmul.mubr.f32.gmra.mrb[16].mxu1 %v598_v61  ;;  %1930 = vmatprep.mubr.f32.mxu0 %v607_v0  ;;  %v1278_v61 = vld [vmem:[#allocation6 + $0xf60] sm:$0xff]  ;;  %v719_v46 = vld [vmem:[%s5558_s28 + $0x5e8] sm:$0xff] }
 0x1d3   : > { %2958 = vmatprep.mubr.f32.mxu1 %v607_v0  ;;  %4404 = vmatpush1.bf16.msra.mxu0 %v4403_v1  ;;  %v1280_v0 = vld [vmem:[#allocation6 + $0xf70] sm:$0xff]  ;;  %v1283_v1 = vld [vmem:[#allocation6 + $0xf88] sm:$0xff]  ;;  %v734_v51 = vld [vmem:[%s5558_s28 + $0x660] sm:$0xff] }
 0x1d4   : > { %4660 = vmatpush1.bf16.msra.mxu1 %v4659_v2  ;;  %4406 = vmatprep.subr.bf16.mxu0 %v4405_v3  ;;  %v1287_v2 = vld [vmem:[#allocation6 + $0xfa8] sm:$0xff]  ;;  %v638_v3 = vld [vmem:[%s5558_s28 + $0x360] sm:$0xff]  ;;  %v4679_v8 = vpack.c.bf16 %v1280_v0, %v1276_v62  ;;  %v537_v0 = vld [vmem:[%s5558_s28 + $0x38] sm:$0xff] }
 0x1d5   : > { %1931 = vmatmul.mubr.f32.gmra.mrb[18].mxu0 %v606_v11  ;;  %4662 = vmatprep.subr.bf16.mxu1 %v4661_v7  ;;  %v4423_v7 = vpack.c.bf16 %v1278_v61, %v1274_v60  ;;  %v4425_v9 = vpack.c.bf16 %v1287_v2, %v1283_v1  ;;  %v727_v48 = vld [vmem:[%s5558_s28 + $0x628] sm:$0xff]  ;;  %v774_v61 = vld [vmem:[%s5558_s28 + $0x7a0] sm:$0xff]  ;;  %v536_v1 = vld [vmem:[%s5558_s28 + $0x30] sm:$0xff] }
 0x1d6   : > { %2959 = vmatmul.mubr.f32.gmra.mrb[18].mxu1 %v606_v11  ;;  %1936 = vmatprep.mubr.f32.mxu0 %v615_v14  ;;  %v1286_v11 = vld [vmem:[#allocation6 + $0xfa0] sm:$0xff]  ;;  %v735_v50 = vld [vmem:[%s5558_s28 + $0x668] sm:$0xff]  ;;  %v545_v2 = vld [vmem:[%s5558_s28 + $0x78] sm:$0xff] }
 0x1d7   : > { %2964 = vmatprep.mubr.f32.mxu1 %v615_v14  ;;  %4408 = vmatpush1.bf16.msra.mxu0 %v4407_v15  ;;  %v1288_v14 = vld [vmem:[#allocation6 + $0xfb0] sm:$0xff]  ;;  %v1291_v15 = vld [vmem:[#allocation6 + $0xfc8] sm:$0xff] }
 0x1d8   : > { %4664 = vmatpush1.bf16.msra.mxu1 %v4663_v16  ;;  %4410 = vmatprep.subr.bf16.mxu0 %v4409_v17  ;;  %v1295_v16 = vld [vmem:[#allocation6 + $0xfe8] sm:$0xff]  ;;  %v646_v17 = vld [vmem:[%s5558_s28 + $0x3a0] sm:$0xff]  ;;  %v4683_v22 = vpack.c.bf16 %v1288_v14, %v1284_v12  ;;  %v585_v12 = vld [vmem:[%s5558_s28 + $0x1b8] sm:$0xff] }
 0x1d9   : > { %1937 = vmatmul.mubr.f32.gmra.mrb[20].mxu0 %v614_v25  ;;  %4666 = vmatprep.subr.bf16.mxu1 %v4665_v21  ;;  %v4427_v21 = vpack.c.bf16 %v1286_v11, %v1282_v10  ;;  %v4429_v23 = vpack.c.bf16 %v1295_v16, %v1291_v15  ;;  %v743_v52 = vld [vmem:[%s5558_s28 + $0x6a8] sm:$0xff]  ;;  %v577_v10 = vld [vmem:[%s5558_s28 + $0x178] sm:$0xff]  ;;  %v576_v11 = vld [vmem:[%s5558_s28 + $0x170] sm:$0xff] }
 0x1da   : > { %2965 = vmatmul.mubr.f32.gmra.mrb[20].mxu1 %v614_v25  ;;  %1942 = vmatprep.mubr.f32.mxu0 %v623_v28  ;;  %v1294_v25 = vld [vmem:[#allocation6 + $0xfe0] sm:$0xff]  ;;  %v775_v60 = vld [vmem:[%s5558_s28 + $0x7a8] sm:$0xff]  ;;  %v593_v14 = vld [vmem:[%s5558_s28 + $0x1f8] sm:$0xff] }
 0x1db   : > { %2970 = vmatprep.mubr.f32.mxu1 %v623_v28  ;;  %4412 = vmatpush1.bf16.msra.mxu0 %v4411_v29  ;;  %v1296_v28 = vld [vmem:[#allocation6 + $0xff0] sm:$0xff]  ;;  %v654_v29 = vld [vmem:[%s5558_s28 + $0x3e0] sm:$0xff]  ;;  %v783_v62 = vld [vmem:[%s5558_s28 + $0x7e8] sm:$0xff] }
 0x1dc   : > { %4668 = vmatpush1.bf16.msra.mxu1 %v4667_v30  ;;  %4414 = vmatprep.subr.bf16.mxu0 %v4413_v31  ;;  %v663_v30 = vld [vmem:[%s5558_s28 + $0x428] sm:$0xff]  ;;  %v4431_v31 = vpack.c.bf16 %v1294_v25, %v1290_v24  ;;  %v4687_v32 = vpack.c.bf16 %v1296_v28, %v1292_v27  ;;  %v592_v15 = vld [vmem:[%s5558_s28 + $0x1f0] sm:$0xff]  ;;  %v601_v16 = vld [vmem:[%s5558_s28 + $0x238] sm:$0xff] }
 0x1dd   : > { %1943 = vmatmul.mubr.f32.gmra.mrb[22].mxu0 %v622_v39  ;;  %4670 = vmatprep.subr.bf16.mxu1 %v4669_v35  ;;  %v670_v35 = vld [vmem:[%s5558_s28 + $0x460] sm:$0xff]  ;;  %v633_v24 = vld [vmem:[%s5558_s28 + $0x338] sm:$0xff]  ;;  %v632_v25 = vld [vmem:[%s5558_s28 + $0x330] sm:$0xff] }
 0x1de   : > { %2971 = vmatmul.mubr.f32.gmra.mrb[22].mxu1 %v622_v39  ;;  %1948 = vmatprep.mubr.f32.mxu0 %v631_v42  ;;  %v686_v39 = vld [vmem:[%s5558_s28 + $0x4e0] sm:$0xff]  ;;  %v640_v27 = vld [vmem:[%s5558_s28 + $0x370] sm:$0xff]  ;;  %v649_v28 = vld [vmem:[%s5558_s28 + $0x3b8] sm:$0xff] }
 0x1df   : > { %2976 = vmatprep.mubr.f32.mxu1 %v631_v42  ;;  %4416 = vmatpush1.bf16.msra.mxu0 %v4415_v43  ;;  %v703_v42 = vld [vmem:[%s5558_s28 + $0x568] sm:$0xff]  ;;  %v702_v43 = vld [vmem:[%s5558_s28 + $0x560] sm:$0xff] }
 0x1e0   : > { %4672 = vmatpush1.bf16.msra.mxu1 %v4671_v44  ;;  %4418 = vmatprep.subr.bf16.mxu0 %v4417_v45  ;;  %v711_v44 = vld [vmem:[%s5558_s28 + $0x5a8] sm:$0xff]  ;;  %v710_v45 = vld [vmem:[%s5558_s28 + $0x5a0] sm:$0xff] }
 0x1e1   : > { %1949 = vmatmul.mubr.f32.gmra.mrb[24].mxu0 %v630_v53  ;;  %4674 = vmatprep.subr.bf16.mxu1 %v4673_v49  ;;  %v726_v49 = vld [vmem:[%s5558_s28 + $0x620] sm:$0xff] }
 0x1e2   : > { %2977 = vmatmul.mubr.f32.gmra.mrb[24].mxu1 %v630_v53  ;;  %1954 = vmatprep.mubr.f32.mxu0 %v639_v56  ;;  %v742_v53 = vld [vmem:[%s5558_s28 + $0x6a0] sm:$0xff] }
 0x1e3   : > { %2982 = vmatprep.mubr.f32.mxu1 %v639_v56  ;;  %4420 = vmatpush1.bf16.msra.mxu0 %v4419_v57  ;;  %v759_v56 = vld [vmem:[%s5558_s28 + $0x728] sm:$0xff]  ;;  %v758_v57 = vld [vmem:[%s5558_s28 + $0x720] sm:$0xff] }
 0x1e4   : > { %4676 = vmatpush1.bf16.msra.mxu1 %v4675_v58  ;;  %4422 = vmatprep.subr.bf16.mxu0 %v4421_v59  ;;  %v767_v58 = vld [vmem:[%s5558_s28 + $0x768] sm:$0xff]  ;;  %v766_v59 = vld [vmem:[%s5558_s28 + $0x760] sm:$0xff] }
 0x1e5   : > { %1955 = vmatmul.mubr.f32.gmra.mrb[26].mxu0 %v638_v3  ;;  %4678 = vmatprep.subr.bf16.mxu1 %v4677_v63  ;;  %v782_v63 = vld [vmem:[%s5558_s28 + $0x7e0] sm:$0xff] }
 0x1e6   : > { %2983 = vmatmul.mubr.f32.gmra.mrb[26].mxu1 %v638_v3  ;;  %1960 = vmatprep.mubr.f32.mxu0 %v647_v6  ;;  %v544_v3 = vld [vmem:[%s5558_s28 + $0x70] sm:$0xff] }
 0x1e7   : > { %2988 = vmatprep.mubr.f32.mxu1 %v647_v6  ;;  %4424 = vmatpush1.bf16.msra.mxu0 %v4423_v7  ;;  %v561_v6 = vld [vmem:[%s5558_s28 + $0xf8] sm:$0xff]  ;;  %v560_v7 = vld [vmem:[%s5558_s28 + $0xf0] sm:$0xff] }
 0x1e8   : > { %4680 = vmatpush1.bf16.msra.mxu1 %v4679_v8  ;;  %4426 = vmatprep.subr.bf16.mxu0 %v4425_v9  ;;  %v569_v8 = vld [vmem:[%s5558_s28 + $0x138] sm:$0xff]  ;;  %v568_v9 = vld [vmem:[%s5558_s28 + $0x130] sm:$0xff] }
 0x1e9   : > { %1961 = vmatmul.mubr.f32.gmra.mrb[28].mxu0 %v646_v17  ;;  %4682 = vmatprep.subr.bf16.mxu1 %v4681_v13  ;;  %v584_v13 = vld [vmem:[%s5558_s28 + $0x1b0] sm:$0xff] }
 0x1ea   : > { %2989 = vmatmul.mubr.f32.gmra.mrb[28].mxu1 %v646_v17  ;;  %1966 = vmatprep.mubr.f32.mxu0 %v655_v20  ;;  %v600_v17 = vld [vmem:[%s5558_s28 + $0x230] sm:$0xff] }
 0x1eb   : > { %2994 = vmatprep.mubr.f32.mxu1 %v655_v20  ;;  %4428 = vmatpush1.bf16.msra.mxu0 %v4427_v21  ;;  %v617_v20 = vld [vmem:[%s5558_s28 + $0x2b8] sm:$0xff]  ;;  %v616_v21 = vld [vmem:[%s5558_s28 + $0x2b0] sm:$0xff] }
 0x1ec   : > { %4684 = vmatpush1.bf16.msra.mxu1 %v4683_v22  ;;  %4430 = vmatprep.subr.bf16.mxu0 %v4429_v23  ;;  %v625_v22 = vld [vmem:[%s5558_s28 + $0x2f8] sm:$0xff]  ;;  %v624_v23 = vld [vmem:[%s5558_s28 + $0x2f0] sm:$0xff] }
 0x1ed   : > { %1967 = vmatmul.mubr.f32.gmra.mrb[30].mxu0 %v654_v29  ;;  %4686 = vmatprep.subr.bf16.mxu1 %v4685_v26  ;;  %v641_v26 = vld [vmem:[%s5558_s28 + $0x378] sm:$0xff] }
 0x1ee   : > { %2995 = vmatmul.mubr.f32.gmra.mrb[30].mxu1 %v654_v29  ;;  %1972 = vmatprep.mubr.f32.mxu0 %v663_v30  ;;  %v648_v29 = vld [vmem:[%s5558_s28 + $0x3b0] sm:$0xff] }
 0x1ef   : > { %3000 = vmatprep.mubr.f32.mxu1 %v663_v30  ;;  %4432 = vmatpush1.bf16.msra.mxu0 %v4431_v31  ;;  %v657_v30 = vld [vmem:[%s5558_s28 + $0x3f8] sm:$0xff]  ;;  %v656_v31 = vld [vmem:[%s5558_s28 + $0x3f0] sm:$0xff] }
 0x1f0   : > { %4688 = vmatpush1.bf16.msra.mxu1 %v4687_v32  ;;  %v665_v32 = vld [vmem:[%s5558_s28 + $0x438] sm:$0xff] }
 0x1f1   : > { %1973 = vmatmul.mubr.f32.gmra.mrb[32].mxu0 %v662_v33 }
 0x1f2   : > { %3001 = vmatmul.mubr.f32.gmra.mrb[32].mxu1 %v662_v33  ;;  %1978 = vmatprep.mubr.f32.mxu0 %v671_v34  ;;  %v664_v33 = vld [vmem:[%s5558_s28 + $0x430] sm:$0xff] }
 0x1f3   : > { %3006 = vmatprep.mubr.f32.mxu1 %v671_v34  ;;  %v673_v34 = vld [vmem:[%s5558_s28 + $0x478] sm:$0xff] }
 0x1f5   : > { %1979 = vmatmul.mubr.f32.gmra.mrb[34].mxu0 %v670_v35 }
 0x1f6   : > { %3007 = vmatmul.mubr.f32.gmra.mrb[34].mxu1 %v670_v35  ;;  %1984 = vmatprep.mubr.f32.mxu0 %v679_v36  ;;  %v672_v35 = vld [vmem:[%s5558_s28 + $0x470] sm:$0xff] }
 0x1f7   : > { %3012 = vmatprep.mubr.f32.mxu1 %v679_v36  ;;  %v681_v36 = vld [vmem:[%s5558_s28 + $0x4b8] sm:$0xff] }
 0x1f9   : > { %1985 = vmatmul.mubr.f32.gmra.mrb[36].mxu0 %v678_v37 }
 0x1fa   : > { %3013 = vmatmul.mubr.f32.gmra.mrb[36].mxu1 %v678_v37  ;;  %1990 = vmatprep.mubr.f32.mxu0 %v687_v38  ;;  %v680_v37 = vld [vmem:[%s5558_s28 + $0x4b0] sm:$0xff] }
 0x1fb   : > { %3018 = vmatprep.mubr.f32.mxu1 %v687_v38  ;;  %v689_v38 = vld [vmem:[%s5558_s28 + $0x4f8] sm:$0xff] }
 0x1fd   : > { %1991 = vmatmul.mubr.f32.gmra.mrb[38].mxu0 %v686_v39 }
 0x1fe   : > { %3019 = vmatmul.mubr.f32.gmra.mrb[38].mxu1 %v686_v39  ;;  %1996 = vmatprep.mubr.f32.mxu0 %v695_v40  ;;  %v688_v39 = vld [vmem:[%s5558_s28 + $0x4f0] sm:$0xff] }
 0x1ff   : > { %3024 = vmatprep.mubr.f32.mxu1 %v695_v40  ;;  %v697_v40 = vld [vmem:[%s5558_s28 + $0x538] sm:$0xff] }
 0x201   : > { %1997 = vmatmul.mubr.f32.gmra.mrb[40].mxu0 %v694_v41 }
 0x202   : > { %3025 = vmatmul.mubr.f32.gmra.mrb[40].mxu1 %v694_v41  ;;  %2002 = vmatprep.mubr.f32.mxu0 %v703_v42  ;;  %v696_v41 = vld [vmem:[%s5558_s28 + $0x530] sm:$0xff] }
 0x203   : > { %3030 = vmatprep.mubr.f32.mxu1 %v703_v42  ;;  %v705_v42 = vld [vmem:[%s5558_s28 + $0x578] sm:$0xff] }
 0x205   : > { %2003 = vmatmul.mubr.f32.gmra.mrb[42].mxu0 %v702_v43 }
 0x206   : > { %3031 = vmatmul.mubr.f32.gmra.mrb[42].mxu1 %v702_v43  ;;  %2008 = vmatprep.mubr.f32.mxu0 %v711_v44  ;;  %v704_v43 = vld [vmem:[%s5558_s28 + $0x570] sm:$0xff] }
 0x207   : > { %3036 = vmatprep.mubr.f32.mxu1 %v711_v44  ;;  %v713_v44 = vld [vmem:[%s5558_s28 + $0x5b8] sm:$0xff] }
 0x209   : > { %2009 = vmatmul.mubr.f32.gmra.mrb[44].mxu0 %v710_v45 }
 0x20a   : > { %3037 = vmatmul.mubr.f32.gmra.mrb[44].mxu1 %v710_v45  ;;  %2014 = vmatprep.mubr.f32.mxu0 %v719_v46  ;;  %v712_v45 = vld [vmem:[%s5558_s28 + $0x5b0] sm:$0xff] }
 0x20b   : > { %3042 = vmatprep.mubr.f32.mxu1 %v719_v46  ;;  %v721_v46 = vld [vmem:[%s5558_s28 + $0x5f8] sm:$0xff] }
 0x20d   : > { %2015 = vmatmul.mubr.f32.gmra.mrb[46].mxu0 %v718_v47 }
 0x20e   : > { %3043 = vmatmul.mubr.f32.gmra.mrb[46].mxu1 %v718_v47  ;;  %2020 = vmatprep.mubr.f32.mxu0 %v727_v48  ;;  %v720_v47 = vld [vmem:[%s5558_s28 + $0x5f0] sm:$0xff] }
 0x20f   : > { %3048 = vmatprep.mubr.f32.mxu1 %v727_v48  ;;  %v729_v48 = vld [vmem:[%s5558_s28 + $0x638] sm:$0xff] }
 0x211   : > { %2021 = vmatmul.mubr.f32.gmra.mrb[48].mxu0 %v726_v49 }
 0x212   : > { %3049 = vmatmul.mubr.f32.gmra.mrb[48].mxu1 %v726_v49  ;;  %2026 = vmatprep.mubr.f32.mxu0 %v735_v50  ;;  %v728_v49 = vld [vmem:[%s5558_s28 + $0x630] sm:$0xff] }
 0x213   : > { %3054 = vmatprep.mubr.f32.mxu1 %v735_v50  ;;  %v737_v50 = vld [vmem:[%s5558_s28 + $0x678] sm:$0xff] }
 0x215   : > { %2027 = vmatmul.mubr.f32.gmra.mrb[50].mxu0 %v734_v51 }
 0x216   : > { %3055 = vmatmul.mubr.f32.gmra.mrb[50].mxu1 %v734_v51  ;;  %2032 = vmatprep.mubr.f32.mxu0 %v743_v52  ;;  %v736_v51 = vld [vmem:[%s5558_s28 + $0x670] sm:$0xff] }
 0x217   : > { %3060 = vmatprep.mubr.f32.mxu1 %v743_v52  ;;  %v745_v52 = vld [vmem:[%s5558_s28 + $0x6b8] sm:$0xff] }
 0x219   : > { %2033 = vmatmul.mubr.f32.gmra.mrb[52].mxu0 %v742_v53 }
 0x21a   : > { %3061 = vmatmul.mubr.f32.gmra.mrb[52].mxu1 %v742_v53  ;;  %2038 = vmatprep.mubr.f32.mxu0 %v751_v54  ;;  %v744_v53 = vld [vmem:[%s5558_s28 + $0x6b0] sm:$0xff] }
 0x21b   : > { %3066 = vmatprep.mubr.f32.mxu1 %v751_v54  ;;  %v753_v54 = vld [vmem:[%s5558_s28 + $0x6f8] sm:$0xff] }
 0x21d   : > { %2039 = vmatmul.mubr.f32.gmra.mrb[54].mxu0 %v750_v55 }
 0x21e   : > { %3067 = vmatmul.mubr.f32.gmra.mrb[54].mxu1 %v750_v55  ;;  %2044 = vmatprep.mubr.f32.mxu0 %v759_v56  ;;  %v752_v55 = vld [vmem:[%s5558_s28 + $0x6f0] sm:$0xff] }
 0x21f   : > { %3072 = vmatprep.mubr.f32.mxu1 %v759_v56  ;;  %v761_v56 = vld [vmem:[%s5558_s28 + $0x738] sm:$0xff] }
 0x221   : > { %2045 = vmatmul.mubr.f32.gmra.mrb[56].mxu0 %v758_v57 }
 0x222   : > { %3073 = vmatmul.mubr.f32.gmra.mrb[56].mxu1 %v758_v57  ;;  %2050 = vmatprep.mubr.f32.mxu0 %v767_v58  ;;  %v760_v57 = vld [vmem:[%s5558_s28 + $0x730] sm:$0xff] }
 0x223   : > { %3078 = vmatprep.mubr.f32.mxu1 %v767_v58  ;;  %v769_v58 = vld [vmem:[%s5558_s28 + $0x778] sm:$0xff] }
 0x225   : > { %2051 = vmatmul.mubr.f32.gmra.mrb[58].mxu0 %v766_v59 }
 0x226   : > { %3079 = vmatmul.mubr.f32.gmra.mrb[58].mxu1 %v766_v59  ;;  %2056 = vmatprep.mubr.f32.mxu0 %v775_v60  ;;  %v768_v59 = vld [vmem:[%s5558_s28 + $0x770] sm:$0xff] }
 0x227   : > { %3084 = vmatprep.mubr.f32.mxu1 %v775_v60  ;;  %v777_v60 = vld [vmem:[%s5558_s28 + $0x7b8] sm:$0xff] }
 0x229   : > { %2057 = vmatmul.mubr.f32.gmra.mrb[60].mxu0 %v774_v61 }
 0x22a   : > { %3085 = vmatmul.mubr.f32.gmra.mrb[60].mxu1 %v774_v61  ;;  %2062 = vmatprep.mubr.f32.mxu0 %v783_v62  ;;  %v776_v61 = vld [vmem:[%s5558_s28 + $0x7b0] sm:$0xff] }
 0x22b   : > { %3090 = vmatprep.mubr.f32.mxu1 %v783_v62  ;;  %v785_v62 = vld [vmem:[%s5558_s28 + $0x7f8] sm:$0xff] }
 0x22d   : > { %2063 = vmatmul.mubr.f32.gmra.mrb[62].mxu0 %v782_v63 }
 0x22e   : > { %3091 = vmatmul.mubr.f32.gmra.mrb[62].mxu1 %v782_v63  ;;  %2133 = vmatprep.mubr.f32.mxu0 %v537_v0  ;;  %v784_v63 = vld [vmem:[%s5558_s28 + $0x7f0] sm:$0xff] }
 0x22f   : > { %3161 = vmatprep.mubr.f32.mxu1 %v537_v0  ;;  %v3743_v0 = vlaneseq }
 0x231   : > { %2134 = vmatmul.mubr.f32.vlgmr.msra.gmra.mrb[0].mxu0 %v536_v1 }
 0x232   : > { %3162 = vmatmul.mubr.f32.vlgmr.msra.gmra.mrb[0].mxu1 %v536_v1  ;;  %2139 = vmatprep.mubr.f32.mxu0 %v545_v2  ;;  %v3744_v1 = vshrl.u32 %v3743_v0, 7 }
 0x233   : > { %3167 = vmatprep.mubr.f32.mxu1 %v545_v2 }
 0x234   : > { %v3745_v2 = vsub.s32 0, %v3744_v1 }
 0x235   : > { %2140 = vmatmul.mubr.f32.gmra.mrb[2].mxu0 %v544_v3 }
 0x236   : > { %3168 = vmatmul.mubr.f32.gmra.mrb[2].mxu1 %v544_v3  ;;  %2145 = vmatprep.mubr.f32.mxu0 %v553_v4  ;;  %v3741_v3 = vld [vmem:[#allocation8] sm:$0xf] }
 0x237   : > { %3173 = vmatprep.mubr.f32.mxu1 %v553_v4  ;;  %v3753_v4 = vsub.s32 2, %v3744_v1 }
 0x239   : > { %2146 = vmatmul.mubr.f32.gmra.mrb[4].mxu0 %v552_v5 }
 0x23a   : > { %3174 = vmatmul.mubr.f32.gmra.mrb[4].mxu1 %v552_v5  ;;  %2151 = vmatprep.mubr.f32.mxu0 %v561_v6  ;;  %v3749_v5 = vsub.s32 1, %v3744_v1 }
 0x23b   : > { %3179 = vmatprep.mubr.f32.mxu1 %v561_v6  ;;  %v3757_v6 = vsub.s32 3, %v3744_v1 }
 0x23d   : > { %2152 = vmatmul.mubr.f32.gmra.mrb[6].mxu0 %v560_v7 }
 0x23e   : > { %3180 = vmatmul.mubr.f32.gmra.mrb[6].mxu1 %v560_v7  ;;  %2157 = vmatprep.mubr.f32.mxu0 %v569_v8  ;;  %v5825_v7 = vrot.slane %v3741_v3, %v3745_v2 }
 0x23f   : > { %3185 = vmatprep.mubr.f32.mxu1 %v569_v8  ;;  %v5827_v8 = vrot.slane %v3741_v3, %v3753_v4 }
 0x241   : > { %2158 = vmatmul.mubr.f32.gmra.mrb[8].mxu0 %v568_v9 }
 0x242   : > { %3186 = vmatmul.mubr.f32.gmra.mrb[8].mxu1 %v568_v9  ;;  %2163 = vmatprep.mubr.f32.mxu0 %v577_v10  ;;  %v5829_v9 = vrot.slane %v3741_v3, %v3749_v5 }
 0x243   : > { %3191 = vmatprep.mubr.f32.mxu1 %v577_v10  ;;  %v5831_v10 = vrot.slane %v3741_v3, %v3757_v6 }
 0x245   : > { %2164 = vmatmul.mubr.f32.gmra.mrb[10].mxu0 %v576_v11 }
 0x246   : > { %3192 = vmatmul.mubr.f32.gmra.mrb[10].mxu1 %v576_v11  ;;  %2169 = vmatprep.mubr.f32.mxu0 %v585_v12 }
 0x247   : > { %3197 = vmatprep.mubr.f32.mxu1 %v585_v12 }
 0x249   : > { %2170 = vmatmul.mubr.f32.gmra.mrb[12].mxu0 %v584_v13 }
 0x24a   : > { %3198 = vmatmul.mubr.f32.gmra.mrb[12].mxu1 %v584_v13  ;;  %2175 = vmatprep.mubr.f32.mxu0 %v593_v14 }
 0x24b   : > { %3203 = vmatprep.mubr.f32.mxu1 %v593_v14 }
 0x24d   : > { %2176 = vmatmul.mubr.f32.gmra.mrb[14].mxu0 %v592_v15 }
 0x24e   : > { %3204 = vmatmul.mubr.f32.gmra.mrb[14].mxu1 %v592_v15  ;;  %2181 = vmatprep.mubr.f32.mxu0 %v601_v16 }
 0x24f   : > { %3209 = vmatprep.mubr.f32.mxu1 %v601_v16 }
 0x251   : > { %2182 = vmatmul.mubr.f32.gmra.mrb[16].mxu0 %v600_v17 }
 0x252   : > { %3210 = vmatmul.mubr.f32.gmra.mrb[16].mxu1 %v600_v17  ;;  %2187 = vmatprep.mubr.f32.mxu0 %v609_v18 }
 0x253   : > { %3215 = vmatprep.mubr.f32.mxu1 %v609_v18 }
 0x255   : > { %2188 = vmatmul.mubr.f32.gmra.mrb[18].mxu0 %v608_v19 }
 0x256   : > { %3216 = vmatmul.mubr.f32.gmra.mrb[18].mxu1 %v608_v19  ;;  %2193 = vmatprep.mubr.f32.mxu0 %v617_v20 }
 0x257   : > { %3221 = vmatprep.mubr.f32.mxu1 %v617_v20 }
 0x259   : > { %2194 = vmatmul.mubr.f32.gmra.mrb[20].mxu0 %v616_v21 }
 0x25a   : > { %3222 = vmatmul.mubr.f32.gmra.mrb[20].mxu1 %v616_v21  ;;  %2199 = vmatprep.mubr.f32.mxu0 %v625_v22 }
 0x25b   : > { %3227 = vmatprep.mubr.f32.mxu1 %v625_v22 }
 0x25d   : > { %2200 = vmatmul.mubr.f32.gmra.mrb[22].mxu0 %v624_v23 }
 0x25e   : > { %3228 = vmatmul.mubr.f32.gmra.mrb[22].mxu1 %v624_v23  ;;  %2205 = vmatprep.mubr.f32.mxu0 %v633_v24 }
 0x25f   : > { %3233 = vmatprep.mubr.f32.mxu1 %v633_v24 }
 0x261   : > { %2206 = vmatmul.mubr.f32.gmra.mrb[24].mxu0 %v632_v25 }
 0x262   : > { %3234 = vmatmul.mubr.f32.gmra.mrb[24].mxu1 %v632_v25  ;;  %2211 = vmatprep.mubr.f32.mxu0 %v641_v26 }
 0x263   : > { %3239 = vmatprep.mubr.f32.mxu1 %v641_v26 }
 0x265   : > { %2212 = vmatmul.mubr.f32.gmra.mrb[26].mxu0 %v640_v27 }
 0x266   : > { %3240 = vmatmul.mubr.f32.gmra.mrb[26].mxu1 %v640_v27  ;;  %2217 = vmatprep.mubr.f32.mxu0 %v649_v28 }
 0x267   : > { %3245 = vmatprep.mubr.f32.mxu1 %v649_v28 }
 0x269   : > { %2218 = vmatmul.mubr.f32.gmra.mrb[28].mxu0 %v648_v29 }
 0x26a   : > { %3246 = vmatmul.mubr.f32.gmra.mrb[28].mxu1 %v648_v29  ;;  %2223 = vmatprep.mubr.f32.mxu0 %v657_v30 }
 0x26b   : > { %3251 = vmatprep.mubr.f32.mxu1 %v657_v30 }
 0x26d   : > { %2224 = vmatmul.mubr.f32.gmra.mrb[30].mxu0 %v656_v31 }
 0x26e   : > { %3252 = vmatmul.mubr.f32.gmra.mrb[30].mxu1 %v656_v31  ;;  %2229 = vmatprep.mubr.f32.mxu0 %v665_v32 }
 0x26f   : > { %3257 = vmatprep.mubr.f32.mxu1 %v665_v32 }
 0x271   : > { %2230 = vmatmul.mubr.f32.gmra.mrb[32].mxu0 %v664_v33 }
 0x272   : > { %3258 = vmatmul.mubr.f32.gmra.mrb[32].mxu1 %v664_v33  ;;  %2235 = vmatprep.mubr.f32.mxu0 %v673_v34 }
 0x273   : > { %3263 = vmatprep.mubr.f32.mxu1 %v673_v34 }
 0x275   : > { %2236 = vmatmul.mubr.f32.gmra.mrb[34].mxu0 %v672_v35 }
 0x276   : > { %3264 = vmatmul.mubr.f32.gmra.mrb[34].mxu1 %v672_v35  ;;  %2241 = vmatprep.mubr.f32.mxu0 %v681_v36 }
 0x277   : > { %3269 = vmatprep.mubr.f32.mxu1 %v681_v36 }
 0x279   : > { %2242 = vmatmul.mubr.f32.gmra.mrb[36].mxu0 %v680_v37 }
 0x27a   : > { %3270 = vmatmul.mubr.f32.gmra.mrb[36].mxu1 %v680_v37  ;;  %2247 = vmatprep.mubr.f32.mxu0 %v689_v38 }
 0x27b   : > { %3275 = vmatprep.mubr.f32.mxu1 %v689_v38 }
 0x27d   : > { %2248 = vmatmul.mubr.f32.gmra.mrb[38].mxu0 %v688_v39 }
 0x27e   : > { %3276 = vmatmul.mubr.f32.gmra.mrb[38].mxu1 %v688_v39  ;;  %2253 = vmatprep.mubr.f32.mxu0 %v697_v40 }
 0x27f   : > { %3281 = vmatprep.mubr.f32.mxu1 %v697_v40 }
 0x281   : > { %2254 = vmatmul.mubr.f32.gmra.mrb[40].mxu0 %v696_v41 }
 0x282   : > { %3282 = vmatmul.mubr.f32.gmra.mrb[40].mxu1 %v696_v41  ;;  %2259 = vmatprep.mubr.f32.mxu0 %v705_v42 }
 0x283   : > { %3287 = vmatprep.mubr.f32.mxu1 %v705_v42 }
 0x285   : > { %2260 = vmatmul.mubr.f32.gmra.mrb[42].mxu0 %v704_v43 }
 0x286   : > { %3288 = vmatmul.mubr.f32.gmra.mrb[42].mxu1 %v704_v43  ;;  %2265 = vmatprep.mubr.f32.mxu0 %v713_v44 }
 0x287   : > { %3293 = vmatprep.mubr.f32.mxu1 %v713_v44 }
 0x289   : > { %2266 = vmatmul.mubr.f32.gmra.mrb[44].mxu0 %v712_v45 }
 0x28a   : > { %3294 = vmatmul.mubr.f32.gmra.mrb[44].mxu1 %v712_v45  ;;  %2271 = vmatprep.mubr.f32.mxu0 %v721_v46 }
 0x28b   : > { %3299 = vmatprep.mubr.f32.mxu1 %v721_v46 }
 0x28d   : > { %2272 = vmatmul.mubr.f32.gmra.mrb[46].mxu0 %v720_v47 }
 0x28e   : > { %3300 = vmatmul.mubr.f32.gmra.mrb[46].mxu1 %v720_v47  ;;  %2277 = vmatprep.mubr.f32.mxu0 %v729_v48 }
 0x28f   : > { %3305 = vmatprep.mubr.f32.mxu1 %v729_v48 }
 0x291   : > { %2278 = vmatmul.mubr.f32.gmra.mrb[48].mxu0 %v728_v49 }
 0x292   : > { %3306 = vmatmul.mubr.f32.gmra.mrb[48].mxu1 %v728_v49  ;;  %2283 = vmatprep.mubr.f32.mxu0 %v737_v50 }
 0x293   : > { %3311 = vmatprep.mubr.f32.mxu1 %v737_v50 }
 0x295   : > { %2284 = vmatmul.mubr.f32.gmra.mrb[50].mxu0 %v736_v51 }
 0x296   : > { %3312 = vmatmul.mubr.f32.gmra.mrb[50].mxu1 %v736_v51  ;;  %2289 = vmatprep.mubr.f32.mxu0 %v745_v52 }
 0x297   : > { %3317 = vmatprep.mubr.f32.mxu1 %v745_v52 }
 0x299   : > { %2290 = vmatmul.mubr.f32.gmra.mrb[52].mxu0 %v744_v53 }
 0x29a   : > { %3318 = vmatmul.mubr.f32.gmra.mrb[52].mxu1 %v744_v53  ;;  %2295 = vmatprep.mubr.f32.mxu0 %v753_v54 }
 0x29b   : > { %3323 = vmatprep.mubr.f32.mxu1 %v753_v54 }
 0x29d   : > { %2296 = vmatmul.mubr.f32.gmra.mrb[54].mxu0 %v752_v55 }
 0x29e   : > { %3324 = vmatmul.mubr.f32.gmra.mrb[54].mxu1 %v752_v55  ;;  %2301 = vmatprep.mubr.f32.mxu0 %v761_v56 }
 0x29f   : > { %3329 = vmatprep.mubr.f32.mxu1 %v761_v56 }
 0x2a1   : > { %2302 = vmatmul.mubr.f32.gmra.mrb[56].mxu0 %v760_v57 }
 0x2a2   : > { %3330 = vmatmul.mubr.f32.gmra.mrb[56].mxu1 %v760_v57  ;;  %2307 = vmatprep.mubr.f32.mxu0 %v769_v58 }
 0x2a3   : > { %3335 = vmatprep.mubr.f32.mxu1 %v769_v58 }
 0x2a5   : > { %2308 = vmatmul.mubr.f32.gmra.mrb[58].mxu0 %v768_v59 }
 0x2a6   : > { %3336 = vmatmul.mubr.f32.gmra.mrb[58].mxu1 %v768_v59  ;;  %2313 = vmatprep.mubr.f32.mxu0 %v777_v60 }
 0x2a7   : > { %3341 = vmatprep.mubr.f32.mxu1 %v777_v60 }
 0x2a9   : > { %2314 = vmatmul.mubr.f32.gmra.mrb[60].mxu0 %v776_v61 }
 0x2aa   : > { %3342 = vmatmul.mubr.f32.gmra.mrb[60].mxu1 %v776_v61  ;;  %2319 = vmatprep.mubr.f32.mxu0 %v785_v62 }
 0x2ab   : > { %3347 = vmatprep.mubr.f32.mxu1 %v785_v62 }
 0x2ad   : > { %2320 = vmatmul.mubr.f32.gmra.mrb[62].mxu0 %v784_v63 }
 0x2ae   : > { %3348 = vmatmul.mubr.f32.gmra.mrb[62].mxu1 %v784_v63 }
 0x304   : > { %v2135_v11 = vpop.f32.mrb[0].mxu0 }
 0x305   : > { %v3763_v12 = vadd.f32 %v5825_v7, %v2135_v11  ;;  %v3163_v13 = vpop.f32.mrb[0].mxu1  ;;  %v2137_v14 = vpop.f32.mrb[1].mxu0 }
 0x306   : > { %v3765_v15 = vadd.f32 %v5827_v8, %v3163_v13  ;;  %v3764_v16 = vadd.f32 %v5829_v9, %v2137_v14  ;;  %v3165_v17 = vpop.f32.mrb[1].mxu1 }
 0x307   : > { %3891 = vst [vmem:[%s5836_s22] sm:$0xff] %v3763_v12  ;;  %v3766_v18 = vadd.f32 %v5831_v10, %v3165_v17 }
 0x308   : > { %3893 = vst [vmem:[%s5836_s22 + $0x10] sm:$0xff] %v3765_v15  ;;  %3892 = vst [vmem:[%s5836_s22 + $0x8] sm:$0xff] %v3764_v16  ;;  %v2141_v19 = vpop.f32.mrb[2].mxu0 }
 0x309   : > { %3894 = vst [vmem:[%s5836_s22 + $0x18] sm:$0xff] %v3766_v18  ;;  %v3767_v20 = vadd.f32 %v5825_v7, %v2141_v19  ;;  %v3169_v21 = vpop.f32.mrb[2].mxu1  ;;  %v2143_v22 = vpop.f32.mrb[3].mxu0 }
 0x30a   : > { %v3769_v23 = vadd.f32 %v5827_v8, %v3169_v21  ;;  %v3768_v24 = vadd.f32 %v5829_v9, %v2143_v22  ;;  %v3171_v25 = vpop.f32.mrb[3].mxu1 }
 0x30b   : > { %3895 = vst [vmem:[%s5836_s22 + $0x20] sm:$0xff] %v3767_v20  ;;  %v3770_v26 = vadd.f32 %v5831_v10, %v3171_v25 }
 0x30c   : > { %3897 = vst [vmem:[%s5836_s22 + $0x30] sm:$0xff] %v3769_v23  ;;  %3896 = vst [vmem:[%s5836_s22 + $0x28] sm:$0xff] %v3768_v24  ;;  %v2147_v27 = vpop.f32.mrb[4].mxu0 }
 0x30d   : > { %3898 = vst [vmem:[%s5836_s22 + $0x38] sm:$0xff] %v3770_v26  ;;  %v3771_v28 = vadd.f32 %v5825_v7, %v2147_v27  ;;  %v3175_v29 = vpop.f32.mrb[4].mxu1  ;;  %v2149_v30 = vpop.f32.mrb[5].mxu0 }
 0x30e   : > { %v3773_v31 = vadd.f32 %v5827_v8, %v3175_v29  ;;  %v3772_v32 = vadd.f32 %v5829_v9, %v2149_v30  ;;  %v3177_v33 = vpop.f32.mrb[5].mxu1 }
 0x30f   : > { %3899 = vst [vmem:[%s5836_s22 + $0x40] sm:$0xff] %v3771_v28  ;;  %v3774_v34 = vadd.f32 %v5831_v10, %v3177_v33 }
 0x310   : > { %3901 = vst [vmem:[%s5836_s22 + $0x50] sm:$0xff] %v3773_v31  ;;  %3900 = vst [vmem:[%s5836_s22 + $0x48] sm:$0xff] %v3772_v32  ;;  %v2153_v35 = vpop.f32.mrb[6].mxu0 }
 0x311   : > { %3902 = vst [vmem:[%s5836_s22 + $0x58] sm:$0xff] %v3774_v34  ;;  %v3775_v36 = vadd.f32 %v5825_v7, %v2153_v35  ;;  %v3181_v37 = vpop.f32.mrb[6].mxu1  ;;  %v2155_v38 = vpop.f32.mrb[7].mxu0 }
 0x312   : > { %v3777_v39 = vadd.f32 %v5827_v8, %v3181_v37  ;;  %v3776_v40 = vadd.f32 %v5829_v9, %v2155_v38  ;;  %v3183_v41 = vpop.f32.mrb[7].mxu1 }
 0x313   : > { %3903 = vst [vmem:[%s5836_s22 + $0x60] sm:$0xff] %v3775_v36  ;;  %v3778_v42 = vadd.f32 %v5831_v10, %v3183_v41 }
 0x314   : > { %3905 = vst [vmem:[%s5836_s22 + $0x70] sm:$0xff] %v3777_v39  ;;  %3904 = vst [vmem:[%s5836_s22 + $0x68] sm:$0xff] %v3776_v40  ;;  %v2159_v43 = vpop.f32.mrb[8].mxu0 }
 0x315   : > { %3906 = vst [vmem:[%s5836_s22 + $0x78] sm:$0xff] %v3778_v42  ;;  %v3779_v44 = vadd.f32 %v5825_v7, %v2159_v43  ;;  %v3187_v45 = vpop.f32.mrb[8].mxu1  ;;  %v2161_v46 = vpop.f32.mrb[9].mxu0 }
 0x316   : > { %v3781_v47 = vadd.f32 %v5827_v8, %v3187_v45  ;;  %v3780_v48 = vadd.f32 %v5829_v9, %v2161_v46  ;;  %v3189_v49 = vpop.f32.mrb[9].mxu1 }
 0x317   : > { %3907 = vst [vmem:[%s5836_s22 + $0x80] sm:$0xff] %v3779_v44  ;;  %v3782_v50 = vadd.f32 %v5831_v10, %v3189_v49 }
 0x318   : > { %3909 = vst [vmem:[%s5836_s22 + $0x90] sm:$0xff] %v3781_v47  ;;  %3908 = vst [vmem:[%s5836_s22 + $0x88] sm:$0xff] %v3780_v48  ;;  %v2165_v51 = vpop.f32.mrb[10].mxu0 }
 0x319   : > { %3910 = vst [vmem:[%s5836_s22 + $0x98] sm:$0xff] %v3782_v50  ;;  %v3783_v52 = vadd.f32 %v5825_v7, %v2165_v51  ;;  %v3193_v53 = vpop.f32.mrb[10].mxu1  ;;  %v2167_v54 = vpop.f32.mrb[11].mxu0 }
 0x31a   : > { %v3785_v55 = vadd.f32 %v5827_v8, %v3193_v53  ;;  %v3784_v56 = vadd.f32 %v5829_v9, %v2167_v54  ;;  %v3195_v57 = vpop.f32.mrb[11].mxu1 }
 0x31b   : > { %3911 = vst [vmem:[%s5836_s22 + $0xa0] sm:$0xff] %v3783_v52  ;;  %v3786_v58 = vadd.f32 %v5831_v10, %v3195_v57 }
 0x31c   : > { %3913 = vst [vmem:[%s5836_s22 + $0xb0] sm:$0xff] %v3785_v55  ;;  %3912 = vst [vmem:[%s5836_s22 + $0xa8] sm:$0xff] %v3784_v56  ;;  %v2171_v59 = vpop.f32.mrb[12].mxu0 }
 0x31d   : > { %3914 = vst [vmem:[%s5836_s22 + $0xb8] sm:$0xff] %v3786_v58  ;;  %v3787_v60 = vadd.f32 %v5825_v7, %v2171_v59  ;;  %v3199_v61 = vpop.f32.mrb[12].mxu1  ;;  %v2173_v62 = vpop.f32.mrb[13].mxu0 }
 0x31e   : > { %v3789_v63 = vadd.f32 %v5827_v8, %v3199_v61  ;;  %v3788_v0 = vadd.f32 %v5829_v9, %v2173_v62  ;;  %v3201_v1 = vpop.f32.mrb[13].mxu1 }
 0x31f   : > { %3915 = vst [vmem:[%s5836_s22 + $0xc0] sm:$0xff] %v3787_v60  ;;  %v3790_v2 = vadd.f32 %v5831_v10, %v3201_v1 }
 0x320   : > { %3917 = vst [vmem:[%s5836_s22 + $0xd0] sm:$0xff] %v3789_v63  ;;  %3916 = vst [vmem:[%s5836_s22 + $0xc8] sm:$0xff] %v3788_v0  ;;  %v2177_v3 = vpop.f32.mrb[14].mxu0 }
 0x321   : > { %3918 = vst [vmem:[%s5836_s22 + $0xd8] sm:$0xff] %v3790_v2  ;;  %v3791_v4 = vadd.f32 %v5825_v7, %v2177_v3  ;;  %v3205_v5 = vpop.f32.mrb[14].mxu1  ;;  %v2179_v6 = vpop.f32.mrb[15].mxu0 }
 0x322   : > { %v3793_v11 = vadd.f32 %v5827_v8, %v3205_v5  ;;  %v3792_v12 = vadd.f32 %v5829_v9, %v2179_v6  ;;  %v3207_v13 = vpop.f32.mrb[15].mxu1 }
 0x323   : > { %3919 = vst [vmem:[%s5836_s22 + $0xe0] sm:$0xff] %v3791_v4  ;;  %v3794_v14 = vadd.f32 %v5831_v10, %v3207_v13 }
 0x324   : > { %3921 = vst [vmem:[%s5836_s22 + $0xf0] sm:$0xff] %v3793_v11  ;;  %3920 = vst [vmem:[%s5836_s22 + $0xe8] sm:$0xff] %v3792_v12  ;;  %v2183_v15 = vpop.f32.mrb[16].mxu0 }
 0x325   : > { %3922 = vst [vmem:[%s5836_s22 + $0xf8] sm:$0xff] %v3794_v14  ;;  %v3795_v16 = vadd.f32 %v5825_v7, %v2183_v15  ;;  %v3211_v17 = vpop.f32.mrb[16].mxu1  ;;  %v2185_v18 = vpop.f32.mrb[17].mxu0 }
 0x326   : > { %v3797_v19 = vadd.f32 %v5827_v8, %v3211_v17  ;;  %v3796_v20 = vadd.f32 %v5829_v9, %v2185_v18  ;;  %v3213_v21 = vpop.f32.mrb[17].mxu1 }
 0x327   : > { %3923 = vst [vmem:[%s5836_s22 + $0x100] sm:$0xff] %v3795_v16  ;;  %v3798_v22 = vadd.f32 %v5831_v10, %v3213_v21 }
 0x328   : > { %3925 = vst [vmem:[%s5836_s22 + $0x110] sm:$0xff] %v3797_v19  ;;  %3924 = vst [vmem:[%s5836_s22 + $0x108] sm:$0xff] %v3796_v20  ;;  %v2189_v23 = vpop.f32.mrb[18].mxu0 }
 0x329   : > { %3926 = vst [vmem:[%s5836_s22 + $0x118] sm:$0xff] %v3798_v22  ;;  %v3799_v24 = vadd.f32 %v5825_v7, %v2189_v23  ;;  %v3217_v25 = vpop.f32.mrb[18].mxu1  ;;  %v2191_v26 = vpop.f32.mrb[19].mxu0 }
 0x32a   : > { %v3801_v27 = vadd.f32 %v5827_v8, %v3217_v25  ;;  %v3800_v28 = vadd.f32 %v5829_v9, %v2191_v26  ;;  %v3219_v29 = vpop.f32.mrb[19].mxu1 }
 0x32b   : > { %3927 = vst [vmem:[%s5836_s22 + $0x120] sm:$0xff] %v3799_v24  ;;  %v3802_v30 = vadd.f32 %v5831_v10, %v3219_v29 }
 0x32c   : > { %3929 = vst [vmem:[%s5836_s22 + $0x130] sm:$0xff] %v3801_v27  ;;  %3928 = vst [vmem:[%s5836_s22 + $0x128] sm:$0xff] %v3800_v28  ;;  %v2195_v31 = vpop.f32.mrb[20].mxu0 }
 0x32d   : > { %3930 = vst [vmem:[%s5836_s22 + $0x138] sm:$0xff] %v3802_v30  ;;  %v3803_v32 = vadd.f32 %v5825_v7, %v2195_v31  ;;  %v3223_v33 = vpop.f32.mrb[20].mxu1  ;;  %v2197_v34 = vpop.f32.mrb[21].mxu0 }
 0x32e   : > { %v3805_v35 = vadd.f32 %v5827_v8, %v3223_v33  ;;  %v3804_v36 = vadd.f32 %v5829_v9, %v2197_v34  ;;  %v3225_v37 = vpop.f32.mrb[21].mxu1 }
 0x32f   : > { %3931 = vst [vmem:[%s5836_s22 + $0x140] sm:$0xff] %v3803_v32  ;;  %v3806_v38 = vadd.f32 %v5831_v10, %v3225_v37 }
 0x330   : > { %3933 = vst [vmem:[%s5836_s22 + $0x150] sm:$0xff] %v3805_v35  ;;  %3932 = vst [vmem:[%s5836_s22 + $0x148] sm:$0xff] %v3804_v36  ;;  %v2201_v39 = vpop.f32.mrb[22].mxu0 }
 0x331   : > { %3934 = vst [vmem:[%s5836_s22 + $0x158] sm:$0xff] %v3806_v38  ;;  %v3807_v40 = vadd.f32 %v5825_v7, %v2201_v39  ;;  %v3229_v41 = vpop.f32.mrb[22].mxu1  ;;  %v2203_v42 = vpop.f32.mrb[23].mxu0 }
 0x332   : > { %v3809_v43 = vadd.f32 %v5827_v8, %v3229_v41  ;;  %v3808_v44 = vadd.f32 %v5829_v9, %v2203_v42  ;;  %v3231_v45 = vpop.f32.mrb[23].mxu1 }
 0x333   : > { %3935 = vst [vmem:[%s5836_s22 + $0x160] sm:$0xff] %v3807_v40  ;;  %v3810_v46 = vadd.f32 %v5831_v10, %v3231_v45 }
 0x334   : > { %3937 = vst [vmem:[%s5836_s22 + $0x170] sm:$0xff] %v3809_v43  ;;  %3936 = vst [vmem:[%s5836_s22 + $0x168] sm:$0xff] %v3808_v44  ;;  %v2207_v47 = vpop.f32.mrb[24].mxu0 }
 0x335   : > { %3938 = vst [vmem:[%s5836_s22 + $0x178] sm:$0xff] %v3810_v46  ;;  %v3811_v48 = vadd.f32 %v5825_v7, %v2207_v47  ;;  %v3235_v49 = vpop.f32.mrb[24].mxu1  ;;  %v2209_v50 = vpop.f32.mrb[25].mxu0 }
 0x336   : > { %v3813_v51 = vadd.f32 %v5827_v8, %v3235_v49  ;;  %v3812_v52 = vadd.f32 %v5829_v9, %v2209_v50  ;;  %v3237_v53 = vpop.f32.mrb[25].mxu1 }
 0x337   : > { %3939 = vst [vmem:[%s5836_s22 + $0x180] sm:$0xff] %v3811_v48  ;;  %v3814_v54 = vadd.f32 %v5831_v10, %v3237_v53 }
 0x338   : > { %3941 = vst [vmem:[%s5836_s22 + $0x190] sm:$0xff] %v3813_v51  ;;  %3940 = vst [vmem:[%s5836_s22 + $0x188] sm:$0xff] %v3812_v52  ;;  %v2213_v55 = vpop.f32.mrb[26].mxu0 }
 0x339   : > { %3942 = vst [vmem:[%s5836_s22 + $0x198] sm:$0xff] %v3814_v54  ;;  %v3815_v56 = vadd.f32 %v5825_v7, %v2213_v55  ;;  %v3241_v57 = vpop.f32.mrb[26].mxu1  ;;  %v2215_v58 = vpop.f32.mrb[27].mxu0 }
 0x33a   : > { %v3817_v59 = vadd.f32 %v5827_v8, %v3241_v57  ;;  %v3816_v60 = vadd.f32 %v5829_v9, %v2215_v58  ;;  %v3243_v61 = vpop.f32.mrb[27].mxu1 }
 0x33b   : > { %3943 = vst [vmem:[%s5836_s22 + $0x1a0] sm:$0xff] %v3815_v56  ;;  %v3818_v62 = vadd.f32 %v5831_v10, %v3243_v61 }
 0x33c   : > { %3945 = vst [vmem:[%s5836_s22 + $0x1b0] sm:$0xff] %v3817_v59  ;;  %3944 = vst [vmem:[%s5836_s22 + $0x1a8] sm:$0xff] %v3816_v60  ;;  %v2219_v63 = vpop.f32.mrb[28].mxu0 }
 0x33d   : > { %3946 = vst [vmem:[%s5836_s22 + $0x1b8] sm:$0xff] %v3818_v62  ;;  %v3819_v0 = vadd.f32 %v5825_v7, %v2219_v63  ;;  %v3247_v1 = vpop.f32.mrb[28].mxu1  ;;  %v2221_v2 = vpop.f32.mrb[29].mxu0 }
 0x33e   : > { %v3821_v3 = vadd.f32 %v5827_v8, %v3247_v1  ;;  %v3820_v4 = vadd.f32 %v5829_v9, %v2221_v2  ;;  %v3249_v5 = vpop.f32.mrb[29].mxu1 }
 0x33f   : > { %3947 = vst [vmem:[%s5836_s22 + $0x1c0] sm:$0xff] %v3819_v0  ;;  %v3822_v6 = vadd.f32 %v5831_v10, %v3249_v5 }
 0x340   : > { %3949 = vst [vmem:[%s5836_s22 + $0x1d0] sm:$0xff] %v3821_v3  ;;  %3948 = vst [vmem:[%s5836_s22 + $0x1c8] sm:$0xff] %v3820_v4  ;;  %v2225_v11 = vpop.f32.mrb[30].mxu0 }
 0x341   : > { %3950 = vst [vmem:[%s5836_s22 + $0x1d8] sm:$0xff] %v3822_v6  ;;  %v3823_v12 = vadd.f32 %v5825_v7, %v2225_v11  ;;  %v3253_v13 = vpop.f32.mrb[30].mxu1  ;;  %v2227_v14 = vpop.f32.mrb[31].mxu0 }
 0x342   : > { %v3825_v15 = vadd.f32 %v5827_v8, %v3253_v13  ;;  %v3824_v16 = vadd.f32 %v5829_v9, %v2227_v14  ;;  %v3255_v17 = vpop.f32.mrb[31].mxu1 }
 0x343   : > { %3951 = vst [vmem:[%s5836_s22 + $0x1e0] sm:$0xff] %v3823_v12  ;;  %v3826_v18 = vadd.f32 %v5831_v10, %v3255_v17 }
 0x344   : > { %3953 = vst [vmem:[%s5836_s22 + $0x1f0] sm:$0xff] %v3825_v15  ;;  %3952 = vst [vmem:[%s5836_s22 + $0x1e8] sm:$0xff] %v3824_v16  ;;  %v2231_v19 = vpop.f32.mrb[32].mxu0 }
 0x345   : > { %3954 = vst [vmem:[%s5836_s22 + $0x1f8] sm:$0xff] %v3826_v18  ;;  %v3827_v20 = vadd.f32 %v5825_v7, %v2231_v19  ;;  %v3259_v21 = vpop.f32.mrb[32].mxu1  ;;  %v2233_v22 = vpop.f32.mrb[33].mxu0 }
 0x346   : > { %v3829_v23 = vadd.f32 %v5827_v8, %v3259_v21  ;;  %v3828_v24 = vadd.f32 %v5829_v9, %v2233_v22  ;;  %v3261_v25 = vpop.f32.mrb[33].mxu1 }
 0x347   : > { %3955 = vst [vmem:[%s5836_s22 + $0x200] sm:$0xff] %v3827_v20  ;;  %v3830_v26 = vadd.f32 %v5831_v10, %v3261_v25 }
 0x348   : > { %3957 = vst [vmem:[%s5836_s22 + $0x210] sm:$0xff] %v3829_v23  ;;  %3956 = vst [vmem:[%s5836_s22 + $0x208] sm:$0xff] %v3828_v24  ;;  %v2237_v27 = vpop.f32.mrb[34].mxu0 }
 0x349   : > { %3958 = vst [vmem:[%s5836_s22 + $0x218] sm:$0xff] %v3830_v26  ;;  %v3831_v28 = vadd.f32 %v5825_v7, %v2237_v27  ;;  %v3265_v29 = vpop.f32.mrb[34].mxu1  ;;  %v2239_v30 = vpop.f32.mrb[35].mxu0 }
 0x34a   : > { %v3833_v31 = vadd.f32 %v5827_v8, %v3265_v29  ;;  %v3832_v32 = vadd.f32 %v5829_v9, %v2239_v30  ;;  %v3267_v33 = vpop.f32.mrb[35].mxu1 }
 0x34b   : > { %3959 = vst [vmem:[%s5836_s22 + $0x220] sm:$0xff] %v3831_v28  ;;  %v3834_v34 = vadd.f32 %v5831_v10, %v3267_v33 }
 0x34c   : > { %3961 = vst [vmem:[%s5836_s22 + $0x230] sm:$0xff] %v3833_v31  ;;  %3960 = vst [vmem:[%s5836_s22 + $0x228] sm:$0xff] %v3832_v32  ;;  %v2243_v35 = vpop.f32.mrb[36].mxu0 }
 0x34d   : > { %3962 = vst [vmem:[%s5836_s22 + $0x238] sm:$0xff] %v3834_v34  ;;  %v3835_v36 = vadd.f32 %v5825_v7, %v2243_v35  ;;  %v3271_v37 = vpop.f32.mrb[36].mxu1  ;;  %v2245_v38 = vpop.f32.mrb[37].mxu0 }
 0x34e   : > { %v3837_v39 = vadd.f32 %v5827_v8, %v3271_v37  ;;  %v3836_v40 = vadd.f32 %v5829_v9, %v2245_v38  ;;  %v3273_v41 = vpop.f32.mrb[37].mxu1 }
 0x34f   : > { %3963 = vst [vmem:[%s5836_s22 + $0x240] sm:$0xff] %v3835_v36  ;;  %v3838_v42 = vadd.f32 %v5831_v10, %v3273_v41 }
 0x350   : > { %3965 = vst [vmem:[%s5836_s22 + $0x250] sm:$0xff] %v3837_v39  ;;  %3964 = vst [vmem:[%s5836_s22 + $0x248] sm:$0xff] %v3836_v40  ;;  %v2249_v43 = vpop.f32.mrb[38].mxu0 }
 0x351   : > { %3966 = vst [vmem:[%s5836_s22 + $0x258] sm:$0xff] %v3838_v42  ;;  %v3839_v44 = vadd.f32 %v5825_v7, %v2249_v43  ;;  %v3277_v45 = vpop.f32.mrb[38].mxu1  ;;  %v2251_v46 = vpop.f32.mrb[39].mxu0 }
 0x352   : > { %v3841_v47 = vadd.f32 %v5827_v8, %v3277_v45  ;;  %v3840_v48 = vadd.f32 %v5829_v9, %v2251_v46  ;;  %v3279_v49 = vpop.f32.mrb[39].mxu1 }
 0x353   : > { %3967 = vst [vmem:[%s5836_s22 + $0x260] sm:$0xff] %v3839_v44  ;;  %v3842_v50 = vadd.f32 %v5831_v10, %v3279_v49 }
 0x354   : > { %3969 = vst [vmem:[%s5836_s22 + $0x270] sm:$0xff] %v3841_v47  ;;  %3968 = vst [vmem:[%s5836_s22 + $0x268] sm:$0xff] %v3840_v48  ;;  %v2255_v51 = vpop.f32.mrb[40].mxu0 }
 0x355   : > { %3970 = vst [vmem:[%s5836_s22 + $0x278] sm:$0xff] %v3842_v50  ;;  %v3843_v52 = vadd.f32 %v5825_v7, %v2255_v51  ;;  %v3283_v53 = vpop.f32.mrb[40].mxu1  ;;  %v2257_v54 = vpop.f32.mrb[41].mxu0 }
 0x356   : > { %v3845_v55 = vadd.f32 %v5827_v8, %v3283_v53  ;;  %v3844_v56 = vadd.f32 %v5829_v9, %v2257_v54  ;;  %v3285_v57 = vpop.f32.mrb[41].mxu1 }
 0x357   : > { %3971 = vst [vmem:[%s5836_s22 + $0x280] sm:$0xff] %v3843_v52  ;;  %v3846_v58 = vadd.f32 %v5831_v10, %v3285_v57 }
 0x358   : > { %3973 = vst [vmem:[%s5836_s22 + $0x290] sm:$0xff] %v3845_v55  ;;  %3972 = vst [vmem:[%s5836_s22 + $0x288] sm:$0xff] %v3844_v56  ;;  %v2261_v59 = vpop.f32.mrb[42].mxu0 }
 0x359   : > { %3974 = vst [vmem:[%s5836_s22 + $0x298] sm:$0xff] %v3846_v58  ;;  %v3847_v60 = vadd.f32 %v5825_v7, %v2261_v59  ;;  %v3289_v61 = vpop.f32.mrb[42].mxu1  ;;  %v2263_v62 = vpop.f32.mrb[43].mxu0 }
 0x35a   : > { %v3849_v63 = vadd.f32 %v5827_v8, %v3289_v61  ;;  %v3848_v0 = vadd.f32 %v5829_v9, %v2263_v62  ;;  %v3291_v1 = vpop.f32.mrb[43].mxu1 }
 0x35b   : > { %3975 = vst [vmem:[%s5836_s22 + $0x2a0] sm:$0xff] %v3847_v60  ;;  %v3850_v2 = vadd.f32 %v5831_v10, %v3291_v1 }
 0x35c   : > { %3977 = vst [vmem:[%s5836_s22 + $0x2b0] sm:$0xff] %v3849_v63  ;;  %3976 = vst [vmem:[%s5836_s22 + $0x2a8] sm:$0xff] %v3848_v0  ;;  %v2267_v3 = vpop.f32.mrb[44].mxu0 }
 0x35d   : > { %3978 = vst [vmem:[%s5836_s22 + $0x2b8] sm:$0xff] %v3850_v2  ;;  %v3851_v4 = vadd.f32 %v5825_v7, %v2267_v3  ;;  %v3295_v5 = vpop.f32.mrb[44].mxu1  ;;  %v2269_v6 = vpop.f32.mrb[45].mxu0 }
 0x35e   : > { %v3853_v11 = vadd.f32 %v5827_v8, %v3295_v5  ;;  %v3852_v12 = vadd.f32 %v5829_v9, %v2269_v6  ;;  %v3297_v13 = vpop.f32.mrb[45].mxu1 }
 0x35f   : > { %3979 = vst [vmem:[%s5836_s22 + $0x2c0] sm:$0xff] %v3851_v4  ;;  %v3854_v14 = vadd.f32 %v5831_v10, %v3297_v13 }
 0x360   : > { %3981 = vst [vmem:[%s5836_s22 + $0x2d0] sm:$0xff] %v3853_v11  ;;  %3980 = vst [vmem:[%s5836_s22 + $0x2c8] sm:$0xff] %v3852_v12  ;;  %v2273_v15 = vpop.f32.mrb[46].mxu0 }
 0x361   : > { %3982 = vst [vmem:[%s5836_s22 + $0x2d8] sm:$0xff] %v3854_v14  ;;  %v3855_v16 = vadd.f32 %v5825_v7, %v2273_v15  ;;  %v3301_v17 = vpop.f32.mrb[46].mxu1  ;;  %v2275_v18 = vpop.f32.mrb[47].mxu0 }
 0x362   : > { %v3857_v19 = vadd.f32 %v5827_v8, %v3301_v17  ;;  %v3856_v20 = vadd.f32 %v5829_v9, %v2275_v18  ;;  %v3303_v21 = vpop.f32.mrb[47].mxu1 }
 0x363   : > { %3983 = vst [vmem:[%s5836_s22 + $0x2e0] sm:$0xff] %v3855_v16  ;;  %v3858_v22 = vadd.f32 %v5831_v10, %v3303_v21 }
 0x364   : > { %3985 = vst [vmem:[%s5836_s22 + $0x2f0] sm:$0xff] %v3857_v19  ;;  %3984 = vst [vmem:[%s5836_s22 + $0x2e8] sm:$0xff] %v3856_v20  ;;  %v2279_v23 = vpop.f32.mrb[48].mxu0 }
 0x365   : > { %3986 = vst [vmem:[%s5836_s22 + $0x2f8] sm:$0xff] %v3858_v22  ;;  %v3859_v24 = vadd.f32 %v5825_v7, %v2279_v23  ;;  %v3307_v25 = vpop.f32.mrb[48].mxu1  ;;  %v2281_v26 = vpop.f32.mrb[49].mxu0 }
 0x366   : > { %v3861_v27 = vadd.f32 %v5827_v8, %v3307_v25  ;;  %v3860_v28 = vadd.f32 %v5829_v9, %v2281_v26  ;;  %v3309_v29 = vpop.f32.mrb[49].mxu1 }
 0x367   : > { %3987 = vst [vmem:[%s5836_s22 + $0x300] sm:$0xff] %v3859_v24  ;;  %v3862_v30 = vadd.f32 %v5831_v10, %v3309_v29 }
 0x368   : > { %3989 = vst [vmem:[%s5836_s22 + $0x310] sm:$0xff] %v3861_v27  ;;  %3988 = vst [vmem:[%s5836_s22 + $0x308] sm:$0xff] %v3860_v28  ;;  %v2285_v31 = vpop.f32.mrb[50].mxu0 }
 0x369   : > { %3990 = vst [vmem:[%s5836_s22 + $0x318] sm:$0xff] %v3862_v30  ;;  %v3863_v32 = vadd.f32 %v5825_v7, %v2285_v31  ;;  %v3313_v33 = vpop.f32.mrb[50].mxu1  ;;  %v2287_v34 = vpop.f32.mrb[51].mxu0 }
 0x36a   : > { %v3865_v35 = vadd.f32 %v5827_v8, %v3313_v33  ;;  %v3864_v36 = vadd.f32 %v5829_v9, %v2287_v34  ;;  %v3315_v37 = vpop.f32.mrb[51].mxu1 }
 0x36b   : > { %3991 = vst [vmem:[%s5836_s22 + $0x320] sm:$0xff] %v3863_v32  ;;  %v3866_v38 = vadd.f32 %v5831_v10, %v3315_v37 }
 0x36c   : > { %3993 = vst [vmem:[%s5836_s22 + $0x330] sm:$0xff] %v3865_v35  ;;  %3992 = vst [vmem:[%s5836_s22 + $0x328] sm:$0xff] %v3864_v36  ;;  %v2291_v39 = vpop.f32.mrb[52].mxu0 }
 0x36d   : > { %3994 = vst [vmem:[%s5836_s22 + $0x338] sm:$0xff] %v3866_v38  ;;  %v3867_v40 = vadd.f32 %v5825_v7, %v2291_v39  ;;  %v3319_v41 = vpop.f32.mrb[52].mxu1  ;;  %v2293_v42 = vpop.f32.mrb[53].mxu0 }
 0x36e   : > { %v3869_v43 = vadd.f32 %v5827_v8, %v3319_v41  ;;  %v3868_v44 = vadd.f32 %v5829_v9, %v2293_v42  ;;  %v3321_v45 = vpop.f32.mrb[53].mxu1 }
 0x36f   : > { %3995 = vst [vmem:[%s5836_s22 + $0x340] sm:$0xff] %v3867_v40  ;;  %v3870_v46 = vadd.f32 %v5831_v10, %v3321_v45 }
 0x370   : > { %3997 = vst [vmem:[%s5836_s22 + $0x350] sm:$0xff] %v3869_v43  ;;  %3996 = vst [vmem:[%s5836_s22 + $0x348] sm:$0xff] %v3868_v44  ;;  %v2297_v47 = vpop.f32.mrb[54].mxu0 }
 0x371   : > { %3998 = vst [vmem:[%s5836_s22 + $0x358] sm:$0xff] %v3870_v46  ;;  %v3871_v48 = vadd.f32 %v5825_v7, %v2297_v47  ;;  %v3325_v49 = vpop.f32.mrb[54].mxu1  ;;  %v2299_v50 = vpop.f32.mrb[55].mxu0 }
 0x372   : > { %v3873_v51 = vadd.f32 %v5827_v8, %v3325_v49  ;;  %v3872_v52 = vadd.f32 %v5829_v9, %v2299_v50  ;;  %v3327_v53 = vpop.f32.mrb[55].mxu1 }
 0x373   : > { %3999 = vst [vmem:[%s5836_s22 + $0x360] sm:$0xff] %v3871_v48  ;;  %v3874_v54 = vadd.f32 %v5831_v10, %v3327_v53 }
 0x374   : > { %4001 = vst [vmem:[%s5836_s22 + $0x370] sm:$0xff] %v3873_v51  ;;  %4000 = vst [vmem:[%s5836_s22 + $0x368] sm:$0xff] %v3872_v52  ;;  %v2303_v55 = vpop.f32.mrb[56].mxu0 }
 0x375   : > { %4002 = vst [vmem:[%s5836_s22 + $0x378] sm:$0xff] %v3874_v54  ;;  %v3875_v56 = vadd.f32 %v5825_v7, %v2303_v55  ;;  %v3331_v57 = vpop.f32.mrb[56].mxu1  ;;  %v2305_v58 = vpop.f32.mrb[57].mxu0 }
 0x376   : > { %v3877_v59 = vadd.f32 %v5827_v8, %v3331_v57  ;;  %v3876_v60 = vadd.f32 %v5829_v9, %v2305_v58  ;;  %v3333_v61 = vpop.f32.mrb[57].mxu1 }
 0x377   : > { %4003 = vst [vmem:[%s5836_s22 + $0x380] sm:$0xff] %v3875_v56  ;;  %v3878_v62 = vadd.f32 %v5831_v10, %v3333_v61 }
 0x378   : > { %4005 = vst [vmem:[%s5836_s22 + $0x390] sm:$0xff] %v3877_v59  ;;  %4004 = vst [vmem:[%s5836_s22 + $0x388] sm:$0xff] %v3876_v60  ;;  %v2309_v63 = vpop.f32.mrb[58].mxu0 }
 0x379   : > { %4006 = vst [vmem:[%s5836_s22 + $0x398] sm:$0xff] %v3878_v62  ;;  %v3879_v0 = vadd.f32 %v5825_v7, %v2309_v63  ;;  %v3337_v1 = vpop.f32.mrb[58].mxu1  ;;  %v2311_v2 = vpop.f32.mrb[59].mxu0 }
 0x37a   : > { %v3881_v3 = vadd.f32 %v5827_v8, %v3337_v1  ;;  %v3880_v4 = vadd.f32 %v5829_v9, %v2311_v2  ;;  %v3339_v5 = vpop.f32.mrb[59].mxu1 }
 0x37b   : > { %4007 = vst [vmem:[%s5836_s22 + $0x3a0] sm:$0xff] %v3879_v0  ;;  %v3882_v6 = vadd.f32 %v5831_v10, %v3339_v5 }
 0x37c   : > { %4009 = vst [vmem:[%s5836_s22 + $0x3b0] sm:$0xff] %v3881_v3  ;;  %4008 = vst [vmem:[%s5836_s22 + $0x3a8] sm:$0xff] %v3880_v4  ;;  %v2315_v11 = vpop.f32.mrb[60].mxu0 }
 0x37d   : > { %4010 = vst [vmem:[%s5836_s22 + $0x3b8] sm:$0xff] %v3882_v6  ;;  %v3883_v12 = vadd.f32 %v5825_v7, %v2315_v11  ;;  %v3343_v13 = vpop.f32.mrb[60].mxu1  ;;  %v2317_v14 = vpop.f32.mrb[61].mxu0 }
 0x37e   : > { %v3885_v15 = vadd.f32 %v5827_v8, %v3343_v13  ;;  %v3884_v16 = vadd.f32 %v5829_v9, %v2317_v14  ;;  %v3345_v17 = vpop.f32.mrb[61].mxu1 }
 0x37f   : > { %4011 = vst [vmem:[%s5836_s22 + $0x3c0] sm:$0xff] %v3883_v12  ;;  %v3886_v18 = vadd.f32 %v5831_v10, %v3345_v17 }
 0x380   : > { %4013 = vst [vmem:[%s5836_s22 + $0x3d0] sm:$0xff] %v3885_v15  ;;  %4012 = vst [vmem:[%s5836_s22 + $0x3c8] sm:$0xff] %v3884_v16  ;;  %v2321_v19 = vpop.f32.mrb[62].mxu0 }
 0x381   : > { %4014 = vst [vmem:[%s5836_s22 + $0x3d8] sm:$0xff] %v3886_v18  ;;  %v3887_v20 = vadd.f32 %v5825_v7, %v2321_v19  ;;  %v3349_v21 = vpop.f32.mrb[62].mxu1  ;;  %v2323_v22 = vpop.f32.mrb[63].mxu0 }
 0x382   : > { %v3889_v23 = vadd.f32 %v5827_v8, %v3349_v21  ;;  %v3888_v24 = vadd.f32 %v5829_v9, %v2323_v22  ;;  %v3351_v25 = vpop.f32.mrb[63].mxu1 }
 0x383   : > { %4015 = vst [vmem:[%s5836_s22 + $0x3e0] sm:$0xff] %v3887_v20  ;;  %v3890_v7 = vadd.f32 %v5831_v10, %v3351_v25 }
 0x384   : > { %4017 = vst [vmem:[%s5836_s22 + $0x3f0] sm:$0xff] %v3889_v23  ;;  %4016 = vst [vmem:[%s5836_s22 + $0x3e8] sm:$0xff] %v3888_v24 }
 0x385   : > { %4018 = vst [vmem:[%s5836_s22 + $0x3f8] sm:$0xff] %v3890_v7 }
 0x386   : > { %5261 = shalt.err (!%p5258_p11)
}
 0x387   : > { %s5262_s9 = scalar_lea.hbm %s6091_s8, 16384  ;;  %s5266_s29 = scalar_lea.hbm %s6150_s3, 32768 }
 0x388   : > { %p5263_p0 = scmp.ne.s32.totalorder %s6091_s8, %s5262_s9  ;;  %p5267_p6 = scmp.lt.u32.totalorder %s6091_s8, %s6150_s3 }
 0x389   : > { %p5268_p7 = scmp.lt.u32.totalorder %s5266_s29, %s5262_s9  ;;  %p5270_p8 = scmp.lt.u32.totalorder %s5262_s9, %s6091_s8 }
 0x38a   : > { %p5264_p4 = pnand %p5263_p0, %p6165_p12 }
 0x38b   : > { %p5269_p2 = por %p5268_p7, %p5267_p6 }
 0x38c   : > { %p5265_p13 = pneg %p5264_p4 }
 0x38d   : > { %p5271_p1 = por %p5270_p8, %p5269_p2 }
 0x38f   : > { %p5272_p10 = pnand %p5271_p1, %p5265_p13 }
 0x391   : > { %5275 = shalt.err (!%p5272_p10)
}
 0x392   : > { %s5344_s22 = smov 512   ;;  %s5345_s24 = smov 32  }
 0x393   : > { %5083 = dma.vmem_to_hbm [thread:$0]  (%p6165_p12), %s6093_s6, 16384, %s6091_s8, %s4020_s26, %s5344_s22, %s5344_s22, %s5345_s24  }
 0x394 PF: > { %s4051_s15 = sand.u32 1, %s5314_s12   ;;  %p6166_p3 = scmp.ne.s32.totalorder %s6158_s23, 0 }
 0x395   : > { %p6167_p5 = scmp.ge.s32.totalorder %s5334_s17, 2  ;;  %s4052_s7 = scalar_lea.sflag [#allocation5], %s4051_s15 }
 0x397   : > { %p5097_p9 = pnand %p6167_p5, %p6166_p3 }
 0x399   : > { %5309 = dma.done.wait (!%p5097_p9), %s4052_s7, 16384  }
 0x39a   : > { %5311 = vsyncadd (!%p5097_p9), %s4052_s7, 4294950912  ;;  %s20_s17 = sadd.s32 1, %s5334_s17   ;;  %s6168_s12 = smov %s5318_s13 }
 0x39b   : > { %p17_p11 = scmp.ge.s32.totalorder %s20_s17, 4   ;;  %s6169_s13 = smov %s5322_s14 }
 0x39c   : > { %s6170_s14 = smov %s5508_s30  ;;  %s6171_s15 = smov %s5330_s16 }
 0x39d   : > { %s6172_s16 = smov %s6174_s11  ;;  %19 = sbr.rel (!%p17_p11) target bundleno = 7 (0x7), region = 95 }
 0x3a4   :  { %4057 = vsyncpa [#allocation4], 1 }
 0x3a5   :  { %4059 = vsyncpa [#allocation4 + $0x1], 1 }
 0x3a6   :  { %4060 = vsyncpa [#allocation7], 1 }
 0x3a7   :  { %4061 = vsyncpa [#allocation5], 1 }
 0x3a8   :  { %4063 = vsyncpa [#allocation5 + $0x1], 1 }

</bundles_post_ra>
